<compile_context>
chip_gen: v7x
topology: tpu7x:2x2x1
jax: 0.10.0
libtpu: 0.0.40
codegen_flags: <defaults>
</compile_context>

<pallas_src>
import functools

import jax
import jax.numpy as jnp
from jax import lax
from jax.experimental import pallas as pl
from jax.experimental.pallas import tpu as pltpu

LANE = 128
NEG_INF = -1e30
LOG2 = 0.6931471805599453


def _leaky_relu(x, slope=0.2):
    return jnp.where(x >= 0.0, x, slope * x)


def _softplus_neg(x):
    # softplus(-x) = max(-x, 0) + log(1 + exp(-|x|)), numerically stable
    return jnp.maximum(-x, 0.0) + jnp.log(1.0 + jnp.exp(-jnp.abs(x)))


# --------------------------- fused forward kernel ---------------------------
def fused_forward_kernel(*refs, heads, num_layers, concat_flags, f_outs,
                         num_nodes, num_graphs):
    x_ref, adj_ref, posm_ref = refs[0:3]
    idx = 3
    gat_refs = []
    for _ in range(num_layers):
        gat_refs.append(refs[idx:idx + 3])
        idx += 3
    local_refs = refs[idx:idx + 8]
    idx += 8
    global_refs = refs[idx:idx + 8]
    idx += 8
    out_ref = refs[idx]                  # [1, 1] loss
    m_ref = refs[idx + 1]                # VMEM scratch [N, num_layers*LANE]

    # Additive adjacency bias built ONCE from the int8 adjacency:
    # 0 where edge j->i (incl. self loop), -1e30 elsewhere.
    adj_f = adj_ref[...].astype(jnp.float32)
    adj_bias = jnp.where(adj_f > 0.5, 0.0, NEG_INF)           # [N, N]

    lane = lax.broadcasted_iota(jnp.int32, (1, LANE), 1)       # [1, 128] lane id

    def gat_layer(h_in, w_ref, att_ref, bias_ref, f_out, concat):
        # Projection: both heads packed into one 128-lane block; head hd's
        # features live in columns [hd*f_out, (hd+1)*f_out).
        w = w_ref[...].astype(jnp.float32)                     # bf16 -> f32
        h = jnp.dot(h_in, w, preferred_element_type=jnp.float32)    # [N, 128]
        # All per-head attention coefficients in one matmul:
        #   column hd       -> a_src (head hd)
        #   column heads+hd -> a_dst (head hd)
        att_w = att_ref[...].astype(jnp.float32)
        att = jnp.dot(h, att_w, preferred_element_type=jnp.float32)  # [N, 128]

        parts = []
        for hd in range(heads):                                # static unroll
            a_src = att[:, hd:hd + 1]                          # [N, 1]
            a_dst = att[:, heads + hd:heads + hd + 1]          # [N, 1]
            # e[i, j] = leaky_relu(a_dst[i] + a_src[j]) + adj_bias[i, j]
            e = _leaky_relu(a_dst + jnp.transpose(a_src)) + adj_bias
            m = jnp.max(e, axis=1, keepdims=True)
            p = jnp.exp(e - m)
            inv = pl.reciprocal(jnp.sum(p, axis=1, keepdims=True), approx=False)
            alpha = p * inv                                    # masked softmax
            # Aggregate on the full packed block; head selection happens below.
            parts.append(jnp.dot(alpha, h, preferred_element_type=jnp.float32))

        if concat:
            # out[:, hd*f_out:(hd+1)*f_out] comes from parts[hd] (its own cols);
            # columns beyond heads*f_out are exactly zero (h is zero there).
            out = parts[0]
            for hd in range(1, heads):
                out = jnp.where(lane >= hd * f_out, parts[hd], out)
        else:
            # Mean over heads: realign head hd's columns [hd*f_out, ...) to
            # [0, f_out) with a lane rotation, sum, scale, mask.
            acc = parts[0]
            for hd in range(1, heads):
                acc = acc + pltpu.roll(parts[hd],
                                       shift=(-hd * f_out) % LANE, axis=1)
            out = jnp.where(lane < f_out, acc * (1.0 / float(heads)), 0.0)
        out = out + bias_ref[...]
        return jnp.maximum(out, 0.0)                           # ReLU

    h = x_ref[...]
    for l in range(num_layers):
        w_ref, att_ref, bias_ref = gat_refs[l]
        h = gat_layer(h, w_ref, att_ref, bias_ref, f_outs[l], concat_flags[l])
        # Write this layer's 128-lane block of M straight into VMEM scratch
        # (replaces jnp.concatenate of per-layer activations).
        m_ref[:, l * LANE:(l + 1) * LANE] = h
    m_feat = m_ref[...]                                        # [N, L*128]

    # global_add_pool: y[b] = sum_{i in graph b} M[i] (transposed contraction
    # straight on the MXU; no pos_mask^T input needed).
    y = lax.dot_general(posm_ref[...], m_feat, (((0,), (0,)), ((), ())),
                        preferred_element_type=jnp.float32)    # [B, L*128]

    def ff(xin, prefs):
        w1, b1, w2, b2, w3, b3, ws, bs = prefs
        hh = jnp.maximum(
            jnp.dot(xin, w1[...].astype(jnp.float32),
                    preferred_element_type=jnp.float32) + b1[...], 0.0)
        hh = jnp.maximum(
            jnp.dot(hh, w2[...].astype(jnp.float32),
                    preferred_element_type=jnp.float32) + b2[...], 0.0)
        hh = jnp.maximum(
            jnp.dot(hh, w3[...].astype(jnp.float32),
                    preferred_element_type=jnp.float32) + b3[...], 0.0)
        sc = jnp.dot(xin, ws[...].astype(jnp.float32),
                     preferred_element_type=jnp.float32) + bs[...]
        return hh + sc

    l_enc = ff(m_feat, local_refs)    # [N, 128] (valid cols 0..emb_dim-1, rest 0)
    g_enc = ff(y, global_refs)        # [B, 128]

    # res = l_enc @ g_enc.T : zero-padded feature columns contribute nothing
    res = lax.dot_general(l_enc, g_enc, (((1,), (1,)), ((), ())),
                          preferred_element_type=jnp.float32)  # [N, B]

    pos_mask = posm_ref[...]
    neg_mask = 1.0 - pos_mask
    sp = _softplus_neg(res)           # softplus(-res), one transcendental pass
    s_pos = jnp.sum(pos_mask * sp, axis=(0, 1), keepdims=True)
    s_neg = jnp.sum(neg_mask * (sp + res), axis=(0, 1), keepdims=True)
    n_pos = jnp.sum(pos_mask, axis=(0, 1), keepdims=True)
    total = float(num_nodes * num_graphs)
    # masked-out entries of the reference contribute softplus(0) = log(2)
    e_pos = (-s_pos - (total - n_pos) * LOG2) / float(num_nodes)
    e_neg = (s_neg + n_pos * LOG2) / float(num_nodes * (num_graphs - 1))
    out_ref[...] = e_neg - e_pos


# ------------------------------ parameter init ------------------------------
def _xavier_uniform(key, shape, fan_in, fan_out):
    a = (6.0 / (fan_in + fan_out)) ** 0.5
    return jax.random.uniform(key, shape, jnp.float32, -a, a)


def init_params(key, *, num_features, num_classes, hidden, heads, num_layers):
    emb_dim = hidden * heads * (num_layers - 1) + num_classes
    assert heads * max(hidden, num_classes) <= LANE
    assert num_features <= LANE

    keys = iter(jax.random.split(key, 4 * num_layers + 8))

    gat = []
    concat_flags = []
    f_outs = []
    m_pos = []                         # valid (logical) feature positions of M
    f_in = num_features
    for i in range(num_layers):
        concat = i < num_layers - 1
        f_out = hidden if concat else num_classes
        concat_flags.append(concat)
        f_outs.append(f_out)

        w = _xavier_uniform(next(keys), (f_in, heads * f_out), f_in, heads * f_out)
        asrc = _xavier_uniform(next(keys), (f_out, heads), heads, f_out)
        adst = _xavier_uniform(next(keys), (f_out, heads), heads, f_out)

        # Pack BOTH heads into one 128-lane block:
        #   head hd's output features -> columns [hd*f_out, (hd+1)*f_out)
        w_p = jnp.zeros((LANE, LANE), jnp.float32).at[:f_in, :heads * f_out].set(w)
        att_p = jnp.zeros((LANE, LANE), jnp.float32)
        for hd in range(heads):
            att_p = att_p.at[hd * f_out:(hd + 1) * f_out, hd].set(asrc[:, hd])
            att_p = att_p.at[hd * f_out:(hd + 1) * f_out, heads + hd].set(adst[:, hd])
        bias_p = jnp.zeros((1, LANE), jnp.float32)   # GATConv bias init: zeros
        gat.append(dict(w=w_p.astype(jnp.bfloat16),  # bf16: halve weight DMA
                        att=att_p.astype(jnp.bfloat16),
                        bias=bias_p))

        width = heads * f_out if concat else f_out   # valid output columns
        m_pos.extend(i * LANE + c for c in range(width))
        f_in = width

    m_width_p = num_layers * LANE
    m_pos_arr = jnp.array(m_pos, jnp.int32)
    assert len(m_pos) == emb_dim

    def ff_params(k):
        ks = jax.random.split(k, 4)

        def wide(kk):     # [emb, emb] -> padded bf16 [m_width_p, LANE]
            w = _xavier_uniform(kk, (emb_dim, emb_dim), emb_dim, emb_dim)
            return jnp.zeros((m_width_p, LANE), jnp.float32).at[
                m_pos_arr, :emb_dim].set(w).astype(jnp.bfloat16)

        def inner(kk):    # [emb, emb] -> padded bf16 [LANE, LANE]
            w = _xavier_uniform(kk, (emb_dim, emb_dim), emb_dim, emb_dim)
            return jnp.zeros((LANE, LANE), jnp.float32).at[
                :emb_dim, :emb_dim].set(w).astype(jnp.bfloat16)

        zb = jnp.zeros((1, LANE), jnp.float32)       # init_emb(): biases -> 0
        return dict(w1=wide(ks[0]), b1=zb, w2=inner(ks[1]), b2=zb,
                    w3=inner(ks[2]), b3=zb, ws=wide(ks[3]), bs=zb)

    params = dict(gat=gat, local_d=ff_params(next(keys)),
                  global_d=ff_params(next(keys)))
    return params, emb_dim, tuple(concat_flags), tuple(f_outs)


# ------------------------------ full forward --------------------------------
def gat_forward(x, adj, pos_mask, params, concat_flags, f_outs, *, heads):
    n, b = pos_mask.shape
    assert b > 1, "local_global_loss_ divides by (num_graphs - 1)"
    num_features = x.shape[1]
    assert num_features <= LANE

    num_layers = len(params['gat'])
    m_width_p = num_layers * LANE

    # host-side, one-time preparation
    x_p = jnp.zeros((n, LANE), jnp.float32).at[:, :num_features].set(x)
    # PyG GATConv adds self-loops itself; enforce them so every softmax row
    # has at least one valid entry (isolated nodes would otherwise silently
    # attend uniformly over non-neighbours).
    adj_sl = jnp.maximum(adj, jnp.eye(n, dtype=adj.dtype))
    adj_i8 = (adj_sl > 0).astype(jnp.int8)           # 4x smaller O(N^2) input
    posm = pos_mask.astype(jnp.float32)

    args = [x_p, adj_i8, posm]
    for lp in params['gat']:
        args += [lp['w'], lp['att'], lp['bias']]
    for p in (params['local_d'], params['global_d']):
        args += [p['w1'], p['b1'], p['w2'], p['b2'],
                 p['w3'], p['b3'], p['ws'], p['bs']]

    kernel = functools.partial(
        fused_forward_kernel, heads=heads, num_layers=num_layers,
        concat_flags=tuple(concat_flags), f_outs=tuple(f_outs),
        num_nodes=n, num_graphs=b)

    # Right-sized scoped-VMEM limit: everything is resident exactly once
    # (single grid point, no pipelining), plus generous headroom for
    # compiler temporaries.
    arg_bytes = sum(int(a.size) * a.dtype.itemsize for a in args)
    scratch_bytes = n * m_width_p * 4
    vmem_limit = int(2 * (arg_bytes + scratch_bytes)) + (4 << 20)

    out = pl.pallas_call(
        kernel,
        out_shape=jax.ShapeDtypeStruct((1, 1), jnp.float32),
        in_specs=[pl.BlockSpec(memory_space=pltpu.MemorySpace.VMEM)] * len(args),
        out_specs=pl.BlockSpec(memory_space=pltpu.MemorySpace.VMEM),
        scratch_shapes=[pltpu.VMEM((n, m_width_p), jnp.float32)],
        compiler_params=pltpu.CompilerParams(vmem_limit_bytes=vmem_limit),
    )(*args)
    return out[0, 0]


# --------------------------------- main --------------------------------------
if __name__ == "__main__":
    # synthetic "dataset" configuration
    num_features = 8
    num_classes = 4
    hidden_channels = 16
    num_gat_layers = 3
    heads = 2

    nodes_per_graph = 8
    num_graphs = 3
    n_nodes = nodes_per_graph * num_graphs

    # batch vector + dense adjacency (ring within each graph; self-loops are
    # added inside gat_forward, matching PyG GATConv behaviour)
    batch_list = []
    adj_list = [[0.0] * n_nodes for _ in range(n_nodes)]
    for g in range(num_graphs):
        off = g * nodes_per_graph
        for i in range(nodes_per_graph):
            batch_list.append(g)
            a = off + i
            b = off + (i + 1) % nodes_per_graph
            adj_list[a][b] = 1.0
            adj_list[b][a] = 1.0

    adj = jnp.array(adj_list, jnp.float32)                           # [N, N]
    batch = jnp.array(batch_list, jnp.int32)                         # [N]
    pos_mask = jax.nn.one_hot(batch, num_graphs, dtype=jnp.float32)  # [N, B]

    key = jax.random.PRNGKey(0)
    k_param, k_x = jax.random.split(key)
    params, emb_dim, concat_flags, f_outs = init_params(
        k_param, num_features=num_features, num_classes=num_classes,
        hidden=hidden_channels, heads=heads, num_layers=num_gat_layers)

    x = jax.random.normal(k_x, (n_nodes, num_features), jnp.float32)

    loss = gat_forward(x, adj, pos_mask, params, concat_flags, f_outs,
                       heads=heads)
    jax.block_until_ready(loss)
    assert loss.shape == () and bool(jnp.isfinite(loss))
    print("KERNEL_OK")
</pallas_src>

<mosaic_0001>
module attributes {stable_mosaic.version = 11 : i64} {
  func.func @fused_forward_kernel(%arg0: memref<24x128xf32, #tpu.memory_space<vmem>>, %arg1: memref<24x24xi8, #tpu.memory_space<vmem>>, %arg2: memref<24x3xf32, #tpu.memory_space<vmem>>, %arg3: memref<128x128xbf16, #tpu.memory_space<vmem>>, %arg4: memref<128x128xbf16, #tpu.memory_space<vmem>>, %arg5: memref<1x128xf32, #tpu.memory_space<vmem>>, %arg6: memref<128x128xbf16, #tpu.memory_space<vmem>>, %arg7: memref<128x128xbf16, #tpu.memory_space<vmem>>, %arg8: memref<1x128xf32, #tpu.memory_space<vmem>>, %arg9: memref<128x128xbf16, #tpu.memory_space<vmem>>, %arg10: memref<128x128xbf16, #tpu.memory_space<vmem>>, %arg11: memref<1x128xf32, #tpu.memory_space<vmem>>, %arg12: memref<384x128xbf16, #tpu.memory_space<vmem>>, %arg13: memref<1x128xf32, #tpu.memory_space<vmem>>, %arg14: memref<128x128xbf16, #tpu.memory_space<vmem>>, %arg15: memref<1x128xf32, #tpu.memory_space<vmem>>, %arg16: memref<128x128xbf16, #tpu.memory_space<vmem>>, %arg17: memref<1x128xf32, #tpu.memory_space<vmem>>, %arg18: memref<384x128xbf16, #tpu.memory_space<vmem>>, %arg19: memref<1x128xf32, #tpu.memory_space<vmem>>, %arg20: memref<384x128xbf16, #tpu.memory_space<vmem>>, %arg21: memref<1x128xf32, #tpu.memory_space<vmem>>, %arg22: memref<128x128xbf16, #tpu.memory_space<vmem>>, %arg23: memref<1x128xf32, #tpu.memory_space<vmem>>, %arg24: memref<128x128xbf16, #tpu.memory_space<vmem>>, %arg25: memref<1x128xf32, #tpu.memory_space<vmem>>, %arg26: memref<384x128xbf16, #tpu.memory_space<vmem>>, %arg27: memref<1x128xf32, #tpu.memory_space<vmem>>, %arg28: memref<1x1xf32, #tpu.memory_space<vmem>>, %arg29: memref<24x384xf32, #tpu.memory_space<vmem>>) attributes {dimension_semantics = [], scalar_prefetch = 0 : i64, scratch_operands = 1 : i64, tpu.core_type = #tpu.core_type<tc>} {
    %c0 = arith.constant 0 : index
    %c0_0 = arith.constant 0 : index
    %0 = vector.load %arg1[%c0, %c0_0] : memref<24x24xi8, #tpu.memory_space<vmem>>, vector<24x24xi8>
    %1 = arith.sitofp %0 : vector<24x24xi8> to vector<24x24xf32>
    %cst = arith.constant 5.000000e-01 : f32
    %2 = vector.broadcast %cst : f32 to vector<24x24xf32>
    %3 = arith.cmpf ogt, %1, %2 : vector<24x24xf32>
    %cst_1 = arith.constant 0.000000e+00 : f32
    %cst_2 = arith.constant -1.000000e+30 : f32
    %4 = vector.broadcast %cst_1 : f32 to vector<24x24xf32>
    %5 = vector.broadcast %cst_2 : f32 to vector<24x24xf32>
    %6 = arith.select %3, %4, %5 : vector<24x24xi1>, vector<24x24xf32>
    %7 = tpu.iota {dimensions = array<i32: 1>} : vector<1x128xi32>
    %c0_3 = arith.constant 0 : index
    %c0_4 = arith.constant 0 : index
    %8 = vector.load %arg0[%c0_3, %c0_4] : memref<24x128xf32, #tpu.memory_space<vmem>>, vector<24x128xf32>
    %c0_5 = arith.constant 0 : index
    %c0_6 = arith.constant 0 : index
    %9 = vector.load %arg3[%c0_5, %c0_6] : memref<128x128xbf16, #tpu.memory_space<vmem>>, vector<128x128xbf16>
    %10 = arith.extf %9 : vector<128x128xbf16> to vector<128x128xf32>
    %cst_7 = arith.constant dense<0.000000e+00> : vector<24x128xf32>
    %11 = tpu.matmul %8, %10, %cst_7 {dimension_numbers = #tpu.dot_dimension_numbers<[1], [0], [0], [1], [0, 0, 1, 1], [], []>} : vector<24x128xf32>, vector<128x128xf32>, vector<24x128xf32> -> vector<24x128xf32>
    %c0_8 = arith.constant 0 : index
    %c0_9 = arith.constant 0 : index
    %12 = vector.load %arg4[%c0_8, %c0_9] : memref<128x128xbf16, #tpu.memory_space<vmem>>, vector<128x128xbf16>
    %13 = arith.extf %12 : vector<128x128xbf16> to vector<128x128xf32>
    %cst_10 = arith.constant dense<0.000000e+00> : vector<24x128xf32>
    %14 = tpu.matmul %11, %13, %cst_10 {dimension_numbers = #tpu.dot_dimension_numbers<[1], [0], [0], [1], [0, 0, 1, 1], [], []>} : vector<24x128xf32>, vector<128x128xf32>, vector<24x128xf32> -> vector<24x128xf32>
    %15 = vector.extract_strided_slice %14 {offsets = [0, 0], sizes = [24, 1], strides = [1, 1]} : vector<24x128xf32> to vector<24x1xf32>
    %16 = vector.extract_strided_slice %14 {offsets = [0, 2], sizes = [24, 1], strides = [1, 1]} : vector<24x128xf32> to vector<24x1xf32>
    %17 = tpu.transpose %15, [1, 0] : vector<24x1xf32> -> vector<1x24xf32>
    %18 = vector.broadcast %16 : vector<24x1xf32> to vector<24x24xf32>
    %19 = vector.broadcast %17 : vector<1x24xf32> to vector<24x24xf32>
    %20 = arith.addf %18, %19 : vector<24x24xf32>
    %cst_11 = arith.constant 0.000000e+00 : f32
    %21 = vector.broadcast %cst_11 : f32 to vector<24x24xf32>
    %22 = arith.cmpf oge, %20, %21 : vector<24x24xf32>
    %cst_12 = arith.constant 2.000000e-01 : f32
    %23 = vector.broadcast %cst_12 : f32 to vector<24x24xf32>
    %24 = arith.mulf %23, %20 : vector<24x24xf32>
    %25 = arith.select %22, %20, %24 : vector<24x24xi1>, vector<24x24xf32>
    %26 = arith.addf %25, %6 : vector<24x24xf32>
    %cst_13 = arith.constant dense<0xFF800000> : vector<24xf32>
    %27 = vector.multi_reduction <maximumf>, %26, %cst_13 [1] : vector<24x24xf32> to vector<24xf32>
    %28 = vector.shape_cast %27 : vector<24xf32> to vector<24x1xf32>
    %29 = vector.broadcast %28 : vector<24x1xf32> to vector<24x24xf32>
    %30 = arith.subf %26, %29 : vector<24x24xf32>
    %31 = math.exp %30 : vector<24x24xf32>
    %cst_14 = arith.constant dense<0.000000e+00> : vector<24xf32>
    %32 = vector.multi_reduction <add>, %31, %cst_14 [1] : vector<24x24xf32> to vector<24xf32>
    %33 = vector.shape_cast %32 : vector<24xf32> to vector<24x1xf32>
    %34 = tpu.reciprocal %33 : vector<24x1xf32> -> vector<24x1xf32>
    %35 = vector.broadcast %34 : vector<24x1xf32> to vector<24x24xf32>
    %36 = arith.mulf %31, %35 : vector<24x24xf32>
    %cst_15 = arith.constant dense<0.000000e+00> : vector<24x128xf32>
    %37 = tpu.matmul %36, %11, %cst_15 {dimension_numbers = #tpu.dot_dimension_numbers<[1], [0], [0], [1], [0, 0, 1, 1], [], []>} : vector<24x24xf32>, vector<24x128xf32>, vector<24x128xf32> -> vector<24x128xf32>
    %38 = vector.extract_strided_slice %14 {offsets = [0, 1], sizes = [24, 1], strides = [1, 1]} : vector<24x128xf32> to vector<24x1xf32>
    %39 = vector.extract_strided_slice %14 {offsets = [0, 3], sizes = [24, 1], strides = [1, 1]} : vector<24x128xf32> to vector<24x1xf32>
    %40 = tpu.transpose %38, [1, 0] : vector<24x1xf32> -> vector<1x24xf32>
    %41 = vector.broadcast %39 : vector<24x1xf32> to vector<24x24xf32>
    %42 = vector.broadcast %40 : vector<1x24xf32> to vector<24x24xf32>
    %43 = arith.addf %41, %42 : vector<24x24xf32>
    %cst_16 = arith.constant 0.000000e+00 : f32
    %44 = vector.broadcast %cst_16 : f32 to vector<24x24xf32>
    %45 = arith.cmpf oge, %43, %44 : vector<24x24xf32>
    %cst_17 = arith.constant 2.000000e-01 : f32
    %46 = vector.broadcast %cst_17 : f32 to vector<24x24xf32>
    %47 = arith.mulf %46, %43 : vector<24x24xf32>
    %48 = arith.select %45, %43, %47 : vector<24x24xi1>, vector<24x24xf32>
    %49 = arith.addf %48, %6 : vector<24x24xf32>
    %cst_18 = arith.constant dense<0xFF800000> : vector<24xf32>
    %50 = vector.multi_reduction <maximumf>, %49, %cst_18 [1] : vector<24x24xf32> to vector<24xf32>
    %51 = vector.shape_cast %50 : vector<24xf32> to vector<24x1xf32>
    %52 = vector.broadcast %51 : vector<24x1xf32> to vector<24x24xf32>
    %53 = arith.subf %49, %52 : vector<24x24xf32>
    %54 = math.exp %53 : vector<24x24xf32>
    %cst_19 = arith.constant dense<0.000000e+00> : vector<24xf32>
    %55 = vector.multi_reduction <add>, %54, %cst_19 [1] : vector<24x24xf32> to vector<24xf32>
    %56 = vector.shape_cast %55 : vector<24xf32> to vector<24x1xf32>
    %57 = tpu.reciprocal %56 : vector<24x1xf32> -> vector<24x1xf32>
    %58 = vector.broadcast %57 : vector<24x1xf32> to vector<24x24xf32>
    %59 = arith.mulf %54, %58 : vector<24x24xf32>
    %cst_20 = arith.constant dense<0.000000e+00> : vector<24x128xf32>
    %60 = tpu.matmul %59, %11, %cst_20 {dimension_numbers = #tpu.dot_dimension_numbers<[1], [0], [0], [1], [0, 0, 1, 1], [], []>} : vector<24x24xf32>, vector<24x128xf32>, vector<24x128xf32> -> vector<24x128xf32>
    %c16_i32 = arith.constant 16 : i32
    %61 = vector.broadcast %c16_i32 : i32 to vector<1x128xi32>
    %62 = arith.cmpi sge, %7, %61 : vector<1x128xi32>
    %63 = vector.shape_cast %62 : vector<1x128xi1> to vector<1x128xi1>
    %64 = vector.broadcast %63 : vector<1x128xi1> to vector<24x128xi1>
    %65 = arith.select %64, %60, %37 : vector<24x128xi1>, vector<24x128xf32>
    %c0_21 = arith.constant 0 : index
    %c0_22 = arith.constant 0 : index
    %66 = vector.load %arg5[%c0_21, %c0_22] : memref<1x128xf32, #tpu.memory_space<vmem>>, vector<1x128xf32>
    %67 = vector.broadcast %66 : vector<1x128xf32> to vector<24x128xf32>
    %68 = arith.addf %65, %67 : vector<24x128xf32>
    %cst_23 = arith.constant 0.000000e+00 : f32
    %69 = vector.broadcast %cst_23 : f32 to vector<24x128xf32>
    %70 = arith.maximumf %68, %69 : vector<24x128xf32>
    %c0_24 = arith.constant 0 : index
    %c0_25 = arith.constant 0 : index
    %71 = vector.load %arg29[%c0_24, %c0_25] : memref<24x384xf32, #tpu.memory_space<vmem>>, vector<24x128xf32>
    tpu.vector_store %arg29[%c0_24, %c0_25], %70 {strides = array<i32>} : memref<24x384xf32, #tpu.memory_space<vmem>>, vector<24x128xf32>,
    %c0_26 = arith.constant 0 : index
    %c0_27 = arith.constant 0 : index
    %72 = vector.load %arg6[%c0_26, %c0_27] : memref<128x128xbf16, #tpu.memory_space<vmem>>, vector<128x128xbf16>
    %73 = arith.extf %72 : vector<128x128xbf16> to vector<128x128xf32>
    %cst_28 = arith.constant dense<0.000000e+00> : vector<24x128xf32>
    %74 = tpu.matmul %70, %73, %cst_28 {dimension_numbers = #tpu.dot_dimension_numbers<[1], [0], [0], [1], [0, 0, 1, 1], [], []>} : vector<24x128xf32>, vector<128x128xf32>, vector<24x128xf32> -> vector<24x128xf32>
    %c0_29 = arith.constant 0 : index
    %c0_30 = arith.constant 0 : index
    %75 = vector.load %arg7[%c0_29, %c0_30] : memref<128x128xbf16, #tpu.memory_space<vmem>>, vector<128x128xbf16>
    %76 = arith.extf %75 : vector<128x128xbf16> to vector<128x128xf32>
    %cst_31 = arith.constant dense<0.000000e+00> : vector<24x128xf32>
    %77 = tpu.matmul %74, %76, %cst_31 {dimension_numbers = #tpu.dot_dimension_numbers<[1], [0], [0], [1], [0, 0, 1, 1], [], []>} : vector<24x128xf32>, vector<128x128xf32>, vector<24x128xf32> -> vector<24x128xf32>
    %78 = vector.extract_strided_slice %77 {offsets = [0, 0], sizes = [24, 1], strides = [1, 1]} : vector<24x128xf32> to vector<24x1xf32>
    %79 = vector.extract_strided_slice %77 {offsets = [0, 2], sizes = [24, 1], strides = [1, 1]} : vector<24x128xf32> to vector<24x1xf32>
    %80 = tpu.transpose %78, [1, 0] : vector<24x1xf32> -> vector<1x24xf32>
    %81 = vector.broadcast %79 : vector<24x1xf32> to vector<24x24xf32>
    %82 = vector.broadcast %80 : vector<1x24xf32> to vector<24x24xf32>
    %83 = arith.addf %81, %82 : vector<24x24xf32>
    %cst_32 = arith.constant 0.000000e+00 : f32
    %84 = vector.broadcast %cst_32 : f32 to vector<24x24xf32>
    %85 = arith.cmpf oge, %83, %84 : vector<24x24xf32>
    %cst_33 = arith.constant 2.000000e-01 : f32
    %86 = vector.broadcast %cst_33 : f32 to vector<24x24xf32>
    %87 = arith.mulf %86, %83 : vector<24x24xf32>
    %88 = arith.select %85, %83, %87 : vector<24x24xi1>, vector<24x24xf32>
    %89 = arith.addf %88, %6 : vector<24x24xf32>
    %cst_34 = arith.constant dense<0xFF800000> : vector<24xf32>
    %90 = vector.multi_reduction <maximumf>, %89, %cst_34 [1] : vector<24x24xf32> to vector<24xf32>
    %91 = vector.shape_cast %90 : vector<24xf32> to vector<24x1xf32>
    %92 = vector.broadcast %91 : vector<24x1xf32> to vector<24x24xf32>
    %93 = arith.subf %89, %92 : vector<24x24xf32>
    %94 = math.exp %93 : vector<24x24xf32>
    %cst_35 = arith.constant dense<0.000000e+00> : vector<24xf32>
    %95 = vector.multi_reduction <add>, %94, %cst_35 [1] : vector<24x24xf32> to vector<24xf32>
    %96 = vector.shape_cast %95 : vector<24xf32> to vector<24x1xf32>
    %97 = tpu.reciprocal %96 : vector<24x1xf32> -> vector<24x1xf32>
    %98 = vector.broadcast %97 : vector<24x1xf32> to vector<24x24xf32>
    %99 = arith.mulf %94, %98 : vector<24x24xf32>
    %cst_36 = arith.constant dense<0.000000e+00> : vector<24x128xf32>
    %100 = tpu.matmul %99, %74, %cst_36 {dimension_numbers = #tpu.dot_dimension_numbers<[1], [0], [0], [1], [0, 0, 1, 1], [], []>} : vector<24x24xf32>, vector<24x128xf32>, vector<24x128xf32> -> vector<24x128xf32>
    %101 = vector.extract_strided_slice %77 {offsets = [0, 1], sizes = [24, 1], strides = [1, 1]} : vector<24x128xf32> to vector<24x1xf32>
    %102 = vector.extract_strided_slice %77 {offsets = [0, 3], sizes = [24, 1], strides = [1, 1]} : vector<24x128xf32> to vector<24x1xf32>
    %103 = tpu.transpose %101, [1, 0] : vector<24x1xf32> -> vector<1x24xf32>
    %104 = vector.broadcast %102 : vector<24x1xf32> to vector<24x24xf32>
    %105 = vector.broadcast %103 : vector<1x24xf32> to vector<24x24xf32>
    %106 = arith.addf %104, %105 : vector<24x24xf32>
    %cst_37 = arith.constant 0.000000e+00 : f32
    %107 = vector.broadcast %cst_37 : f32 to vector<24x24xf32>
    %108 = arith.cmpf oge, %106, %107 : vector<24x24xf32>
    %cst_38 = arith.constant 2.000000e-01 : f32
    %109 = vector.broadcast %cst_38 : f32 to vector<24x24xf32>
    %110 = arith.mulf %109, %106 : vector<24x24xf32>
    %111 = arith.select %108, %106, %110 : vector<24x24xi1>, vector<24x24xf32>
    %112 = arith.addf %111, %6 : vector<24x24xf32>
    %cst_39 = arith.constant dense<0xFF800000> : vector<24xf32>
    %113 = vector.multi_reduction <maximumf>, %112, %cst_39 [1] : vector<24x24xf32> to vector<24xf32>
    %114 = vector.shape_cast %113 : vector<24xf32> to vector<24x1xf32>
    %115 = vector.broadcast %114 : vector<24x1xf32> to vector<24x24xf32>
    %116 = arith.subf %112, %115 : vector<24x24xf32>
    %117 = math.exp %116 : vector<24x24xf32>
    %cst_40 = arith.constant dense<0.000000e+00> : vector<24xf32>
    %118 = vector.multi_reduction <add>, %117, %cst_40 [1] : vector<24x24xf32> to vector<24xf32>
    %119 = vector.shape_cast %118 : vector<24xf32> to vector<24x1xf32>
    %120 = tpu.reciprocal %119 : vector<24x1xf32> -> vector<24x1xf32>
    %121 = vector.broadcast %120 : vector<24x1xf32> to vector<24x24xf32>
    %122 = arith.mulf %117, %121 : vector<24x24xf32>
    %cst_41 = arith.constant dense<0.000000e+00> : vector<24x128xf32>
    %123 = tpu.matmul %122, %74, %cst_41 {dimension_numbers = #tpu.dot_dimension_numbers<[1], [0], [0], [1], [0, 0, 1, 1], [], []>} : vector<24x24xf32>, vector<24x128xf32>, vector<24x128xf32> -> vector<24x128xf32>
    %c16_i32_42 = arith.constant 16 : i32
    %124 = vector.broadcast %c16_i32_42 : i32 to vector<1x128xi32>
    %125 = arith.cmpi sge, %7, %124 : vector<1x128xi32>
    %126 = vector.shape_cast %125 : vector<1x128xi1> to vector<1x128xi1>
    %127 = vector.broadcast %126 : vector<1x128xi1> to vector<24x128xi1>
    %128 = arith.select %127, %123, %100 : vector<24x128xi1>, vector<24x128xf32>
    %c0_43 = arith.constant 0 : index
    %c0_44 = arith.constant 0 : index
    %129 = vector.load %arg8[%c0_43, %c0_44] : memref<1x128xf32, #tpu.memory_space<vmem>>, vector<1x128xf32>
    %130 = vector.broadcast %129 : vector<1x128xf32> to vector<24x128xf32>
    %131 = arith.addf %128, %130 : vector<24x128xf32>
    %cst_45 = arith.constant 0.000000e+00 : f32
    %132 = vector.broadcast %cst_45 : f32 to vector<24x128xf32>
    %133 = arith.maximumf %131, %132 : vector<24x128xf32>
    %c0_46 = arith.constant 0 : index
    %c128 = arith.constant 128 : index
    %134 = vector.load %arg29[%c0_46, %c128] : memref<24x384xf32, #tpu.memory_space<vmem>>, vector<24x128xf32>
    tpu.vector_store %arg29[%c0_46, %c128], %133 {strides = array<i32>} : memref<24x384xf32, #tpu.memory_space<vmem>>, vector<24x128xf32>,
    %c0_47 = arith.constant 0 : index
    %c0_48 = arith.constant 0 : index
    %135 = vector.load %arg9[%c0_47, %c0_48] : memref<128x128xbf16, #tpu.memory_space<vmem>>, vector<128x128xbf16>
    %136 = arith.extf %135 : vector<128x128xbf16> to vector<128x128xf32>
    %cst_49 = arith.constant dense<0.000000e+00> : vector<24x128xf32>
    %137 = tpu.matmul %133, %136, %cst_49 {dimension_numbers = #tpu.dot_dimension_numbers<[1], [0], [0], [1], [0, 0, 1, 1], [], []>} : vector<24x128xf32>, vector<128x128xf32>, vector<24x128xf32> -> vector<24x128xf32>
    %c0_50 = arith.constant 0 : index
    %c0_51 = arith.constant 0 : index
    %138 = vector.load %arg10[%c0_50, %c0_51] : memref<128x128xbf16, #tpu.memory_space<vmem>>, vector<128x128xbf16>
    %139 = arith.extf %138 : vector<128x128xbf16> to vector<128x128xf32>
    %cst_52 = arith.constant dense<0.000000e+00> : vector<24x128xf32>
    %140 = tpu.matmul %137, %139, %cst_52 {dimension_numbers = #tpu.dot_dimension_numbers<[1], [0], [0], [1], [0, 0, 1, 1], [], []>} : vector<24x128xf32>, vector<128x128xf32>, vector<24x128xf32> -> vector<24x128xf32>
    %141 = vector.extract_strided_slice %140 {offsets = [0, 0], sizes = [24, 1], strides = [1, 1]} : vector<24x128xf32> to vector<24x1xf32>
    %142 = vector.extract_strided_slice %140 {offsets = [0, 2], sizes = [24, 1], strides = [1, 1]} : vector<24x128xf32> to vector<24x1xf32>
    %143 = tpu.transpose %141, [1, 0] : vector<24x1xf32> -> vector<1x24xf32>
    %144 = vector.broadcast %142 : vector<24x1xf32> to vector<24x24xf32>
    %145 = vector.broadcast %143 : vector<1x24xf32> to vector<24x24xf32>
    %146 = arith.addf %144, %145 : vector<24x24xf32>
    %cst_53 = arith.constant 0.000000e+00 : f32
    %147 = vector.broadcast %cst_53 : f32 to vector<24x24xf32>
    %148 = arith.cmpf oge, %146, %147 : vector<24x24xf32>
    %cst_54 = arith.constant 2.000000e-01 : f32
    %149 = vector.broadcast %cst_54 : f32 to vector<24x24xf32>
    %150 = arith.mulf %149, %146 : vector<24x24xf32>
    %151 = arith.select %148, %146, %150 : vector<24x24xi1>, vector<24x24xf32>
    %152 = arith.addf %151, %6 : vector<24x24xf32>
    %cst_55 = arith.constant dense<0xFF800000> : vector<24xf32>
    %153 = vector.multi_reduction <maximumf>, %152, %cst_55 [1] : vector<24x24xf32> to vector<24xf32>
    %154 = vector.shape_cast %153 : vector<24xf32> to vector<24x1xf32>
    %155 = vector.broadcast %154 : vector<24x1xf32> to vector<24x24xf32>
    %156 = arith.subf %152, %155 : vector<24x24xf32>
    %157 = math.exp %156 : vector<24x24xf32>
    %cst_56 = arith.constant dense<0.000000e+00> : vector<24xf32>
    %158 = vector.multi_reduction <add>, %157, %cst_56 [1] : vector<24x24xf32> to vector<24xf32>
    %159 = vector.shape_cast %158 : vector<24xf32> to vector<24x1xf32>
    %160 = tpu.reciprocal %159 : vector<24x1xf32> -> vector<24x1xf32>
    %161 = vector.broadcast %160 : vector<24x1xf32> to vector<24x24xf32>
    %162 = arith.mulf %157, %161 : vector<24x24xf32>
    %cst_57 = arith.constant dense<0.000000e+00> : vector<24x128xf32>
    %163 = tpu.matmul %162, %137, %cst_57 {dimension_numbers = #tpu.dot_dimension_numbers<[1], [0], [0], [1], [0, 0, 1, 1], [], []>} : vector<24x24xf32>, vector<24x128xf32>, vector<24x128xf32> -> vector<24x128xf32>
    %164 = vector.extract_strided_slice %140 {offsets = [0, 1], sizes = [24, 1], strides = [1, 1]} : vector<24x128xf32> to vector<24x1xf32>
    %165 = vector.extract_strided_slice %140 {offsets = [0, 3], sizes = [24, 1], strides = [1, 1]} : vector<24x128xf32> to vector<24x1xf32>
    %166 = tpu.transpose %164, [1, 0] : vector<24x1xf32> -> vector<1x24xf32>
    %167 = vector.broadcast %165 : vector<24x1xf32> to vector<24x24xf32>
    %168 = vector.broadcast %166 : vector<1x24xf32> to vector<24x24xf32>
    %169 = arith.addf %167, %168 : vector<24x24xf32>
    %cst_58 = arith.constant 0.000000e+00 : f32
    %170 = vector.broadcast %cst_58 : f32 to vector<24x24xf32>
    %171 = arith.cmpf oge, %169, %170 : vector<24x24xf32>
    %cst_59 = arith.constant 2.000000e-01 : f32
    %172 = vector.broadcast %cst_59 : f32 to vector<24x24xf32>
    %173 = arith.mulf %172, %169 : vector<24x24xf32>
    %174 = arith.select %171, %169, %173 : vector<24x24xi1>, vector<24x24xf32>
    %175 = arith.addf %174, %6 : vector<24x24xf32>
    %cst_60 = arith.constant dense<0xFF800000> : vector<24xf32>
    %176 = vector.multi_reduction <maximumf>, %175, %cst_60 [1] : vector<24x24xf32> to vector<24xf32>
    %177 = vector.shape_cast %176 : vector<24xf32> to vector<24x1xf32>
    %178 = vector.broadcast %177 : vector<24x1xf32> to vector<24x24xf32>
    %179 = arith.subf %175, %178 : vector<24x24xf32>
    %180 = math.exp %179 : vector<24x24xf32>
    %cst_61 = arith.constant dense<0.000000e+00> : vector<24xf32>
    %181 = vector.multi_reduction <add>, %180, %cst_61 [1] : vector<24x24xf32> to vector<24xf32>
    %182 = vector.shape_cast %181 : vector<24xf32> to vector<24x1xf32>
    %183 = tpu.reciprocal %182 : vector<24x1xf32> -> vector<24x1xf32>
    %184 = vector.broadcast %183 : vector<24x1xf32> to vector<24x24xf32>
    %185 = arith.mulf %180, %184 : vector<24x24xf32>
    %cst_62 = arith.constant dense<0.000000e+00> : vector<24x128xf32>
    %186 = tpu.matmul %185, %137, %cst_62 {dimension_numbers = #tpu.dot_dimension_numbers<[1], [0], [0], [1], [0, 0, 1, 1], [], []>} : vector<24x24xf32>, vector<24x128xf32>, vector<24x128xf32> -> vector<24x128xf32>
    %c124_i32 = arith.constant 124 : i32
    %187 = tpu.dynamic_rotate %186 by %c124_i32 dim 1 : vector<24x128xf32>, i32 -> vector<24x128xf32>
    %188 = arith.addf %163, %187 : vector<24x128xf32>
    %c4_i32 = arith.constant 4 : i32
    %189 = vector.broadcast %c4_i32 : i32 to vector<1x128xi32>
    %190 = arith.cmpi slt, %7, %189 : vector<1x128xi32>
    %cst_63 = arith.constant 5.000000e-01 : f32
    %191 = vector.broadcast %cst_63 : f32 to vector<24x128xf32>
    %192 = arith.mulf %188, %191 : vector<24x128xf32>
    %cst_64 = arith.constant 0.000000e+00 : f32
    %193 = vector.shape_cast %190 : vector<1x128xi1> to vector<1x128xi1>
    %194 = vector.broadcast %193 : vector<1x128xi1> to vector<24x128xi1>
    %195 = vector.broadcast %cst_64 : f32 to vector<24x128xf32>
    %196 = arith.select %194, %192, %195 : vector<24x128xi1>, vector<24x128xf32>
    %c0_65 = arith.constant 0 : index
    %c0_66 = arith.constant 0 : index
    %197 = vector.load %arg11[%c0_65, %c0_66] : memref<1x128xf32, #tpu.memory_space<vmem>>, vector<1x128xf32>
    %198 = vector.broadcast %197 : vector<1x128xf32> to vector<24x128xf32>
    %199 = arith.addf %196, %198 : vector<24x128xf32>
    %cst_67 = arith.constant 0.000000e+00 : f32
    %200 = vector.broadcast %cst_67 : f32 to vector<24x128xf32>
    %201 = arith.maximumf %199, %200 : vector<24x128xf32>
    %c0_68 = arith.constant 0 : index
    %c256 = arith.constant 256 : index
    %202 = vector.load %arg29[%c0_68, %c256] : memref<24x384xf32, #tpu.memory_space<vmem>>, vector<24x128xf32>
    tpu.vector_store %arg29[%c0_68, %c256], %201 {strides = array<i32>} : memref<24x384xf32, #tpu.memory_space<vmem>>, vector<24x128xf32>,
    %c0_69 = arith.constant 0 : index
    %c0_70 = arith.constant 0 : index
    %203 = vector.load %arg29[%c0_69, %c0_70] : memref<24x384xf32, #tpu.memory_space<vmem>>, vector<24x384xf32>
    %c0_71 = arith.constant 0 : index
    %c0_72 = arith.constant 0 : index
    %204 = vector.load %arg2[%c0_71, %c0_72] : memref<24x3xf32, #tpu.memory_space<vmem>>, vector<24x3xf32>
    %cst_73 = arith.constant dense<0.000000e+00> : vector<3x384xf32>
    %205 = tpu.matmul %204, %203, %cst_73 {dimension_numbers = #tpu.dot_dimension_numbers<[0], [0], [1], [1], [0, 1, 1, 1], [], []>} : vector<24x3xf32>, vector<24x384xf32>, vector<3x384xf32> -> vector<3x384xf32>
    %c0_74 = arith.constant 0 : index
    %c0_75 = arith.constant 0 : index
    %206 = vector.load %arg12[%c0_74, %c0_75] : memref<384x128xbf16, #tpu.memory_space<vmem>>, vector<384x128xbf16>
    %207 = arith.extf %206 : vector<384x128xbf16> to vector<384x128xf32>
    %cst_76 = arith.constant dense<0.000000e+00> : vector<24x128xf32>
    %208 = tpu.matmul %203, %207, %cst_76 {dimension_numbers = #tpu.dot_dimension_numbers<[1], [0], [0], [1], [0, 0, 1, 1], [], []>} : vector<24x384xf32>, vector<384x128xf32>, vector<24x128xf32> -> vector<24x128xf32>
    %c0_77 = arith.constant 0 : index
    %c0_78 = arith.constant 0 : index
    %209 = vector.load %arg13[%c0_77, %c0_78] : memref<1x128xf32, #tpu.memory_space<vmem>>, vector<1x128xf32>
    %210 = vector.broadcast %209 : vector<1x128xf32> to vector<24x128xf32>
    %211 = arith.addf %208, %210 : vector<24x128xf32>
    %cst_79 = arith.constant 0.000000e+00 : f32
    %212 = vector.broadcast %cst_79 : f32 to vector<24x128xf32>
    %213 = arith.maximumf %211, %212 : vector<24x128xf32>
    %c0_80 = arith.constant 0 : index
    %c0_81 = arith.constant 0 : index
    %214 = vector.load %arg14[%c0_80, %c0_81] : memref<128x128xbf16, #tpu.memory_space<vmem>>, vector<128x128xbf16>
    %215 = arith.extf %214 : vector<128x128xbf16> to vector<128x128xf32>
    %cst_82 = arith.constant dense<0.000000e+00> : vector<24x128xf32>
    %216 = tpu.matmul %213, %215, %cst_82 {dimension_numbers = #tpu.dot_dimension_numbers<[1], [0], [0], [1], [0, 0, 1, 1], [], []>} : vector<24x128xf32>, vector<128x128xf32>, vector<24x128xf32> -> vector<24x128xf32>
    %c0_83 = arith.constant 0 : index
    %c0_84 = arith.constant 0 : index
    %217 = vector.load %arg15[%c0_83, %c0_84] : memref<1x128xf32, #tpu.memory_space<vmem>>, vector<1x128xf32>
    %218 = vector.broadcast %217 : vector<1x128xf32> to vector<24x128xf32>
    %219 = arith.addf %216, %218 : vector<24x128xf32>
    %cst_85 = arith.constant 0.000000e+00 : f32
    %220 = vector.broadcast %cst_85 : f32 to vector<24x128xf32>
    %221 = arith.maximumf %219, %220 : vector<24x128xf32>
    %c0_86 = arith.constant 0 : index
    %c0_87 = arith.constant 0 : index
    %222 = vector.load %arg16[%c0_86, %c0_87] : memref<128x128xbf16, #tpu.memory_space<vmem>>, vector<128x128xbf16>
    %223 = arith.extf %222 : vector<128x128xbf16> to vector<128x128xf32>
    %cst_88 = arith.constant dense<0.000000e+00> : vector<24x128xf32>
    %224 = tpu.matmul %221, %223, %cst_88 {dimension_numbers = #tpu.dot_dimension_numbers<[1], [0], [0], [1], [0, 0, 1, 1], [], []>} : vector<24x128xf32>, vector<128x128xf32>, vector<24x128xf32> -> vector<24x128xf32>
    %c0_89 = arith.constant 0 : index
    %c0_90 = arith.constant 0 : index
    %225 = vector.load %arg17[%c0_89, %c0_90] : memref<1x128xf32, #tpu.memory_space<vmem>>, vector<1x128xf32>
    %226 = vector.broadcast %225 : vector<1x128xf32> to vector<24x128xf32>
    %227 = arith.addf %224, %226 : vector<24x128xf32>
    %cst_91 = arith.constant 0.000000e+00 : f32
    %228 = vector.broadcast %cst_91 : f32 to vector<24x128xf32>
    %229 = arith.maximumf %227, %228 : vector<24x128xf32>
    %c0_92 = arith.constant 0 : index
    %c0_93 = arith.constant 0 : index
    %230 = vector.load %arg18[%c0_92, %c0_93] : memref<384x128xbf16, #tpu.memory_space<vmem>>, vector<384x128xbf16>
    %231 = arith.extf %230 : vector<384x128xbf16> to vector<384x128xf32>
    %cst_94 = arith.constant dense<0.000000e+00> : vector<24x128xf32>
    %232 = tpu.matmul %203, %231, %cst_94 {dimension_numbers = #tpu.dot_dimension_numbers<[1], [0], [0], [1], [0, 0, 1, 1], [], []>} : vector<24x384xf32>, vector<384x128xf32>, vector<24x128xf32> -> vector<24x128xf32>
    %c0_95 = arith.constant 0 : index
    %c0_96 = arith.constant 0 : index
    %233 = vector.load %arg19[%c0_95, %c0_96] : memref<1x128xf32, #tpu.memory_space<vmem>>, vector<1x128xf32>
    %234 = vector.broadcast %233 : vector<1x128xf32> to vector<24x128xf32>
    %235 = arith.addf %232, %234 : vector<24x128xf32>
    %236 = arith.addf %229, %235 : vector<24x128xf32>
    %c0_97 = arith.constant 0 : index
    %c0_98 = arith.constant 0 : index
    %237 = vector.load %arg20[%c0_97, %c0_98] : memref<384x128xbf16, #tpu.memory_space<vmem>>, vector<384x128xbf16>
    %238 = arith.extf %237 : vector<384x128xbf16> to vector<384x128xf32>
    %cst_99 = arith.constant dense<0.000000e+00> : vector<3x128xf32>
    %239 = tpu.matmul %205, %238, %cst_99 {dimension_numbers = #tpu.dot_dimension_numbers<[1], [0], [0], [1], [0, 0, 1, 1], [], []>} : vector<3x384xf32>, vector<384x128xf32>, vector<3x128xf32> -> vector<3x128xf32>
    %c0_100 = arith.constant 0 : index
    %c0_101 = arith.constant 0 : index
    %240 = vector.load %arg21[%c0_100, %c0_101] : memref<1x128xf32, #tpu.memory_space<vmem>>, vector<1x128xf32>
    %241 = vector.broadcast %240 : vector<1x128xf32> to vector<3x128xf32>
    %242 = arith.addf %239, %241 : vector<3x128xf32>
    %cst_102 = arith.constant 0.000000e+00 : f32
    %243 = vector.broadcast %cst_102 : f32 to vector<3x128xf32>
    %244 = arith.maximumf %242, %243 : vector<3x128xf32>
    %c0_103 = arith.constant 0 : index
    %c0_104 = arith.constant 0 : index
    %245 = vector.load %arg22[%c0_103, %c0_104] : memref<128x128xbf16, #tpu.memory_space<vmem>>, vector<128x128xbf16>
    %246 = arith.extf %245 : vector<128x128xbf16> to vector<128x128xf32>
    %cst_105 = arith.constant dense<0.000000e+00> : vector<3x128xf32>
    %247 = tpu.matmul %244, %246, %cst_105 {dimension_numbers = #tpu.dot_dimension_numbers<[1], [0], [0], [1], [0, 0, 1, 1], [], []>} : vector<3x128xf32>, vector<128x128xf32>, vector<3x128xf32> -> vector<3x128xf32>
    %c0_106 = arith.constant 0 : index
    %c0_107 = arith.constant 0 : index
    %248 = vector.load %arg23[%c0_106, %c0_107] : memref<1x128xf32, #tpu.memory_space<vmem>>, vector<1x128xf32>
    %249 = vector.broadcast %248 : vector<1x128xf32> to vector<3x128xf32>
    %250 = arith.addf %247, %249 : vector<3x128xf32>
    %cst_108 = arith.constant 0.000000e+00 : f32
    %251 = vector.broadcast %cst_108 : f32 to vector<3x128xf32>
    %252 = arith.maximumf %250, %251 : vector<3x128xf32>
    %c0_109 = arith.constant 0 : index
    %c0_110 = arith.constant 0 : index
    %253 = vector.load %arg24[%c0_109, %c0_110] : memref<128x128xbf16, #tpu.memory_space<vmem>>, vector<128x128xbf16>
    %254 = arith.extf %253 : vector<128x128xbf16> to vector<128x128xf32>
    %cst_111 = arith.constant dense<0.000000e+00> : vector<3x128xf32>
    %255 = tpu.matmul %252, %254, %cst_111 {dimension_numbers = #tpu.dot_dimension_numbers<[1], [0], [0], [1], [0, 0, 1, 1], [], []>} : vector<3x128xf32>, vector<128x128xf32>, vector<3x128xf32> -> vector<3x128xf32>
    %c0_112 = arith.constant 0 : index
    %c0_113 = arith.constant 0 : index
    %256 = vector.load %arg25[%c0_112, %c0_113] : memref<1x128xf32, #tpu.memory_space<vmem>>, vector<1x128xf32>
    %257 = vector.broadcast %256 : vector<1x128xf32> to vector<3x128xf32>
    %258 = arith.addf %255, %257 : vector<3x128xf32>
    %cst_114 = arith.constant 0.000000e+00 : f32
    %259 = vector.broadcast %cst_114 : f32 to vector<3x128xf32>
    %260 = arith.maximumf %258, %259 : vector<3x128xf32>
    %c0_115 = arith.constant 0 : index
    %c0_116 = arith.constant 0 : index
    %261 = vector.load %arg26[%c0_115, %c0_116] : memref<384x128xbf16, #tpu.memory_space<vmem>>, vector<384x128xbf16>
    %262 = arith.extf %261 : vector<384x128xbf16> to vector<384x128xf32>
    %cst_117 = arith.constant dense<0.000000e+00> : vector<3x128xf32>
    %263 = tpu.matmul %205, %262, %cst_117 {dimension_numbers = #tpu.dot_dimension_numbers<[1], [0], [0], [1], [0, 0, 1, 1], [], []>} : vector<3x384xf32>, vector<384x128xf32>, vector<3x128xf32> -> vector<3x128xf32>
    %c0_118 = arith.constant 0 : index
    %c0_119 = arith.constant 0 : index
    %264 = vector.load %arg27[%c0_118, %c0_119] : memref<1x128xf32, #tpu.memory_space<vmem>>, vector<1x128xf32>
    %265 = vector.broadcast %264 : vector<1x128xf32> to vector<3x128xf32>
    %266 = arith.addf %263, %265 : vector<3x128xf32>
    %267 = arith.addf %260, %266 : vector<3x128xf32>
    %cst_120 = arith.constant dense<0.000000e+00> : vector<24x3xf32>
    %268 = tpu.matmul %236, %267, %cst_120 {dimension_numbers = #tpu.dot_dimension_numbers<[1], [1], [0], [0], [0, 0, 1, 0], [], []>} : vector<24x128xf32>, vector<3x128xf32>, vector<24x3xf32> -> vector<24x3xf32>
    %c0_121 = arith.constant 0 : index
    %c0_122 = arith.constant 0 : index
    %269 = vector.load %arg2[%c0_121, %c0_122] : memref<24x3xf32, #tpu.memory_space<vmem>>, vector<24x3xf32>
    %cst_123 = arith.constant 1.000000e+00 : f32
    %270 = vector.broadcast %cst_123 : f32 to vector<24x3xf32>
    %271 = arith.subf %270, %269 : vector<24x3xf32>
    %cst_124 = arith.constant 0.000000e+00 : f32
    %272 = vector.broadcast %cst_124 : f32 to vector<24x3xf32>
    %273 = arith.subf %272, %268 : vector<24x3xf32>
    %cst_125 = arith.constant 0.000000e+00 : f32
    %274 = vector.broadcast %cst_125 : f32 to vector<24x3xf32>
    %275 = arith.maximumf %273, %274 : vector<24x3xf32>
    %276 = math.absf %268 : vector<24x3xf32>
    %cst_126 = arith.constant 0.000000e+00 : f32
    %277 = vector.broadcast %cst_126 : f32 to vector<24x3xf32>
    %278 = arith.subf %277, %276 : vector<24x3xf32>
    %279 = math.exp %278 : vector<24x3xf32>
    %cst_127 = arith.constant 1.000000e+00 : f32
    %280 = vector.broadcast %cst_127 : f32 to vector<24x3xf32>
    %281 = arith.addf %280, %279 : vector<24x3xf32>
    %282 = math.log %281 : vector<24x3xf32>
    %283 = arith.addf %275, %282 : vector<24x3xf32>
    %284 = arith.mulf %269, %283 : vector<24x3xf32>
    %285 = vector.shape_cast %284 : vector<24x3xf32> to vector<1x24x3xf32>
    %cst_128 = arith.constant dense<0.000000e+00> : vector<1xf32>
    %286 = vector.multi_reduction <add>, %285, %cst_128 [1, 2] : vector<1x24x3xf32> to vector<1xf32>
    %287 = vector.shape_cast %286 : vector<1xf32> to vector<1x1x1xf32>
    %288 = vector.extract %287[0, 0, 0] : f32 from vector<1x1x1xf32>
    %289 = vector.broadcast %288 : f32 to vector<1x1xf32>
    %290 = arith.addf %283, %268 : vector<24x3xf32>
    %291 = arith.mulf %271, %290 : vector<24x3xf32>
    %292 = vector.shape_cast %291 : vector<24x3xf32> to vector<1x24x3xf32>
    %cst_129 = arith.constant dense<0.000000e+00> : vector<1xf32>
    %293 = vector.multi_reduction <add>, %292, %cst_129 [1, 2] : vector<1x24x3xf32> to vector<1xf32>
    %294 = vector.shape_cast %293 : vector<1xf32> to vector<1x1x1xf32>
    %295 = vector.extract %294[0, 0, 0] : f32 from vector<1x1x1xf32>
    %296 = vector.broadcast %295 : f32 to vector<1x1xf32>
    %297 = vector.shape_cast %269 : vector<24x3xf32> to vector<1x24x3xf32>
    %cst_130 = arith.constant dense<0.000000e+00> : vector<1xf32>
    %298 = vector.multi_reduction <add>, %297, %cst_130 [1, 2] : vector<1x24x3xf32> to vector<1xf32>
    %299 = vector.shape_cast %298 : vector<1xf32> to vector<1x1x1xf32>
    %300 = vector.extract %299[0, 0, 0] : f32 from vector<1x1x1xf32>
    %301 = vector.broadcast %300 : f32 to vector<1x1xf32>
    %cst_131 = arith.constant 0.000000e+00 : f32
    %302 = vector.broadcast %cst_131 : f32 to vector<1x1xf32>
    %303 = arith.subf %302, %289 : vector<1x1xf32>
    %cst_132 = arith.constant 7.200000e+01 : f32
    %304 = vector.broadcast %cst_132 : f32 to vector<1x1xf32>
    %305 = arith.subf %304, %301 : vector<1x1xf32>
    %cst_133 = arith.constant 0.693147182 : f32
    %306 = vector.broadcast %cst_133 : f32 to vector<1x1xf32>
    %307 = arith.mulf %305, %306 : vector<1x1xf32>
    %308 = arith.subf %303, %307 : vector<1x1xf32>
    %cst_134 = arith.constant 2.400000e+01 : f32
    %309 = vector.broadcast %cst_134 : f32 to vector<1x1xf32>
    %310 = arith.divf %308, %309 : vector<1x1xf32>
    %cst_135 = arith.constant 0.693147182 : f32
    %311 = vector.broadcast %cst_135 : f32 to vector<1x1xf32>
    %312 = arith.mulf %301, %311 : vector<1x1xf32>
    %313 = arith.addf %296, %312 : vector<1x1xf32>
    %cst_136 = arith.constant 4.800000e+01 : f32
    %314 = vector.broadcast %cst_136 : f32 to vector<1x1xf32>
    %315 = arith.divf %313, %314 : vector<1x1xf32>
    %316 = arith.subf %315, %310 : vector<1x1xf32>
    %c0_137 = arith.constant 0 : index
    %c0_138 = arith.constant 0 : index
    %317 = vector.load %arg28[%c0_137, %c0_138] : memref<1x1xf32, #tpu.memory_space<vmem>>, vector<1x1xf32>
    tpu.vector_store %arg28[%c0_137, %c0_138], %316 {strides = array<i32>} : memref<1x1xf32, #tpu.memory_space<vmem>>, vector<1x1xf32>,
    return
  }
}

</mosaic_0001>

<bundles_post_ra>
// kernel: tpu_custom_call.1
= control target key start
LH: loop header
LB: loop body
LE: loop exit
PB: predicated region body
PF: predicated region fallthrough
CT: control target
= control target key end

     0   :  { %s8124_s0 = inlined_call_operand.hbm [shape: f32[24,128], index: 0, kind: input, shape index: {}]   ;;  %s8125_s1 = inlined_call_operand.hbm [shape: s8[24,24], index: 1, kind: input, shape index: {}]   ;;  %s8126_s2 = inlined_call_operand.vmem [shape: f32[24,3], index: 2, kind: input, shape index: {}]   ;;  %s8127_s3 = inlined_call_operand.hbm [shape: bf16[128,128], index: 3, kind: input, shape index: {}]   ;;  %s8128_s4 = inlined_call_operand.hbm [shape: bf16[128,128], index: 4, kind: input, shape index: {}]   ;;  %s8129_s5 = inlined_call_operand.vmem [shape: f32[1,128], index: 5, kind: input, shape index: {}]   ;;  %s8130_s6 = inlined_call_operand.hbm [shape: bf16[128,128], index: 6, kind: input, shape index: {}]   ;;  %s8131_s7 = inlined_call_operand.hbm [shape: bf16[128,128], index: 7, kind: input, shape index: {}]   ;;  %s8132_s8 = inlined_call_operand.hbm [shape: f32[1,128], index: 8, kind: input, shape index: {}]   ;;  %s8133_s9 = inlined_call_operand.hbm [shape: bf16[128,128], index: 9, kind: input, shape index: {}]   ;;  %s8134_s10 = inlined_call_operand.vmem [shape: bf16[128,128], index: 10, kind: input, shape index: {}]   ;;  %s8135_s11 = inlined_call_operand.vmem [shape: f32[1,128], index: 11, kind: input, shape index: {}]   ;;  %s8136_s12 = inlined_call_operand.hbm [shape: bf16[384,128], index: 12, kind: input, shape index: {}]   ;;  %s8137_s13 = inlined_call_operand.vmem [shape: f32[1,128], index: 13, kind: input, shape index: {}]   ;;  %s8138_s14 = inlined_call_operand.hbm [shape: bf16[128,128], index: 14, kind: input, shape index: {}]   ;;  %s8139_s15 = inlined_call_operand.vmem [shape: f32[1,128], index: 15, kind: input, shape index: {}]   ;;  %s8140_s16 = inlined_call_operand.hbm [shape: bf16[128,128], index: 16, kind: input, shape index: {}]   ;;  %s8141_s17 = inlined_call_operand.vmem [shape: f32[1,128], index: 17, kind: input, shape index: {}]   ;;  %s8142_s18 = inlined_call_operand.hbm [shape: bf16[384,128], index: 18, kind: input, shape index: {}]   ;;  %s8143_s19 = inlined_call_operand.vmem [shape: f32[1,128], index: 19, kind: input, shape index: {}]   ;;  %s8144_s20 = inlined_call_operand.hbm [shape: bf16[384,128], index: 20, kind: input, shape index: {}]   ;;  %s8145_s21 = inlined_call_operand.vmem [shape: f32[1,128], index: 21, kind: input, shape index: {}]   ;;  %s8146_s22 = inlined_call_operand.hbm [shape: bf16[128,128], index: 22, kind: input, shape index: {}]   ;;  %s8147_s23 = inlined_call_operand.vmem [shape: f32[1,128], index: 23, kind: input, shape index: {}]   ;;  %s8148_s24 = inlined_call_operand.hbm [shape: bf16[128,128], index: 24, kind: input, shape index: {}]   ;;  %s8149_s25 = inlined_call_operand.vmem [shape: f32[1,128], index: 25, kind: input, shape index: {}]   ;;  %s8150_s26 = inlined_call_operand.hbm [shape: bf16[384,128], index: 26, kind: input, shape index: {}]   ;;  %s8151_s27 = inlined_call_operand.vmem [shape: f32[1,128], index: 27, kind: input, shape index: {}]   ;;  %s8152_s28 = inlined_call_operand.hbm [shape: f32[1,1], index: 28, kind: output, shape index: {}]  }
   0x1   :  { %8165 = sst [smem:[#allocation40_spill]] %s8124_s0 }
   0x2   :  { %8166 = sst [smem:[#allocation41_spill]] %s8125_s1 }
   0x3   :  { %8167 = sst [smem:[#allocation42_spill]] %s8126_s2 }
   0x4   :  { %8168 = sst [smem:[#allocation43_spill]] %s8127_s3 }
   0x5   :  { %8169 = sst [smem:[#allocation44_spill]] %s8128_s4 }
   0x6   :  { %8170 = sst [smem:[#allocation45_spill]] %s8129_s5 }
   0x7   :  { %8171 = sst [smem:[#allocation46_spill]] %s8130_s6 }
   0x8   :  { %8172 = sst [smem:[#allocation47_spill]] %s8131_s7 }
   0x9   :  { %8173 = sst [smem:[#allocation48_spill]] %s8132_s8 }
   0xa   :  { %8174 = sst [smem:[#allocation49_spill]] %s8133_s9 }
   0xb   :  { %8175 = sst [smem:[#allocation50_spill]] %s8134_s10 }
   0xc   :  { %8176 = sst [smem:[#allocation51_spill]] %s8135_s11 }
   0xd   :  { %8177 = sst [smem:[#allocation52_spill]] %s8136_s12 }
   0xe   :  { %8178 = sst [smem:[#allocation53_spill]] %s8149_s25 }
   0xf   :  { %8179 = sst [smem:[#allocation54_spill]] %s8151_s27 }
  0x10   :  { %8180 = sst [smem:[#allocation55_spill]] %s8152_s28 }
  0x11   :  { %33 = vsyncpa [#allocation4], 0 }
  0x12   :  { %34 = vsyncpa [#allocation7], 0 }
  0x13   :  { %35 = vsyncpa [#allocation10], 0 }
  0x14   :  { %36 = vsyncpa [#allocation13], 0 }
  0x15   :  { %37 = vsyncpa [#allocation16], 0 }
  0x16   :  { %38 = vsyncpa [#allocation19], 0 }
  0x17   :  { %39 = vsyncpa [#allocation22], 0 }
  0x18   :  { %40 = vsyncpa [#allocation25], 0 }
  0x19   :  { %41 = vsyncpa [#allocation28], 0 }
  0x1a   :  { %42 = vsyncpa [#allocation5], 0  ;;  %s7121_s8 = smov [#allocation6]   ;;  %s8181_s3 = sld [smem:[#allocation41_spill]] }
  0x1b   :  { %s60_s5 = sshll.u32 %s7121_s8, 4  ;;  %s61_s5 = int_to_ptr.vmem [resolvable:$true] %s60_s5 }
  0x20   :  { %s6727_s6 = scalar_lea.hbm %s8181_s3, 96 }
  0x21   :  { %p6728_p0 = scmp.ne.s32.totalorder %s8181_s3, %s6727_s6  ;;  %p6731_p1 = scmp.lt.u32.totalorder %s6727_s6, %s8181_s3 }
  0x23   :  { %p6733_p2 = pnand %p6731_p1, %p6728_p0 }
  0x25   :  { %6736 = shalt.err (!%p6733_p2)
}
  0x26   :  { %s6737_s2 = scalar_lea.vmem %s61_s5, 96  ;;  %p6742_p4 = scmp.lt.s32.totalorder %s61_s5, %s61_s5 }
  0x27   :  { %p6738_p3 = scmp.ne.s32.totalorder %s61_s5, %s6737_s2  ;;  %p6743_p5 = scmp.lt.s32.totalorder %s6737_s2, %s6737_s2 }
  0x29   :  { %p6744_p6 = por %p6743_p5, %p6742_p4 }
  0x2b   :  { %p6745_p7 = pnand %p6744_p6, %p6738_p3 }
  0x2d   :  { %6748 = shalt.err (!%p6745_p7)
}
  0x2e   :  { %s7122_s7 = smov 32   ;;  %s7123_s12 = smov 2  }
  0x2f   :  { %66 = dma.hbm_to_vmem [thread:$0]  %s8181_s3, 96, %s61_s5, [#allocation7], %s7122_s7, %s7122_s7, %s7123_s12  }
  0x30   :  { %s7124_s8 = smov [#allocation9]   ;;  %s7125_s30 = smov [#allocation12]  }
  0x31   :  { %s86_s9 = sshll.u32 %s7124_s8, 4  ;;  %s112_s6 = sshll.u32 %s7125_s30, 4  ;;  %s87_s9 = int_to_ptr.vmem [resolvable:$true] %s86_s9  ;;  %s113_s6 = int_to_ptr.vmem [resolvable:$true] %s112_s6 }
  0x32   :  { %s8182_s11 = sld [smem:[#allocation44_spill]] }
  0x38   :  { %s6749_s29 = scalar_lea.hbm %s8182_s11, 1024 }
  0x39   :  { %p6750_p8 = scmp.ne.s32.totalorder %s8182_s11, %s6749_s29  ;;  %p6753_p9 = scmp.lt.u32.totalorder %s6749_s29, %s8182_s11 }
  0x3b   :  { %p6755_p10 = pnand %p6753_p9, %p6750_p8 }
  0x3d   :  { %6758 = shalt.err (!%p6755_p10)
}
  0x3e   :  { %s6759_s5 = scalar_lea.vmem %s87_s9, 1024  ;;  %p6764_p12 = scmp.lt.s32.totalorder %s87_s9, %s87_s9 }
  0x3f   :  { %p6760_p11 = scmp.ne.s32.totalorder %s87_s9, %s6759_s5  ;;  %p6765_p13 = scmp.lt.s32.totalorder %s6759_s5, %s6759_s5 }
  0x41   :  { %p6766_p0 = por %p6765_p13, %p6764_p12 }
  0x43   :  { %p6767_p1 = pnand %p6766_p0, %p6760_p11 }
  0x45   :  { %6770 = shalt.err (!%p6767_p1)
}
  0x46   :  { %s7126_s3 = smov 64   ;;  %s7127_s7 = smov 4  }
  0x47   :  { %92 = dma.hbm_to_vmem [thread:$0]  %s8182_s11, 1024, %s87_s9, [#allocation10], %s7126_s3, %s7126_s3, %s7127_s7  }
  0x48   :  { %s8183_s1 = sld [smem:[#allocation47_spill]] }
  0x4e   :  { %s6771_s4 = scalar_lea.hbm %s8183_s1, 1024 }
  0x4f   :  { %p6772_p2 = scmp.ne.s32.totalorder %s8183_s1, %s6771_s4  ;;  %p6775_p3 = scmp.lt.u32.totalorder %s6771_s4, %s8183_s1 }
  0x51   :  { %p6777_p4 = pnand %p6775_p3, %p6772_p2 }
  0x53   :  { %6780 = shalt.err (!%p6777_p4)
}
  0x54   :  { %s6781_s29 = scalar_lea.vmem %s113_s6, 1024  ;;  %p6786_p6 = scmp.lt.s32.totalorder %s113_s6, %s113_s6 }
  0x55   :  { %p6782_p5 = scmp.ne.s32.totalorder %s113_s6, %s6781_s29  ;;  %p6787_p7 = scmp.lt.s32.totalorder %s6781_s29, %s6781_s29 }
  0x57   :  { %p6788_p8 = por %p6787_p7, %p6786_p6 }
  0x59   :  { %p6789_p9 = pnand %p6788_p8, %p6782_p5 }
  0x5b   :  { %6792 = shalt.err (!%p6789_p9)
}
  0x5c   :  { %118 = dma.hbm_to_vmem [thread:$0]  %s8183_s1, 1024, %s113_s6, [#allocation13], %s7126_s3, %s7126_s3, %s7127_s7  }
  0x5d   :  { %s7128_s2 = smov [#allocation15]   ;;  %s7129_s28 = smov [#allocation18]  }
  0x5e   :  { %s134_s5 = sshll.u32 %s7128_s2, 4  ;;  %s164_s12 = sshll.u32 %s7129_s28, 4  ;;  %s135_s5 = int_to_ptr.vmem [resolvable:$true] %s134_s5  ;;  %s165_s12 = int_to_ptr.vmem [resolvable:$true] %s164_s12 }
  0x5f   :  { %s8184_s4 = sld [smem:[#allocation49_spill]] }
  0x65   :  { %s6793_s8 = scalar_lea.hbm %s8184_s4, 1024 }
  0x66   :  { %p6794_p10 = scmp.ne.s32.totalorder %s8184_s4, %s6793_s8  ;;  %p6797_p11 = scmp.lt.u32.totalorder %s6793_s8, %s8184_s4 }
  0x68   :  { %p6799_p12 = pnand %p6797_p11, %p6794_p10 }
  0x6a   :  { %6802 = shalt.err (!%p6799_p12)
}
  0x6b   :  { %s6803_s6 = scalar_lea.vmem %s135_s5, 1024  ;;  %p6808_p0 = scmp.lt.s32.totalorder %s135_s5, %s135_s5 }
  0x6c   :  { %p6804_p13 = scmp.ne.s32.totalorder %s135_s5, %s6803_s6  ;;  %p6809_p1 = scmp.lt.s32.totalorder %s6803_s6, %s6803_s6 }
  0x6e   :  { %p6810_p2 = por %p6809_p1, %p6808_p0 }
  0x70   :  { %p6811_p3 = pnand %p6810_p2, %p6804_p13 }
  0x72   :  { %6814 = shalt.err (!%p6811_p3)
}
  0x73   :  { %140 = dma.hbm_to_vmem [thread:$0]  %s8184_s4, 1024, %s135_s5, [#allocation16], %s7126_s3, %s7126_s3, %s7127_s7  }
  0x74   :  { %s6815_s28 = scalar_lea.hbm %s8138_s14, 1024 }
  0x75   :  { %p6816_p4 = scmp.ne.s32.totalorder %s8138_s14, %s6815_s28  ;;  %p6819_p5 = scmp.lt.u32.totalorder %s6815_s28, %s8138_s14 }
  0x77   :  { %p6821_p6 = pnand %p6819_p5, %p6816_p4 }
  0x79   :  { %6824 = shalt.err (!%p6821_p6)
}
  0x7a   :  { %s6825_s10 = scalar_lea.vmem %s165_s12, 1024  ;;  %p6830_p8 = scmp.lt.s32.totalorder %s165_s12, %s165_s12 }
  0x7b   :  { %p6826_p7 = scmp.ne.s32.totalorder %s165_s12, %s6825_s10  ;;  %p6831_p9 = scmp.lt.s32.totalorder %s6825_s10, %s6825_s10 }
  0x7d   :  { %p6832_p10 = por %p6831_p9, %p6830_p8 }
  0x7f   :  { %p6833_p11 = pnand %p6832_p10, %p6826_p7 }
  0x81   :  { %6836 = shalt.err (!%p6833_p11)
}
  0x82   :  { %170 = dma.hbm_to_vmem [thread:$0]  %s8138_s14, 1024, %s165_s12, [#allocation19], %s7126_s3, %s7126_s3, %s7127_s7  }
  0x83   :  { %s7130_s0 = smov [#allocation21]   ;;  %s7131_s6 = smov [#allocation24]  }
  0x84   :  { %s192_s29 = sshll.u32 %s7130_s0, 4  ;;  %s220_s1 = sshll.u32 %s7131_s6, 4  ;;  %s193_s29 = int_to_ptr.vmem [resolvable:$true] %s192_s29  ;;  %s221_s1 = int_to_ptr.vmem [resolvable:$true] %s220_s1 }
  0x85   :  { %s6837_s2 = scalar_lea.hbm %s8142_s18, 3072 }
  0x86   :  { %p6838_p12 = scmp.ne.s32.totalorder %s8142_s18, %s6837_s2  ;;  %p6841_p13 = scmp.lt.u32.totalorder %s6837_s2, %s8142_s18 }
  0x88   :  { %p6843_p0 = pnand %p6841_p13, %p6838_p12 }
  0x8a   :  { %6846 = shalt.err (!%p6843_p0)
}
  0x8b   :  { %s6847_s14 = scalar_lea.vmem %s193_s29, 3072  ;;  %p6852_p2 = scmp.lt.s32.totalorder %s193_s29, %s193_s29 }
  0x8c   :  { %p6848_p1 = scmp.ne.s32.totalorder %s193_s29, %s6847_s14  ;;  %p6853_p3 = scmp.lt.s32.totalorder %s6847_s14, %s6847_s14 }
  0x8e   :  { %p6854_p4 = por %p6853_p3, %p6852_p2 }
  0x90   :  { %p6855_p5 = pnand %p6854_p4, %p6848_p1 }
  0x92   :  { %6858 = shalt.err (!%p6855_p5)
}
  0x93   :  { %198 = dma.hbm_to_vmem [thread:$0]  %s8142_s18, 3072, %s193_s29, [#allocation22], %s7126_s3, %s7126_s3, %s7127_s7  }
  0x94   :  { %s6859_s4 = scalar_lea.hbm %s8146_s22, 1024 }
  0x95   :  { %p6860_p6 = scmp.ne.s32.totalorder %s8146_s22, %s6859_s4  ;;  %p6863_p7 = scmp.lt.u32.totalorder %s6859_s4, %s8146_s22 }
  0x97   :  { %p6865_p8 = pnand %p6863_p7, %p6860_p6 }
  0x99   :  { %6868 = shalt.err (!%p6865_p8)
}
  0x9a   :  { %s6869_s2 = scalar_lea.vmem %s221_s1, 1024  ;;  %p6874_p10 = scmp.lt.s32.totalorder %s221_s1, %s221_s1 }
  0x9b   :  { %p6870_p9 = scmp.ne.s32.totalorder %s221_s1, %s6869_s2  ;;  %p6875_p11 = scmp.lt.s32.totalorder %s6869_s2, %s6869_s2 }
  0x9d   :  { %p6876_p12 = por %p6875_p11, %p6874_p10 }
  0x9f   :  { %p6877_p13 = pnand %p6876_p12, %p6870_p9 }
  0xa1   :  { %6880 = shalt.err (!%p6877_p13)
}
  0xa2   :  { %226 = dma.hbm_to_vmem [thread:$0]  %s8146_s22, 1024, %s221_s1, [#allocation25], %s7126_s3, %s7126_s3, %s7127_s7  }
  0xa3   :  { %s7132_s28 = smov [#allocation3]   ;;  %s8185_s14 = sld [smem:[#allocation40_spill]] }
  0xa4   :  { %s48_s25 = sshll.u32 %s7132_s28, 4  ;;  %s49_s25 = int_to_ptr.vmem [resolvable:$true] %s48_s25 }
  0xa9   :  { %s6881_s12 = scalar_lea.hbm %s8185_s14, 384 }
  0xaa   :  { %p6882_p0 = scmp.ne.s32.totalorder %s8185_s14, %s6881_s12  ;;  %p6885_p1 = scmp.lt.u32.totalorder %s6881_s12, %s8185_s14 }
  0xac   :  { %p6887_p2 = pnand %p6885_p1, %p6882_p0 }
  0xae   :  { %6890 = shalt.err (!%p6887_p2)
}
  0xaf   :  { %s6891_s0 = scalar_lea.vmem %s49_s25, 384  ;;  %p6896_p4 = scmp.lt.s32.totalorder %s49_s25, %s49_s25 }
  0xb0   :  { %p6892_p3 = scmp.ne.s32.totalorder %s49_s25, %s6891_s0  ;;  %p6897_p5 = scmp.lt.s32.totalorder %s6891_s0, %s6891_s0 }
  0xb2   :  { %p6898_p6 = por %p6897_p5, %p6896_p4 }
  0xb4   :  { %p6899_p7 = pnand %p6898_p6, %p6892_p3 }
  0xb6   :  { %6902 = shalt.err (!%p6899_p7)
}
  0xb7   :  { %s7133_s22 = smov 128   ;;  %s7134_s1 = smov 8  }
  0xb8   :  { %54 = dma.hbm_to_vmem [thread:$0]  %s8185_s14, 384, %s49_s25, [#allocation4], %s7133_s22, %s7133_s22, %s7134_s1  }
  0xb9   :  { %s7135_s11 = smov [#allocation8]   ;;  %s7136_s18 = smov [#allocation11]  }
  0xba   :  { %s74_s2 = sshll.u32 %s7135_s11, 4  ;;  %s100_s29 = sshll.u32 %s7136_s18, 4  ;;  %s75_s2 = int_to_ptr.vmem [resolvable:$true] %s74_s2  ;;  %s7411_s29 = int_to_ptr.vmem [resolvable:$true] %s100_s29 }
  0xbb   :  { %s8186_s8 = sld [smem:[#allocation43_spill]] }
  0xc1   :  { %s6903_s12 = scalar_lea.hbm %s8186_s8, 1024 }
  0xc2   :  { %p6904_p8 = scmp.ne.s32.totalorder %s8186_s8, %s6903_s12  ;;  %p6907_p9 = scmp.lt.u32.totalorder %s6903_s12, %s8186_s8 }
  0xc4   :  { %p6909_p10 = pnand %p6907_p9, %p6904_p8 }
  0xc6   :  { %6912 = shalt.err (!%p6909_p10)
}
  0xc7   :  { %s6913_s25 = scalar_lea.vmem %s75_s2, 1024  ;;  %p6918_p12 = scmp.lt.s32.totalorder %s75_s2, %s75_s2 }
  0xc8   :  { %p6914_p11 = scmp.ne.s32.totalorder %s75_s2, %s6913_s25  ;;  %p6919_p13 = scmp.lt.s32.totalorder %s6913_s25, %s6913_s25 }
  0xca   :  { %p6920_p0 = por %p6919_p13, %p6918_p12 }
  0xcc   :  { %p6921_p1 = pnand %p6920_p0, %p6914_p11 }
  0xce   :  { %6924 = shalt.err (!%p6921_p1)
}
  0xcf   :  { %80 = dma.hbm_to_vmem [thread:$0]  %s8186_s8, 1024, %s75_s2, [#allocation7], %s7126_s3, %s7126_s3, %s7127_s7  }
  0xd0   :  { %s8187_s6 = sld [smem:[#allocation46_spill]] }
  0xd6   :  { %s6925_s9 = scalar_lea.hbm %s8187_s6, 1024 }
  0xd7   :  { %p6926_p2 = scmp.ne.s32.totalorder %s8187_s6, %s6925_s9  ;;  %p6929_p3 = scmp.lt.u32.totalorder %s6925_s9, %s8187_s6 }
  0xd9   :  { %p6931_p4 = pnand %p6929_p3, %p6926_p2 }
  0xdb   :  { %6934 = shalt.err (!%p6931_p4)
}
  0xdc   :  { %s6935_s12 = scalar_lea.vmem %s7411_s29, 1024  ;;  %p6940_p6 = scmp.lt.s32.totalorder %s7411_s29, %s7411_s29 }
  0xdd   :  { %p6936_p5 = scmp.ne.s32.totalorder %s7411_s29, %s6935_s12  ;;  %p6941_p7 = scmp.lt.s32.totalorder %s6935_s12, %s6935_s12 }
  0xdf   :  { %p6942_p8 = por %p6941_p7, %p6940_p6 }
  0xe1   :  { %p6943_p9 = pnand %p6942_p8, %p6936_p5 }
  0xe3   :  { %6946 = shalt.err (!%p6943_p9)
}
  0xe4   :  { %106 = dma.hbm_to_vmem [thread:$0]  %s8187_s6, 1024, %s7411_s29, [#allocation10], %s7126_s3, %s7126_s3, %s7127_s7  }
  0xe5   :  { %s7137_s30 = smov [#allocation14]   ;;  %s7138_s5 = smov [#allocation17]  }
  0xe6   :  { %s125_s10 = sshll.u32 %s7137_s30, 4  ;;  %s150_s4 = sshll.u32 %s7138_s5, 4  ;;  %s126_s10 = int_to_ptr.vmem [resolvable:$true] %s125_s10  ;;  %s7448_s4 = int_to_ptr.vmem [resolvable:$true] %s150_s4 }
  0xe7   :  { %s8188_s0 = sld [smem:[#allocation48_spill]] }
  0xed   :  { %s6947_s22 = scalar_lea.hbm %s8188_s0, 16 }
  0xee   :  { %p6948_p10 = scmp.ne.s32.totalorder %s8188_s0, %s6947_s22  ;;  %p6951_p11 = scmp.lt.u32.totalorder %s6947_s22, %s8188_s0 }
  0xf0   :  { %p6953_p12 = pnand %p6951_p11, %p6948_p10 }
  0xf2   :  { %6956 = shalt.err (!%p6953_p12)
}
  0xf3   :  { %s6957_s29 = scalar_lea.vmem %s126_s10, 16  ;;  %s6961_s6 = scalar_lea.vmem %s126_s10, 32 }
  0xf4   :  { %p6958_p13 = scmp.ne.s32.totalorder %s126_s10, %s6957_s29  ;;  %p6962_p0 = scmp.lt.s32.totalorder %s126_s10, %s126_s10 }
  0xf5   :  { %p6963_p1 = scmp.lt.s32.totalorder %s6961_s6, %s6957_s29 }
  0xf7   :  { %p6964_p2 = por %p6963_p1, %p6962_p0 }
  0xf9   :  { %p6965_p3 = pnand %p6964_p2, %p6958_p13 }
  0xfb   :  { %6968 = shalt.err (!%p6965_p3)
}
  0xfc   :  { %128 = dma.hbm_to_vmem [thread:$0]  %s8188_s0, 16, %s126_s10, [#allocation13]  }
  0xfd   :  { %s8189_s8 = sld [smem:[#allocation52_spill]] }
 0x103   :  { %s6969_s30 = scalar_lea.hbm %s8189_s8, 3072 }
 0x104   :  { %p6970_p4 = scmp.ne.s32.totalorder %s8189_s8, %s6969_s30  ;;  %p6973_p5 = scmp.lt.u32.totalorder %s6969_s30, %s8189_s8 }
 0x106   :  { %p6975_p6 = pnand %p6973_p5, %p6970_p4 }
 0x108   :  { %6978 = shalt.err (!%p6975_p6)
}
 0x109   :  { %s6979_s1 = scalar_lea.vmem %s7448_s4, 3072  ;;  %p6984_p8 = scmp.lt.s32.totalorder %s7448_s4, %s7448_s4 }
 0x10a   :  { %p6980_p7 = scmp.ne.s32.totalorder %s7448_s4, %s6979_s1  ;;  %p6985_p9 = scmp.lt.s32.totalorder %s6979_s1, %s6979_s1 }
 0x10c   :  { %p6986_p10 = por %p6985_p9, %p6984_p8 }
 0x10e   :  { %p6987_p11 = pnand %p6986_p10, %p6980_p7 }
 0x110   :  { %6990 = shalt.err (!%p6987_p11)
}
 0x111   :  { %156 = dma.hbm_to_vmem [thread:$0]  %s8189_s8, 3072, %s7448_s4, [#allocation16], %s7126_s3, %s7126_s3, %s7127_s7  }
 0x112   :  { %s7139_s9 = smov [#allocation20]   ;;  %s7140_s18 = smov [#allocation23]  }
 0x113   :  { %s178_s11 = sshll.u32 %s7139_s9, 4  ;;  %s206_s29 = sshll.u32 %s7140_s18, 4  ;;  %s179_s11 = int_to_ptr.vmem [resolvable:$true] %s178_s11  ;;  %s7482_s29 = int_to_ptr.vmem [resolvable:$true] %s206_s29 }
 0x114   :  { %s6991_s27 = scalar_lea.hbm %s8140_s16, 1024 }
 0x115   :  { %p6992_p12 = scmp.ne.s32.totalorder %s8140_s16, %s6991_s27  ;;  %p6995_p13 = scmp.lt.u32.totalorder %s6991_s27, %s8140_s16 }
 0x117   :  { %p6997_p0 = pnand %p6995_p13, %p6992_p12 }
 0x119   :  { %7000 = shalt.err (!%p6997_p0)
}
 0x11a   :  { %s7001_s4 = scalar_lea.vmem %s179_s11, 1024  ;;  %p7006_p2 = scmp.lt.s32.totalorder %s179_s11, %s179_s11 }
 0x11b   :  { %p7002_p1 = scmp.ne.s32.totalorder %s179_s11, %s7001_s4  ;;  %p7007_p3 = scmp.lt.s32.totalorder %s7001_s4, %s7001_s4 }
 0x11d   :  { %p7008_p4 = por %p7007_p3, %p7006_p2 }
 0x11f   :  { %p7009_p5 = pnand %p7008_p4, %p7002_p1 }
 0x121   :  { %7012 = shalt.err (!%p7009_p5)
}
 0x122   :  { %184 = dma.hbm_to_vmem [thread:$0]  %s8140_s16, 1024, %s179_s11, [#allocation19], %s7126_s3, %s7126_s3, %s7127_s7  }
 0x123   :  { %s7013_s1 = scalar_lea.hbm %s8144_s20, 3072 }
 0x124   :  { %p7014_p6 = scmp.ne.s32.totalorder %s8144_s20, %s7013_s1  ;;  %p7017_p7 = scmp.lt.u32.totalorder %s7013_s1, %s8144_s20 }
 0x126   :  { %p7019_p8 = pnand %p7017_p7, %p7014_p6 }
 0x128   :  { %7022 = shalt.err (!%p7019_p8)
}
 0x129   :  { %s7023_s6 = scalar_lea.vmem %s7482_s29, 3072  ;;  %p7028_p10 = scmp.lt.s32.totalorder %s7482_s29, %s7482_s29 }
 0x12a   :  { %p7024_p9 = scmp.ne.s32.totalorder %s7482_s29, %s7023_s6  ;;  %p7029_p11 = scmp.lt.s32.totalorder %s7023_s6, %s7023_s6 }
 0x12c   :  { %p7030_p12 = por %p7029_p11, %p7028_p10 }
 0x12e   :  { %p7031_p13 = pnand %p7030_p12, %p7024_p9 }
 0x130   :  { %7034 = shalt.err (!%p7031_p13)
}
 0x131   :  { %212 = dma.hbm_to_vmem [thread:$0]  %s8144_s20, 3072, %s7482_s29, [#allocation22], %s7126_s3, %s7126_s3, %s7127_s7  }
 0x132   :  { %s7141_s28 = smov [#allocation26]   ;;  %s7142_s12 = smov [#allocation27]  }
 0x133   :  { %s234_s27 = sshll.u32 %s7141_s28, 4  ;;  %s248_s2 = sshll.u32 %s7142_s12, 4  ;;  %s235_s27 = int_to_ptr.vmem [resolvable:$true] %s234_s27  ;;  %s7519_s2 = int_to_ptr.vmem [resolvable:$true] %s248_s2 }
 0x134   :  { %s7035_s4 = scalar_lea.hbm %s8148_s24, 1024 }
 0x135   :  { %p7036_p0 = scmp.ne.s32.totalorder %s8148_s24, %s7035_s4  ;;  %p7039_p1 = scmp.lt.u32.totalorder %s7035_s4, %s8148_s24 }
 0x137   :  { %p7041_p2 = pnand %p7039_p1, %p7036_p0 }
 0x139   :  { %7044 = shalt.err (!%p7041_p2)
}
 0x13a   :  { %s7045_s20 = scalar_lea.vmem %s235_s27, 1024  ;;  %p7050_p4 = scmp.lt.s32.totalorder %s235_s27, %s235_s27 }
 0x13b   :  { %p7046_p3 = scmp.ne.s32.totalorder %s235_s27, %s7045_s20  ;;  %p7051_p5 = scmp.lt.s32.totalorder %s7045_s20, %s7045_s20 }
 0x13d   :  { %p7052_p6 = por %p7051_p5, %p7050_p4 }
 0x13f   :  { %p7053_p7 = pnand %p7052_p6, %p7046_p3 }
 0x141   :  { %7056 = shalt.err (!%p7053_p7)
}
 0x142   :  { %240 = dma.hbm_to_vmem [thread:$0]  %s8148_s24, 1024, %s235_s27, [#allocation25], %s7126_s3, %s7126_s3, %s7127_s7  }
 0x143   :  { %s7057_s9 = scalar_lea.hbm %s8150_s26, 3072 }
 0x144   :  { %p7058_p8 = scmp.ne.s32.totalorder %s8150_s26, %s7057_s9  ;;  %p7061_p9 = scmp.lt.u32.totalorder %s7057_s9, %s8150_s26 }
 0x146   :  { %p7063_p10 = pnand %p7061_p9, %p7058_p8 }
 0x148   :  { %7066 = shalt.err (!%p7063_p10)
}
 0x149   :  { %s7067_s28 = scalar_lea.vmem %s7519_s2, 3072  ;;  %p7072_p12 = scmp.lt.s32.totalorder %s7519_s2, %s7519_s2 }
 0x14a   :  { %p7068_p11 = scmp.ne.s32.totalorder %s7519_s2, %s7067_s28  ;;  %p7073_p13 = scmp.lt.s32.totalorder %s7067_s28, %s7067_s28 }
 0x14c   :  { %p7074_p0 = por %p7073_p13, %p7072_p12 }
 0x14e   :  { %p7075_p1 = pnand %p7074_p0, %p7068_p11 }
 0x150   :  { %7078 = shalt.err (!%p7075_p1)
}
 0x151   :  { %254 = dma.hbm_to_vmem [thread:$0]  %s8150_s26, 3072, %s7519_s2, [#allocation28], %s7126_s3, %s7126_s3, %s7127_s7  }
 0x152   :  { %7101 = dma.done.wait [#allocation4], 384  }
 0x153   :  { %7102 = vsyncadd [#allocation4], 4294966912 }
 0x154   :  { %7103 = dma.done.wait [#allocation7], 1120  }
 0x155   :  { %7104 = vsyncadd [#allocation7], 4294966176 }
 0x156   :  { %7105 = dma.done.wait [#allocation10], 2048  }
 0x157   :  { %7106 = vsyncadd [#allocation10], 4294965248 }
 0x158   :  { %7107 = dma.done.wait [#allocation13], 1040  }
 0x159   :  { %7108 = vsyncadd [#allocation13], 4294966256 }
 0x15a   :  { %7109 = dma.done.wait [#allocation16], 4096  }
 0x15b   :  { %7110 = vsyncadd [#allocation16], 4294963200 }
 0x15c   :  { %7111 = dma.done.wait [#allocation19], 2048  }
 0x15d   :  { %7112 = vsyncadd [#allocation19], 4294965248 }
 0x15e   :  { %7113 = dma.done.wait [#allocation22], 6144  }
 0x15f   :  { %7114 = vsyncadd [#allocation22], 4294961152 }
 0x160   :  { %7115 = dma.done.wait [#allocation25], 2048  }
 0x161   :  { %7116 = vsyncadd [#allocation25], 4294965248 }
 0x162   :  { %7117 = dma.done.wait [#allocation28], 3072  }
 0x163   :  { %7118 = vsyncadd [#allocation28], 4294964224  ;;  %v7143_v0 = vmov 0.0|0.0   ;;  %vm7144_vm0 = vmmov 0   ;;  %v7145_v1 = vmov 0.0   ;;  %v4124_v2 = vld [vmem:[#allocation8] sm:$0xff]   ;;  %v320_v41 = vlaneseq }
 0x164   :  { %6107 = vmatprep.subr.bf16.mxu0 %v7143_v0  ;;  %5479 = vmatprep.mubr.msk.f32.mxu0 %vm7144_vm0, %v7145_v1  ;;  %v4827_v3 = vld [vmem:[#allocation8 + $0x8] sm:$0xff]   ;;  %v4156_v4 = vld [vmem:[#allocation9] sm:$0xff]   ;;  %v4828_v6 = vld [vmem:[#allocation8 + $0x10] sm:$0xff]   ;;  %v7146_v21 = vmov 2   ;;  %v7147_v29 = vmov 3   ;;  %s7148_s26 = smov 127  }
 0x165   :  { %6131 = vmatprep.subr.bf16.mxu1 %v7143_v0  ;;  %5520 = vmatprep.mubr.msk.f32.mxu1 %vm7144_vm0, %v7145_v1  ;;  %v4834_v5 = vld [vmem:[#allocation9 + $0x8] sm:$0xff]   ;;  %v4835_v7 = vld [vmem:[#allocation9 + $0x10] sm:$0xff]   ;;  %v4829_v8 = vld [vmem:[#allocation8 + $0x18] sm:$0xff]   ;;  %v597_v44 = vshrl.u32 %v320_v41, 7  ;;  %v7149_v60 = vmov -1e+30  }
 0x166   :  { %6109 = vmatpush3.bf16.msra.mxu0 %v4124_v2  ;;  %6133 = vmatpush3.bf16.msra.mxu1 %v4156_v4  ;;  %v4836_v9 = vld [vmem:[#allocation9 + $0x18] sm:$0xff]   ;;  %v4830_v10 = vld [vmem:[#allocation8 + $0x20] sm:$0xff]   ;;  %v4831_v12 = vld [vmem:[#allocation8 + $0x28] sm:$0xff]   ;;  %vm615_vm5 = vcmask 195584   ;;  %s8190_s12 = sld [smem:[#allocation45_spill]]  ;;  %s8191_s5 = sld [smem:[#allocation50_spill]] }
 0x167   :  { %6110 = vmatprep.subr.bf16.mxu0 %v7143_v0  ;;  %6134 = vmatprep.subr.bf16.mxu1 %v7143_v0  ;;  %v4837_v11 = vld [vmem:[#allocation9 + $0x20] sm:$0xff]   ;;  %v4838_v13 = vld [vmem:[#allocation9 + $0x28] sm:$0xff]   ;;  %v4832_v14 = vld [vmem:[#allocation8 + $0x30] sm:$0xff]   ;;  %v7602_v48 = vsub.s32 0, %v597_v44  ;;  %s7150_s11 = smov 124   ;;  %s8192_s27 = sld [smem:[#allocation42_spill]] }
 0x168   :  { %v4839_v15 = vld [vmem:[#allocation9 + $0x30] sm:$0xff]   ;;  %v4833_v16 = vld [vmem:[#allocation8 + $0x38] sm:$0xff]   ;;  %v322_v17 = vld [vmem:[#allocation3] sm:$0xff]  ;;  %6633 = vset.pattern.permute.xlu1 %v7146_v21  ;;  %6634 = vset.pattern.permute.xlu0 %v7147_v29  ;;  %s8194_s10 = sld [smem:[#allocation53_spill]]  ;;  %s8195_s18 = sld [smem:[#allocation54_spill]] }
 0x169   :  { %v4840_v18 = vld [vmem:[#allocation9 + $0x38] sm:$0xff]   ;;  %v323_v19 = vld [vmem:[#allocation3 + $0x8] sm:$0xff] }
 0x16a   :  { %6112 = vmatpush3.bf16.msra.mxu0 %v4827_v3  ;;  %6136 = vmatpush3.bf16.msra.mxu1 %v4834_v5  ;;  %v324_v20 = vld [vmem:[#allocation3 + $0x10] sm:$0xff]  ;;  %v4990_v43 = vld [vmem:[#allocation6] sm:$0xf]   ;;  %v307_v50 = vld [vmem:[#allocation6 + $0x4] sm:$0x3] }
 0x16b   :  { %6113 = vmatprep.subr.bf16.mxu0 %v7143_v0  ;;  %6137 = vmatprep.subr.bf16.mxu1 %v7143_v0  ;;  %v4991_v45 = vunpack.c.0.s8 %v4990_v43  ;;  %v4992_v46 = vunpack.c.1.s8 %v4990_v43  ;;  %v310_v54 = vunpack.c.0.s8 %v307_v50 }
 0x16d   :  { %v311_v49 = vcvt.s32.f32 %v4991_v45  ;;  %v312_v52 = vcvt.s32.f32 %v4992_v46  ;;  %v313_v62 = vcvt.s32.f32 %v310_v54 }
 0x16e   :  { %6115 = vmatpush3.bf16.msra.mxu0 %v4828_v6  ;;  %6139 = vmatpush3.bf16.msra.mxu1 %v4835_v7 }
 0x16f   :  { %6116 = vmatprep.subr.bf16.mxu0 %v7143_v0  ;;  %6140 = vmatprep.subr.bf16.mxu1 %v7143_v0  ;;  %vm314_vm1 = vcmp.gt.f32.partialorder %v311_v49, 0.5  ;;  %vm315_vm2 = vcmp.gt.f32.partialorder %v312_v52, 0.5  ;;  %vm316_vm6 = vcmp.gt.f32.partialorder %v313_v62, 0.5 }
 0x170   :  { %v7605_v61 = vsel %vm314_vm1, 0.0, %v7149_v60  ;;  %v7607_v3 = vsel %vm315_vm2, 0.0, %v7149_v60 }
 0x172   :  { %6118 = vmatpush3.bf16.msra.mxu0 %v4829_v8  ;;  %6142 = vmatpush3.bf16.msra.mxu1 %v4836_v9 }
 0x173   :  { %6119 = vmatprep.subr.bf16.mxu0 %v7143_v0  ;;  %6143 = vmatprep.subr.bf16.mxu1 %v7143_v0 }
 0x176   :  { %6121 = vmatpush3.bf16.msra.mxu0 %v4830_v10  ;;  %6145 = vmatpush3.bf16.msra.mxu1 %v4837_v11  ;;  %v7612_v10 = vsel %vm316_vm6, 0.0, %v7149_v60 }
 0x177   :  { %6122 = vmatprep.subr.bf16.mxu0 %v7143_v0  ;;  %6146 = vmatprep.subr.bf16.mxu1 %v7143_v0 }
 0x17a   :  { %6124 = vmatpush3.bf16.msra.mxu0 %v4831_v12  ;;  %6148 = vmatpush3.bf16.msra.mxu1 %v4838_v13 }
 0x17b   :  { %6125 = vmatprep.subr.bf16.mxu0 %v7143_v0  ;;  %6149 = vmatprep.subr.bf16.mxu1 %v7143_v0 }
 0x17e   :  { %6127 = vmatpush3.bf16.msra.mxu0 %v4832_v14  ;;  %6151 = vmatpush3.bf16.msra.mxu1 %v4839_v15 }
 0x17f   :  { %6128 = vmatprep.subr.bf16.mxu0 %v7143_v0  ;;  %6152 = vmatprep.subr.bf16.mxu1 %v7143_v0 }
 0x182   :  { %6130 = vmatpush3.bf16.msra.mxu0 %v4833_v16  ;;  %6154 = vmatpush3.bf16.msra.mxu1 %v4840_v18 }
 0x183   :  { %6155 = vmatprep.subr.bf16.mxu0 %v7143_v0  ;;  %6158 = vmatprep.subr.bf16.mxu1 %v7143_v0 }
 0x185   :  { %5480 = vmatmul.mubr.f32.vlgmr.msra.gmra.mrb[0].mxu0 %v322_v17 }
 0x186   :  { %5482 = vmatprep.mubr.msk.f32.mxu0 %vm7144_vm0, %v7145_v1 }
 0x189   :  { %5483 = vmatmul.mubr.f32.gmra.mrb[2].mxu0 %v323_v19 }
 0x18a   :  { %5485 = vmatprep.mubr.msk.f32.mxu0 %vm7144_vm0, %v7145_v1 }
 0x18d   :  { %5486 = vmatmul.mubr.f32.gmra.mrb[4].mxu0 %v324_v20 }
 0x18e   :  { %5535 = vmatprep.mubr.msk.f32.mxu0 %vm7144_vm0, %v7145_v1 }
 0x258   :  { %v423_v22 = vpop.f32.mrb[0].mxu0 }
 0x259   :  { %v5481_v23 = vpop.f32.mrb[1].mxu0  ;;  %5521 = vmatmul.mubr.f32.vlgmr.msra.gmra.mrb[0].mxu1 %v423_v22 }
 0x25a   :  { %5523 = vmatprep.mubr.msk.f32.mxu1 %vm7144_vm0, %v7145_v1 }
 0x25c   :  { %v428_v24 = vpop.f32.mrb[2].mxu0 }
 0x25d   :  { %v6156_v25 = vpack.c.bf16 %v428_v24, %v423_v22  ;;  %5524 = vmatmul.mubr.f32.gmra.mrb[2].mxu1 %v428_v24  ;;  %v5484_v26 = vpop.f32.mrb[3].mxu0 }
 0x25e   :  { %5526 = vmatprep.mubr.msk.f32.mxu1 %vm7144_vm0, %v7145_v1 }
 0x25f   :  { %6157 = vmatpush3.bf16.msra.mxu0 %v6156_v25  ;;  %6160 = vmatpush3.bf16.msra.mxu1 %v6156_v25 }
 0x260   :  { %v433_v27 = vpop.f32.mrb[4].mxu0  ;;  %5533 = vmatprep.subr.mxu0 %v7145_v1  ;;  %5548 = vmatprep.subr.mxu1 %v7145_v1 }
 0x261   :  { %5527 = vmatmul.mubr.f32.gmra.mrb[4].mxu1 %v433_v27  ;;  %v5487_v28 = vpop.f32.mrb[5].mxu0 }
 0x262   :  { %5550 = vmatprep.mubr.msk.f32.mxu1 %vm7144_vm0, %v7145_v1 }
 0x263   :  { %5534 = vmatpush3.msra.mxu0 %v433_v27  ;;  %5549 = vmatpush3.msra.mxu1 %v433_v27 }
 0x264   :  { %6161 = vmatprep.subr.bf16.mxu0 %v7143_v0  ;;  %6185 = vmatprep.subr.bf16.mxu1 %v7143_v0 }
 0x32c   :  { %v535_v30 = vpop.f32.mrb[0].mxu1 }
 0x32d   :  { %583 = vperm.xlu1 %6633, %v535_v30   ;;  %738 = vrot.lane.b32.xlu0 %v535_v30, %s7148_s26  ;;  %v5522_v31 = vpop.f32.mrb[1].mxu1 }
 0x330   :  { %v540_v32 = vpop.f32.mrb[2].mxu1 }
 0x331   :  { %740 = vrot.lane.b32.xlu0 %v540_v32, %s7148_s26  ;;  %v5525_v33 = vpop.f32.mrb[3].mxu1 }
 0x334   :  { %v545_v34 = vpop.f32.mrb[4].mxu1 }
 0x335   :  { %780 = vperm.xlu0 %6634, %v535_v30   ;;  %742 = vrot.lane.b32.xlu1 %v545_v34, %s7148_s26  ;;  %v5528_v35 = vpop.f32.mrb[5].mxu1 }
 0x339   :  { %588 = vperm.xlu1 %6633, %v540_v32   ;;  %6636 = vset.pattern.permute.xlu0 %v7146_v21 }
 0x33a   :  { %593 = vperm.xlu0 %6636, %v545_v34  }
 0x33d   :  { %6635 = vset.pattern.permute.xlu1 %v7147_v29 }
 0x33e   :  { %784 = vperm.xlu1 %6635, %v540_v32  }
 0x342   :  { %788 = vperm.xlu1 %6635, %v545_v34  }
 0x36b   :  { %549 = vxpose.xlu1.b32.start [1/3] (short) (narrow) %v535_v30, 8 }
 0x36f   :  { %550 = vxpose.xlu1.b32.cont [2/3] (short) (narrow) %v540_v32, 8 }
 0x373   :  { %551 = vxpose.xlu1.b32.end [3/3] (short) (narrow) %v545_v34, 8 }
 0x39f   :  { %v739_v36 = vpop.permute.xlu0 %738 }
 0x3a0   :  { %747 = vxpose.xlu0.b32.start [1/3] (short) (narrow) %v739_v36, 8 }
 0x3a3   :  { %v741_v37 = vpop.permute.xlu0 %740 }
 0x3a4   :  { %748 = vxpose.xlu0.b32.cont [2/3] (short) (narrow) %v741_v37, 8 }
 0x3ac   :  { %v584_v38 = vpop.permute.xlu1 %583 }
 0x3b0   :  { %v743_v39 = vpop.permute.xlu1 %742 }
 0x3b1   :  { %749 = vxpose.xlu0.b32.end [3/3] (short) (narrow) %v743_v39, 8 }
 0x3b4   :  { %v781_v51 = vpop.permute.xlu0 %780 }
 0x3b8   :  { %v589_v40 = vpop.permute.xlu1 %588 }
 0x3b9   :  { %v594_v56 = vpop.permute.xlu0 %593 }
 0x3bd   :  { %v785_v42 = vpop.permute.xlu1 %784 }
 0x3c1   :  { %v789_v47 = vpop.permute.xlu1 %788 }
 0x3eb   :  { %v565_v53 = vpop.trf.xlu1 }
 0x3ec   :  { %v599_v55 = vrot.slane %v565_v53, %v7602_v48 }
 0x3ee   :  { %v600_v57 = vadd.f32 %v599_v55, %v584_v38  ;;  %v601_v58 = vadd.f32 %v599_v55, %v589_v40  ;;  %v602_v59 = vadd.f32 %v599_v55, %v594_v56 }
 0x3f0   :  { %vm603_vm3 = vcmp.ge.f32.partialorder %v600_v57, 0.0  ;;  %v606_v63 = vmul.f32 0.2, %v600_v57  ;;  %vm604_vm4 = vcmp.ge.f32.partialorder %v601_v58, 0.0  ;;  %v607_v2 = vmul.f32 0.2, %v601_v58 }
 0x3f1   :  { %v608_v6 = vmul.f32 0.2, %v602_v59  ;;  %vm605_vm7 = vcmp.ge.f32.partialorder %v602_v59, 0.0 }
 0x3f2   :  { %v609_v4 = vsel %vm603_vm3, %v600_v57, %v606_v63  ;;  %v610_v5 = vsel %vm604_vm4, %v601_v58, %v607_v2 }
 0x3f3   :  { %v612_v7 = vadd.f32 %v609_v4, %v7605_v61  ;;  %v613_v9 = vadd.f32 %v610_v5, %v7607_v3  ;;  %v611_v11 = vsel %vm605_vm7, %v602_v59, %v608_v6 }
 0x3f4   :  { %v614_v13 = vadd.f32 %v611_v11, %v7612_v10 }
 0x3f5   :  { %v616_v8 = vsel %vm615_vm5, %v612_v7, -inf  ;;  %v619_v12 = vsel %vm615_vm5, %v613_v9, -inf }
 0x3f6   :  { %617 = vmax.xlane.f32.xlu0 %v616_v8  ;;  %v622_v14 = vsel %vm615_vm5, %v614_v13, -inf }
 0x3fa   :  { %620 = vmax.xlane.f32.xlu0 %v619_v12 }
 0x3fe   :  { %623 = vmax.xlane.f32.xlu0 %v622_v14 }
 0x429   :  { %v763_v15 = vpop.trf.xlu0 }
 0x42a   :  { %v794_v16 = vrot.slane %v763_v15, %v7602_v48 }
 0x42c   :  { %v795_v17 = vadd.f32 %v794_v16, %v781_v51  ;;  %v796_v18 = vadd.f32 %v794_v16, %v785_v42  ;;  %v797_v19 = vadd.f32 %v794_v16, %v789_v47 }
 0x42e   :  { %vm798_vm8 = vcmp.ge.f32.partialorder %v795_v17, 0.0  ;;  %v801_v20 = vmul.f32 0.2, %v795_v17  ;;  %vm799_vm9 = vcmp.ge.f32.partialorder %v796_v18, 0.0  ;;  %v802_v22 = vmul.f32 0.2, %v796_v18 }
 0x42f   :  { %v803_v25 = vmul.f32 0.2, %v797_v19  ;;  %vm800_vm10 = vcmp.ge.f32.partialorder %v797_v19, 0.0 }
 0x430   :  { %v804_v23 = vsel %vm798_vm8, %v795_v17, %v801_v20  ;;  %v805_v24 = vsel %vm799_vm9, %v796_v18, %v802_v22 }
 0x431   :  { %v807_v26 = vadd.f32 %v804_v23, %v7605_v61  ;;  %v808_v28 = vadd.f32 %v805_v24, %v7607_v3  ;;  %v806_v30 = vsel %vm800_vm10, %v797_v19, %v803_v25 }
 0x432   :  { %v809_v32 = vadd.f32 %v806_v30, %v7612_v10  ;;  %v4843_v30 = vld [vmem:[#allocation11 + $0x18] sm:$0xff]  }
 0x433   :  { %v810_v27 = vsel %vm615_vm5, %v807_v26, -inf  ;;  %v813_v31 = vsel %vm615_vm5, %v808_v28, -inf }
 0x434   :  { %811 = vmax.xlane.f32.xlu1 %v810_v27  ;;  %v816_v33 = vsel %vm615_vm5, %v809_v32, -inf  ;;  %v4841_v27 = vld [vmem:[#allocation11 + $0x8] sm:$0xff]  }
 0x438   :  { %814 = vmax.xlane.f32.xlu1 %v813_v31  ;;  %v4844_v31 = vld [vmem:[#allocation11 + $0x20] sm:$0xff]  }
 0x43c   :  { %817 = vmax.xlane.f32.xlu1 %v816_v33  ;;  %v4846_v33 = vld [vmem:[#allocation11 + $0x30] sm:$0xff]  }
 0x483   :  { %v618_v34 = vpop.xlane.xlu0 %617 }
 0x484   :  { %v625_v35 = vsub.f32 %v612_v7, %v618_v34  ;;  %v4847_v34 = vld [vmem:[#allocation11 + $0x38] sm:$0xff]  }
 0x486   :  { %v628_v36 = vmul.f32 1.442695, %v625_v35  ;;  %v4220_v35 = vld [vmem:[#allocation12] sm:$0xff]  }
 0x487   :  { %v621_v37 = vpop.xlane.xlu0 %620 }
 0x488   :  { %6640 = vpow2.f32 %v628_v36  ;;  %v626_v38 = vsub.f32 %v613_v9, %v621_v37  ;;  %v4848_v36 = vld [vmem:[#allocation12 + $0x8] sm:$0xff]   ;;  %v4849_v37 = vld [vmem:[#allocation12 + $0x10] sm:$0xff]  }
 0x48a   :  { %v630_v39 = vmul.f32 1.442695, %v626_v38  ;;  %v4850_v38 = vld [vmem:[#allocation12 + $0x18] sm:$0xff]  }
 0x48b   :  { %v624_v40 = vpop.xlane.xlu0 %623 }
 0x48c   :  { %6642 = vpow2.f32 %v630_v39  ;;  %v627_v42 = vsub.f32 %v614_v13, %v624_v40  ;;  %v4851_v39 = vld [vmem:[#allocation12 + $0x20] sm:$0xff]   ;;  %v4852_v40 = vld [vmem:[#allocation12 + $0x28] sm:$0xff]  }
 0x48e   :  { %v632_v43 = vmul.f32 1.442695, %v627_v42  ;;  %v4853_v42 = vld [vmem:[#allocation12 + $0x30] sm:$0xff]  }
 0x490   :  { %6644 = vpow2.f32 %v632_v43  ;;  %v4854_v43 = vld [vmem:[#allocation12 + $0x38] sm:$0xff]  }
 0x492   :  { %v6641_v44 = vpop.eup %6640 }
 0x493   :  { %v634_v45 = vsel %vm615_vm5, %v6641_v44, 0.0 }
 0x494   :  { %635 = vadd.xlane.f32.xlu0 %v634_v45 }
 0x496   :  { %v6643_v46 = vpop.eup %6642 }
 0x497   :  { %v637_v47 = vsel %vm615_vm5, %v6643_v46, 0.0 }
 0x498   :  { %638 = vadd.xlane.f32.xlu0 %v637_v47 }
 0x49a   :  { %v6645_v49 = vpop.eup %6644 }
 0x49b   :  { %v640_v50 = vsel %vm615_vm5, %v6645_v49, 0.0 }
 0x49c   :  { %641 = vadd.xlane.f32.xlu0 %v640_v50 }
 0x4c1   :  { %v812_v51 = vpop.xlane.xlu1 %811 }
 0x4c2   :  { %v819_v52 = vsub.f32 %v807_v26, %v812_v51  ;;  %v4188_v26 = vld [vmem:[#allocation11] sm:$0xff]   ;;  %v7665_v51 = vand.u32 127, %v320_v41 }
 0x4c4   :  { %v822_v53 = vmul.f32 1.442695, %v819_v52  ;;  %vm932_vm11 = vcmp.ge.s32.totalorder %v7665_v51, 16  ;;  %v4098_v52 = vld [vmem:[%s8190_s12] ss:$0 sm:$0xff]  ;;  %vm2191_vm10 = vcmp.lt.s32.totalorder %v7665_v51, 4 }
 0x4c5   :  { %v815_v54 = vpop.xlane.xlu1 %814  ;;  %s7151_s12 = smov [#allocation29]  }
 0x4c6   :  { %6646 = vpow2.f32 %v822_v53  ;;  %v820_v55 = vsub.f32 %v808_v28, %v815_v54  ;;  %v4842_v28 = vld [vmem:[#allocation11 + $0x10] sm:$0xff]   ;;  %s4075_s2 = sshll.u32 %s7151_s12, 4  ;;  %s4076_s2 = int_to_ptr.vmem [resolvable:$true] %s4075_s2 }
 0x4c7   :  { %s7079_s30 = scalar_lea.vmem %s4076_s2, 16  ;;  %p7084_p3 = scmp.lt.s32.totalorder %s4076_s2, %s4076_s2 }
 0x4c8   :  { %v824_v56 = vmul.f32 1.442695, %v820_v55  ;;  %p7080_p2 = scmp.ne.s32.totalorder %s4076_s2, %s7079_s30 }
 0x4c9   :  { %v818_v57 = vpop.xlane.xlu1 %817 }
 0x4ca   :  { %6648 = vpow2.f32 %v824_v56  ;;  %v821_v58 = vsub.f32 %v809_v32, %v818_v57  ;;  %v4845_v32 = vld [vmem:[#allocation11 + $0x28] sm:$0xff]  }
 0x4cc   :  { %v826_v59 = vmul.f32 1.442695, %v821_v58 }
 0x4ce   :  { %6650 = vpow2.f32 %v826_v59 }
 0x4d0   :  { %v6647_v60 = vpop.eup %6646 }
 0x4d1   :  { %v828_v62 = vsel %vm615_vm5, %v6647_v60, 0.0 }
 0x4d2   :  { %829 = vadd.xlane.f32.xlu1 %v828_v62 }
 0x4d4   :  { %v6649_v63 = vpop.eup %6648 }
 0x4d5   :  { %v831_v2 = vsel %vm615_vm5, %v6649_v63, 0.0 }
 0x4d6   :  { %832 = vadd.xlane.f32.xlu1 %v831_v2 }
 0x4d8   :  { %v6651_v4 = vpop.eup %6650 }
 0x4d9   :  { %v834_v5 = vsel %vm615_vm5, %v6651_v4, 0.0 }
 0x4da   :  { %835 = vadd.xlane.f32.xlu1 %v834_v5 }
 0x521   :  { %v636_v6 = vpop.xlane.xlu0 %635 }
 0x522   :  { %6652 = vrcp.f32 %v636_v6 }
 0x525   :  { %v639_v7 = vpop.xlane.xlu0 %638 }
 0x526   :  { %6654 = vrcp.f32 %v639_v7 }
 0x529   :  { %v642_v8 = vpop.xlane.xlu0 %641 }
 0x52a   :  { %6656 = vrcp.f32 %v642_v8 }
 0x52c   :  { %v6653_v9 = vpop.eup %6652 }
 0x52d   :  { %v646_v11 = vmul.f32 %v6653_v9, %v6641_v44 }
 0x52f   :  { %5536 = vmatmul.mubr.msk.f32.vlgmr.msra.gmra.mrb[6].mxu0 %vm615_vm5, %v646_v11 }
 0x530   :  { %v6655_v12 = vpop.eup %6654  ;;  %5538 = vmatprep.mubr.msk.f32.mxu0 %vm7144_vm0, %v7145_v1  ;;  %6163 = vmatpush3.bf16.msra.mxu0 %v4188_v26 }
 0x531   :  { %v647_v13 = vmul.f32 %v6655_v12, %v6643_v46  ;;  %6164 = vmatprep.subr.bf16.mxu0 %v7143_v0 }
 0x533   :  { %5539 = vmatmul.mubr.msk.f32.gmra.mrb[8].mxu0 %vm615_vm5, %v647_v13 }
 0x534   :  { %v6657_v14 = vpop.eup %6656  ;;  %5541 = vmatprep.mubr.msk.f32.mxu0 %vm7144_vm0, %v7145_v1  ;;  %6166 = vmatpush3.bf16.msra.mxu0 %v4841_v27 }
 0x535   :  { %v648_v15 = vmul.f32 %v6657_v14, %v6645_v49  ;;  %6167 = vmatprep.subr.bf16.mxu0 %v7143_v0 }
 0x537   :  { %5542 = vmatmul.mubr.msk.f32.gmra.mrb[10].mxu0 %vm615_vm5, %v648_v15 }
 0x538   :  { %5591 = vmatprep.mubr.msk.f32.mxu0 %vm7144_vm0, %v7145_v1  ;;  %6169 = vmatpush3.bf16.msra.mxu0 %v4842_v28 }
 0x539   :  { %6170 = vmatprep.subr.bf16.mxu0 %v7143_v0 }
 0x53c   :  { %6172 = vmatpush3.bf16.msra.mxu0 %v4843_v30 }
 0x53d   :  { %6173 = vmatprep.subr.bf16.mxu0 %v7143_v0 }
 0x540   :  { %6175 = vmatpush3.bf16.msra.mxu0 %v4844_v31 }
 0x541   :  { %6176 = vmatprep.subr.bf16.mxu0 %v7143_v0 }
 0x544   :  { %6178 = vmatpush3.bf16.msra.mxu0 %v4845_v32 }
 0x545   :  { %6179 = vmatprep.subr.bf16.mxu0 %v7143_v0 }
 0x548   :  { %6181 = vmatpush3.bf16.msra.mxu0 %v4846_v33 }
 0x549   :  { %6182 = vmatprep.subr.bf16.mxu0 %v7143_v0 }
 0x54c   :  { %6184 = vmatpush3.bf16.msra.mxu0 %v4847_v34 }
 0x54d   :  { %6209 = vmatprep.subr.bf16.mxu0 %v7143_v0 }
 0x55f   :  { %v830_v16 = vpop.xlane.xlu1 %829 }
 0x560   :  { %6658 = vrcp.f32 %v830_v16 }
 0x563   :  { %v833_v17 = vpop.xlane.xlu1 %832 }
 0x564   :  { %6660 = vrcp.f32 %v833_v17 }
 0x567   :  { %v836_v18 = vpop.xlane.xlu1 %835 }
 0x568   :  { %6662 = vrcp.f32 %v836_v18 }
 0x56a   :  { %v6659_v19 = vpop.eup %6658 }
 0x56b   :  { %v840_v20 = vmul.f32 %v6659_v19, %v6647_v60 }
 0x56d   :  { %5551 = vmatmul.mubr.msk.f32.vlgmr.msra.gmra.mrb[6].mxu1 %vm615_vm5, %v840_v20 }
 0x56e   :  { %v6661_v22 = vpop.eup %6660  ;;  %5553 = vmatprep.mubr.msk.f32.mxu1 %vm7144_vm0, %v7145_v1  ;;  %6187 = vmatpush3.bf16.msra.mxu1 %v4220_v35 }
 0x56f   :  { %v841_v23 = vmul.f32 %v6661_v22, %v6649_v63  ;;  %6188 = vmatprep.subr.bf16.mxu1 %v7143_v0 }
 0x571   :  { %5554 = vmatmul.mubr.msk.f32.gmra.mrb[8].mxu1 %vm615_vm5, %v841_v23 }
 0x572   :  { %v6663_v24 = vpop.eup %6662  ;;  %5556 = vmatprep.mubr.msk.f32.mxu1 %vm7144_vm0, %v7145_v1  ;;  %6190 = vmatpush3.bf16.msra.mxu1 %v4848_v36 }
 0x573   :  { %v842_v25 = vmul.f32 %v6663_v24, %v6651_v4  ;;  %6191 = vmatprep.subr.bf16.mxu1 %v7143_v0 }
 0x575   :  { %5557 = vmatmul.mubr.msk.f32.gmra.mrb[10].mxu1 %vm615_vm5, %v842_v25 }
 0x576   :  { %5632 = vmatprep.mubr.msk.f32.mxu1 %vm7144_vm0, %v7145_v1  ;;  %6193 = vmatpush3.bf16.msra.mxu1 %v4849_v37 }
 0x577   :  { %6194 = vmatprep.subr.bf16.mxu1 %v7143_v0 }
 0x57a   :  { %6196 = vmatpush3.bf16.msra.mxu1 %v4850_v38 }
 0x57b   :  { %6197 = vmatprep.subr.bf16.mxu1 %v7143_v0 }
 0x57e   :  { %6199 = vmatpush3.bf16.msra.mxu1 %v4851_v39 }
 0x57f   :  { %6200 = vmatprep.subr.bf16.mxu1 %v7143_v0 }
 0x582   :  { %6202 = vmatpush3.bf16.msra.mxu1 %v4852_v40 }
 0x583   :  { %6203 = vmatprep.subr.bf16.mxu1 %v7143_v0 }
 0x586   :  { %6205 = vmatpush3.bf16.msra.mxu1 %v4853_v42 }
 0x587   :  { %6206 = vmatprep.subr.bf16.mxu1 %v7143_v0 }
 0x58a   :  { %6208 = vmatpush3.bf16.msra.mxu1 %v4854_v43 }
 0x58b   :  { %6212 = vmatprep.subr.bf16.mxu1 %v7143_v0 }
 0x602   :  { %v724_v44 = vpop.f32.mrb[6].mxu0 }
 0x603   :  { %v5537_v45 = vpop.f32.mrb[7].mxu0 }
 0x606   :  { %v729_v46 = vpop.f32.mrb[8].mxu0 }
 0x607   :  { %v5540_v47 = vpop.f32.mrb[9].mxu0 }
 0x60a   :  { %v734_v49 = vpop.f32.mrb[10].mxu0 }
 0x60b   :  { %v5543_v50 = vpop.f32.mrb[11].mxu0 }
 0x640   :  { %v918_v53 = vpop.f32.mrb[6].mxu1 }
 0x641   :  { %v935_v54 = vsel %vm932_vm11, %v918_v53, %v724_v44  ;;  %v5552_v55 = vpop.f32.mrb[7].mxu1 }
 0x642   :  { %v945_v56 = vadd.f32 %v4098_v52, %v935_v54 }
 0x644   :  { %v7673_v57 = vmax.f32 %v945_v56, 0.0  ;;  %v923_v58 = vpop.f32.mrb[8].mxu1 }
 0x645   :  { %v936_v59 = vsel %vm932_vm11, %v923_v58, %v729_v46  ;;  %v5555_v41 = vpop.f32.mrb[9].mxu1 }
 0x646   :  { %v946_v60 = vadd.f32 %v4098_v52, %v936_v59  ;;  %5592 = vmatmul.mubr.f32.vlgmr.msra.gmra.mrb[12].mxu0 %v7673_v57 }
 0x647   :  { %5594 = vmatprep.mubr.msk.f32.mxu0 %vm7144_vm0, %v7145_v1 }
 0x648   :  { %v7680_v62 = vmax.f32 %v946_v60, 0.0  ;;  %v928_v63 = vpop.f32.mrb[10].mxu1 }
 0x649   :  { %v937_v2 = vsel %vm932_vm11, %v928_v63, %v734_v49  ;;  %v5558_v4 = vpop.f32.mrb[11].mxu1 }
 0x64a   :  { %v947_v5 = vadd.f32 %v4098_v52, %v937_v2  ;;  %5595 = vmatmul.mubr.f32.gmra.mrb[14].mxu0 %v7680_v62 }
 0x64b   :  { %5597 = vmatprep.mubr.msk.f32.mxu0 %vm7144_vm0, %v7145_v1 }
 0x64c   :  { %v7687_v6 = vmax.f32 %v947_v5, 0.0 }
 0x64e   :  { %5598 = vmatmul.mubr.f32.gmra.mrb[16].mxu0 %v7687_v6 }
 0x64f   :  { %5647 = vmatprep.mubr.msk.f32.mxu0 %vm7144_vm0, %v7145_v1 }
 0x719   :  { %v1052_v7 = vpop.f32.mrb[12].mxu0 }
 0x71a   :  { %v5593_v8 = vpop.f32.mrb[13].mxu0  ;;  %5633 = vmatmul.mubr.f32.vlgmr.msra.gmra.mrb[12].mxu1 %v1052_v7 }
 0x71b   :  { %5635 = vmatprep.mubr.msk.f32.mxu1 %vm7144_vm0, %v7145_v1 }
 0x71d   :  { %v1057_v9 = vpop.f32.mrb[14].mxu0 }
 0x71e   :  { %v6210_v11 = vpack.c.bf16 %v1057_v9, %v1052_v7  ;;  %v5596_v12 = vpop.f32.mrb[15].mxu0  ;;  %5636 = vmatmul.mubr.f32.gmra.mrb[14].mxu1 %v1057_v9 }
 0x71f   :  { %5638 = vmatprep.mubr.msk.f32.mxu1 %vm7144_vm0, %v7145_v1 }
 0x720   :  { %6211 = vmatpush3.bf16.msra.mxu0 %v6210_v11  ;;  %6214 = vmatpush3.bf16.msra.mxu1 %v6210_v11 }
 0x721   :  { %v1062_v13 = vpop.f32.mrb[16].mxu0  ;;  %5645 = vmatprep.subr.mxu0 %v7145_v1  ;;  %5660 = vmatprep.subr.mxu1 %v7145_v1 }
 0x722   :  { %v5599_v14 = vpop.f32.mrb[17].mxu0  ;;  %5639 = vmatmul.mubr.f32.gmra.mrb[16].mxu1 %v1062_v13 }
 0x723   :  { %5662 = vmatprep.mubr.msk.f32.mxu1 %vm7144_vm0, %v7145_v1 }
 0x724   :  { %5646 = vmatpush3.msra.mxu0 %v1062_v13  ;;  %5661 = vmatpush3.msra.mxu1 %v1062_v13 }
 0x725   :  { %6215 = vmatprep.subr.bf16.mxu0 %v7143_v0  ;;  %6239 = vmatprep.subr.bf16.mxu1 %v7143_v0 }
 0x7ed   :  { %v1164_v15 = vpop.f32.mrb[12].mxu1 }
 0x7ee   :  { %1366 = vrot.lane.b32.xlu0 %v1164_v15, %s7148_s26  ;;  %v5634_v16 = vpop.f32.mrb[13].mxu1 }
 0x7f1   :  { %v1169_v17 = vpop.f32.mrb[14].mxu1 }
 0x7f2   :  { %1212 = vperm.xlu0 %6636, %v1164_v15   ;;  %1368 = vrot.lane.b32.xlu1 %v1169_v17, %s7148_s26  ;;  %v5637_v18 = vpop.f32.mrb[15].mxu1 }
 0x7f5   :  { %v1174_v19 = vpop.f32.mrb[16].mxu1 }
 0x7f6   :  { %1217 = vperm.xlu0 %6636, %v1169_v17   ;;  %1370 = vrot.lane.b32.xlu1 %v1174_v19, %s7148_s26  ;;  %v5640_v20 = vpop.f32.mrb[17].mxu1 }
 0x7fa   :  { %1222 = vperm.xlu0 %6636, %v1174_v19   ;;  %1408 = vperm.xlu1 %6635, %v1164_v15  }
 0x7fe   :  { %1412 = vperm.xlu1 %6635, %v1169_v17  }
 0x802   :  { %1416 = vperm.xlu1 %6635, %v1174_v19  }
 0x818   :  { %1178 = vxpose.xlu0.b32.start [1/3] (short) (narrow) %v1164_v15, 8 }
 0x81c   :  { %1179 = vxpose.xlu0.b32.cont [2/3] (short) (narrow) %v1169_v17, 8 }
 0x820   :  { %1180 = vxpose.xlu0.b32.end [3/3] (short) (narrow) %v1174_v19, 8 }
 0x849   :  { %6637 = vset.pattern.permute.xlu0 %v7147_v29 }
 0x860   :  { %v1367_v22 = vpop.permute.xlu0 %1366 }
 0x861   :  { %1375 = vxpose.xlu1.b32.start [1/3] (short) (narrow) %v1367_v22, 8 }
 0x864   :  { %v1369_v23 = vpop.permute.xlu1 %1368 }
 0x865   :  { %1376 = vxpose.xlu1.b32.cont [2/3] (short) (narrow) %v1369_v23, 8 }
 0x868   :  { %v1371_v24 = vpop.permute.xlu1 %1370 }
 0x869   :  { %1377 = vxpose.xlu1.b32.end [3/3] (short) (narrow) %v1371_v24, 8 }
 0x871   :  { %v1213_v25 = vpop.permute.xlu0 %1212 }
 0x875   :  { %v1218_v26 = vpop.permute.xlu0 %1217 }
 0x879   :  { %v1223_v27 = vpop.permute.xlu0 %1222  ;;  %v1409_v43 = vpop.permute.xlu1 %1408 }
 0x87d   :  { %v1413_v44 = vpop.permute.xlu1 %1412 }
 0x881   :  { %v1417_v45 = vpop.permute.xlu1 %1416 }
 0x898   :  { %v1194_v28 = vpop.trf.xlu0 }
 0x899   :  { %v1228_v30 = vrot.slane %v1194_v28, %v7602_v48 }
 0x89b   :  { %v1229_v31 = vadd.f32 %v1228_v30, %v1213_v25  ;;  %v1230_v32 = vadd.f32 %v1228_v30, %v1218_v26  ;;  %v1231_v33 = vadd.f32 %v1228_v30, %v1223_v27 }
 0x89d   :  { %vm1232_vm12 = vcmp.ge.f32.partialorder %v1229_v31, 0.0  ;;  %v1235_v34 = vmul.f32 0.2, %v1229_v31  ;;  %vm1233_vm13 = vcmp.ge.f32.partialorder %v1230_v32, 0.0  ;;  %v1236_v35 = vmul.f32 0.2, %v1230_v32 }
 0x89e   :  { %v1237_v53 = vmul.f32 0.2, %v1231_v33  ;;  %vm1234_vm14 = vcmp.ge.f32.partialorder %v1231_v33, 0.0 }
 0x89f   :  { %v1238_v36 = vsel %vm1232_vm12, %v1229_v31, %v1235_v34  ;;  %v1239_v37 = vsel %vm1233_vm13, %v1230_v32, %v1236_v35 }
 0x8a0   :  { %v1241_v38 = vadd.f32 %v1238_v36, %v7605_v61  ;;  %v1242_v40 = vadd.f32 %v1239_v37, %v7607_v3  ;;  %v1240_v41 = vsel %vm1234_vm14, %v1231_v33, %v1237_v53 }
 0x8a1   :  { %v1243_v8 = vadd.f32 %v1240_v41, %v7612_v10 }
 0x8a2   :  { %v1244_v39 = vsel %vm615_vm5, %v1241_v38, -inf  ;;  %v1247_v42 = vsel %vm615_vm5, %v1242_v40, -inf }
 0x8a3   :  { %1245 = vmax.xlane.f32.xlu0 %v1244_v39  ;;  %v1250_v11 = vsel %vm615_vm5, %v1243_v8, -inf }
 0x8a7   :  { %1248 = vmax.xlane.f32.xlu0 %v1247_v42 }
 0x8e1   :  { %v1391_v46 = vpop.trf.xlu1 }
 0x8e2   :  { %v1422_v47 = vrot.slane %v1391_v46, %v7602_v48 }
 0x8e4   :  { %v1423_v49 = vadd.f32 %v1422_v47, %v1409_v43  ;;  %v1424_v50 = vadd.f32 %v1422_v47, %v1413_v44  ;;  %v1425_v52 = vadd.f32 %v1422_v47, %v1417_v45 }
 0x8e6   :  { %vm1427_vm15 = vcmp.ge.f32.partialorder %v1424_v50, 0.0  ;;  %v1430_v54 = vmul.f32 0.2, %v1424_v50  ;;  %vm1426_vm1 = vcmp.ge.f32.partialorder %v1423_v49, 0.0  ;;  %v1429_v55 = vmul.f32 0.2, %v1423_v49 }
 0x8e7   :  { %vm1428_vm2 = vcmp.ge.f32.partialorder %v1425_v52, 0.0  ;;  %v1431_v56 = vmul.f32 0.2, %v1425_v52 }
 0x8e8   :  { %v1433_v58 = vsel %vm1427_vm15, %v1424_v50, %v1430_v54  ;;  %v1432_v59 = vsel %vm1426_vm1, %v1423_v49, %v1429_v55 }
 0x8e9   :  { %v1436_v60 = vadd.f32 %v1433_v58, %v7607_v3  ;;  %v1435_v63 = vadd.f32 %v1432_v59, %v7605_v61  ;;  %v1434_v2 = vsel %vm1428_vm2, %v1425_v52, %v1431_v56 }
 0x8ea   :  { %v1437_v7 = vadd.f32 %v1434_v2, %v7612_v10 }
 0x8eb   :  { %v1441_v4 = vsel %vm615_vm5, %v1436_v60, -inf  ;;  %v1438_v5 = vsel %vm615_vm5, %v1435_v63, -inf }
 0x8ec   :  { %1442 = vmax.xlane.f32.xlu0 %v1441_v4  ;;  %1439 = vmax.xlane.f32.xlu1 %v1438_v5  ;;  %v1444_v9 = vsel %vm615_vm5, %v1437_v7, -inf }
 0x8f0   :  { %1445 = vmax.xlane.f32.xlu0 %v1444_v9  ;;  %1251 = vmax.xlane.f32.xlu1 %v1250_v11  ;;  %v4856_v9 = vld [vmem:[#allocation15 + $0x10] sm:$0xff]   ;;  %v4857_v11 = vld [vmem:[#allocation15 + $0x18] sm:$0xff]  }
 0x930   :  { %v1246_v12 = vpop.xlane.xlu0 %1245 }
 0x931   :  { %v1253_v13 = vsub.f32 %v1241_v38, %v1246_v12  ;;  %v4858_v12 = vld [vmem:[#allocation15 + $0x20] sm:$0xff]  }
 0x933   :  { %v1256_v14 = vmul.f32 1.442695, %v1253_v13  ;;  %v4859_v13 = vld [vmem:[#allocation15 + $0x28] sm:$0xff]  }
 0x934   :  { %v1249_v15 = vpop.xlane.xlu0 %1248 }
 0x935   :  { %6664 = vpow2.f32 %v1256_v14  ;;  %v1254_v16 = vsub.f32 %v1242_v40, %v1249_v15  ;;  %v4860_v14 = vld [vmem:[#allocation15 + $0x30] sm:$0xff]   ;;  %v4861_v15 = vld [vmem:[#allocation15 + $0x38] sm:$0xff]  }
 0x937   :  { %v1258_v17 = vmul.f32 1.442695, %v1254_v16  ;;  %v4284_v16 = vld [vmem:[%s8191_s5] sm:$0xff]  }
 0x939   :  { %6666 = vpow2.f32 %v1258_v17  ;;  %v4862_v17 = vld [vmem:[%s8191_s5 + $0x8] sm:$0xff]  }
 0x93f   :  { %v6665_v18 = vpop.eup %6664 }
 0x940   :  { %v1262_v19 = vsel %vm615_vm5, %v6665_v18, 0.0 }
 0x941   :  { %1263 = vadd.xlane.f32.xlu1 %v1262_v19  ;;  %v4864_v19 = vld [vmem:[%s8191_s5 + $0x18] sm:$0xff]  }
 0x943   :  { %v6667_v20 = vpop.eup %6666 }
 0x944   :  { %v1265_v22 = vsel %vm615_vm5, %v6667_v20, 0.0 }
 0x945   :  { %1266 = vadd.xlane.f32.xlu1 %v1265_v22  ;;  %v4866_v22 = vld [vmem:[%s8191_s5 + $0x28] sm:$0xff]  }
 0x979   :  { %v1443_v23 = vpop.xlane.xlu0 %1442  ;;  %v1440_v24 = vpop.xlane.xlu1 %1439 }
 0x97a   :  { %v1448_v25 = vsub.f32 %v1436_v60, %v1443_v23  ;;  %v1447_v26 = vsub.f32 %v1435_v63, %v1440_v24  ;;  %v4867_v23 = vld [vmem:[%s8191_s5 + $0x30] sm:$0xff]   ;;  %v4868_v24 = vld [vmem:[%s8191_s5 + $0x38] sm:$0xff]  }
 0x97c   :  { %v1450_v27 = vmul.f32 1.442695, %v1447_v26  ;;  %v1452_v28 = vmul.f32 1.442695, %v1448_v25 }
 0x97d   :  { %v1446_v30 = vpop.xlane.xlu0 %1445  ;;  %v1252_v31 = vpop.xlane.xlu1 %1251 }
 0x97e   :  { %v1449_v32 = vsub.f32 %v1437_v7, %v1446_v30  ;;  %v1255_v33 = vsub.f32 %v1243_v8, %v1252_v31  ;;  %6668 = vpow2.f32 %v1450_v27  ;;  %v4252_v7 = vld [vmem:[#allocation15] sm:$0xff]   ;;  %v4855_v8 = vld [vmem:[#allocation15 + $0x8] sm:$0xff]   ;;  %v4105_v30 = vld [vmem:[#allocation14] ss:$0 sm:$0xff] }
 0x97f   :  { %6670 = vpow2.f32 %v1452_v28 }
 0x980   :  { %v1260_v34 = vmul.f32 1.442695, %v1255_v33  ;;  %v1454_v35 = vmul.f32 1.442695, %v1449_v32 }
 0x982   :  { %6672 = vpow2.f32 %v1260_v34 }
 0x983   :  { %6674 = vpow2.f32 %v1454_v35 }
 0x988   :  { %v6669_v36 = vpop.eup %6668 }
 0x989   :  { %v1456_v37 = vsel %vm615_vm5, %v6669_v36, 0.0  ;;  %v6671_v38 = vpop.eup %6670 }
 0x98a   :  { %1457 = vadd.xlane.f32.xlu0 %v1456_v37  ;;  %v1459_v40 = vsel %vm615_vm5, %v6671_v38, 0.0 }
 0x98c   :  { %v6673_v39 = vpop.eup %6672 }
 0x98d   :  { %v1268_v42 = vsel %vm615_vm5, %v6673_v39, 0.0  ;;  %v6675_v43 = vpop.eup %6674 }
 0x98e   :  { %1460 = vadd.xlane.f32.xlu0 %v1459_v40  ;;  %1269 = vadd.xlane.f32.xlu1 %v1268_v42  ;;  %v1462_v44 = vsel %vm615_vm5, %v6675_v43, 0.0 }
 0x992   :  { %1463 = vadd.xlane.f32.xlu0 %v1462_v44 }
 0x9ce   :  { %v1264_v45 = vpop.xlane.xlu1 %1263 }
 0x9cf   :  { %6676 = vrcp.f32 %v1264_v45 }
 0x9d2   :  { %v1267_v46 = vpop.xlane.xlu1 %1266 }
 0x9d3   :  { %6678 = vrcp.f32 %v1267_v46 }
 0x9d9   :  { %v6677_v47 = vpop.eup %6676 }
 0x9da   :  { %v1274_v49 = vmul.f32 %v6677_v47, %v6665_v18  ;;  %v4863_v18 = vld [vmem:[%s8191_s5 + $0x10] sm:$0xff]  }
 0x9dc   :  { %5648 = vmatmul.mubr.msk.f32.vlgmr.msra.gmra.mrb[18].mxu0 %vm615_vm5, %v1274_v49 }
 0x9dd   :  { %v6679_v50 = vpop.eup %6678  ;;  %5650 = vmatprep.mubr.msk.f32.mxu0 %vm7144_vm0, %v7145_v1  ;;  %6217 = vmatpush3.bf16.msra.mxu0 %v4252_v7 }
 0x9de   :  { %v1275_v52 = vmul.f32 %v6679_v50, %v6667_v20  ;;  %6218 = vmatprep.subr.bf16.mxu0 %v7143_v0  ;;  %v4865_v20 = vld [vmem:[%s8191_s5 + $0x20] sm:$0xff]   ;;  %s8193_s5 = sld [smem:[#allocation51_spill]] }
 0x9e0   :  { %5651 = vmatmul.mubr.msk.f32.gmra.mrb[20].mxu0 %vm615_vm5, %v1275_v52 }
 0x9e1   :  { %5653 = vmatprep.mubr.msk.f32.mxu0 %vm7144_vm0, %v7145_v1  ;;  %6220 = vmatpush3.bf16.msra.mxu0 %v4855_v8 }
 0x9e2   :  { %6221 = vmatprep.subr.bf16.mxu0 %v7143_v0 }
 0x9e5   :  { %6223 = vmatpush3.bf16.msra.mxu0 %v4856_v9 }
 0x9e6   :  { %6224 = vmatprep.subr.bf16.mxu0 %v7143_v0 }
 0x9e9   :  { %6226 = vmatpush3.bf16.msra.mxu0 %v4857_v11 }
 0x9ea   :  { %6227 = vmatprep.subr.bf16.mxu0 %v7143_v0 }
 0x9ed   :  { %6229 = vmatpush3.bf16.msra.mxu0 %v4858_v12 }
 0x9ee   :  { %6230 = vmatprep.subr.bf16.mxu0 %v7143_v0 }
 0x9f1   :  { %6232 = vmatpush3.bf16.msra.mxu0 %v4859_v13 }
 0x9f2   :  { %6233 = vmatprep.subr.bf16.mxu0 %v7143_v0 }
 0x9f5   :  { %6235 = vmatpush3.bf16.msra.mxu0 %v4860_v14 }
 0x9f6   :  { %6236 = vmatprep.subr.bf16.mxu0 %v7143_v0 }
 0x9f9   :  { %6238 = vmatpush3.bf16.msra.mxu0 %v4861_v15 }
 0x9fa   :  { %6263 = vmatprep.subr.bf16.mxu0 %v7143_v0 }
 0xa17   :  { %v1458_v53 = vpop.xlane.xlu0 %1457 }
 0xa18   :  { %6680 = vrcp.f32 %v1458_v53 }
 0xa1b   :  { %v1461_v54 = vpop.xlane.xlu0 %1460  ;;  %v1270_v55 = vpop.xlane.xlu1 %1269 }
 0xa1c   :  { %6682 = vrcp.f32 %v1461_v54 }
 0xa1d   :  { %6684 = vrcp.f32 %v1270_v55 }
 0xa1f   :  { %v1464_v56 = vpop.xlane.xlu0 %1463 }
 0xa20   :  { %6686 = vrcp.f32 %v1464_v56 }
 0xa22   :  { %v6681_v58 = vpop.eup %6680 }
 0xa23   :  { %v1468_v59 = vmul.f32 %v6681_v58, %v6669_v36 }
 0xa25   :  { %5663 = vmatmul.mubr.msk.f32.vlgmr.msra.gmra.mrb[18].mxu1 %vm615_vm5, %v1468_v59 }
 0xa26   :  { %v6683_v41 = vpop.eup %6682  ;;  %5665 = vmatprep.mubr.msk.f32.mxu1 %vm7144_vm0, %v7145_v1  ;;  %6241 = vmatpush3.bf16.msra.mxu1 %v4284_v16 }
 0xa27   :  { %v6685_v60 = vpop.eup %6684  ;;  %v1469_v63 = vmul.f32 %v6683_v41, %v6671_v38  ;;  %6242 = vmatprep.subr.bf16.mxu1 %v7143_v0 }
 0xa28   :  { %v1276_v2 = vmul.f32 %v6685_v60, %v6673_v39 }
 0xa29   :  { %5666 = vmatmul.mubr.msk.f32.gmra.mrb[20].mxu1 %vm615_vm5, %v1469_v63 }
 0xa2a   :  { %v6687_v4 = vpop.eup %6686  ;;  %5654 = vmatmul.mubr.msk.f32.gmra.mrb[22].mxu0 %vm615_vm5, %v1276_v2  ;;  %5668 = vmatprep.mubr.msk.f32.mxu1 %vm7144_vm0, %v7145_v1 }
 0xa2b   :  { %v1470_v5 = vmul.f32 %v6687_v4, %v6675_v43  ;;  %5703 = vmatprep.mubr.msk.f32.mxu0 %vm7144_vm0, %v7145_v1  ;;  %6244 = vmatpush3.bf16.msra.mxu1 %v4862_v17 }
 0xa2c   :  { %6245 = vmatprep.subr.bf16.mxu1 %v7143_v0 }
 0xa2d   :  { %5669 = vmatmul.mubr.msk.f32.gmra.mrb[22].mxu1 %vm615_vm5, %v1470_v5 }
 0xa2e   :  { %5744 = vmatprep.mubr.msk.f32.mxu1 %vm7144_vm0, %v7145_v1 }
 0xa2f   :  { %6247 = vmatpush3.bf16.msra.mxu1 %v4863_v18 }
 0xa30   :  { %6248 = vmatprep.subr.bf16.mxu1 %v7143_v0 }
 0xa33   :  { %6250 = vmatpush3.bf16.msra.mxu1 %v4864_v19 }
 0xa34   :  { %6251 = vmatprep.subr.bf16.mxu1 %v7143_v0 }
 0xa37   :  { %6253 = vmatpush3.bf16.msra.mxu1 %v4865_v20 }
 0xa38   :  { %6254 = vmatprep.subr.bf16.mxu1 %v7143_v0 }
 0xa3b   :  { %6256 = vmatpush3.bf16.msra.mxu1 %v4866_v22 }
 0xa3c   :  { %6257 = vmatprep.subr.bf16.mxu1 %v7143_v0 }
 0xa3f   :  { %6259 = vmatpush3.bf16.msra.mxu1 %v4867_v23 }
 0xa40   :  { %6260 = vmatprep.subr.bf16.mxu1 %v7143_v0 }
 0xa43   :  { %6262 = vmatpush3.bf16.msra.mxu1 %v4868_v24 }
 0xa44   :  { %6266 = vmatprep.subr.bf16.mxu1 %v7143_v0 }
 0xaaf   :  { %v1352_v25 = vpop.f32.mrb[18].mxu0 }
 0xab0   :  { %v5649_v26 = vpop.f32.mrb[19].mxu0 }
 0xab3   :  { %v1357_v27 = vpop.f32.mrb[20].mxu0 }
 0xab4   :  { %v5652_v28 = vpop.f32.mrb[21].mxu0 }
 0xaf8   :  { %v1546_v31 = vpop.f32.mrb[18].mxu1 }
 0xaf9   :  { %v1560_v32 = vsel %vm932_vm11, %v1546_v31, %v1352_v25  ;;  %v5664_v33 = vpop.f32.mrb[19].mxu1 }
 0xafa   :  { %v1570_v34 = vadd.f32 %v4105_v30, %v1560_v32 }
 0xafc   :  { %v7786_v35 = vmax.f32 %v1570_v34, 0.0  ;;  %v1551_v36 = vpop.f32.mrb[20].mxu1 }
 0xafd   :  { %v1362_v37 = vpop.f32.mrb[22].mxu0  ;;  %v1561_v38 = vsel %vm932_vm11, %v1551_v36, %v1357_v27  ;;  %v5667_v39 = vpop.f32.mrb[21].mxu1 }
 0xafe   :  { %v1571_v40 = vadd.f32 %v4105_v30, %v1561_v38  ;;  %v5655_v42 = vpop.f32.mrb[23].mxu0  ;;  %5704 = vmatmul.mubr.f32.vlgmr.msra.gmra.mrb[24].mxu0 %v7786_v35 }
 0xaff   :  { %5706 = vmatprep.mubr.msk.f32.mxu0 %vm7144_vm0, %v7145_v1 }
 0xb00   :  { %v7793_v43 = vmax.f32 %v1571_v40, 0.0  ;;  %v1556_v44 = vpop.f32.mrb[22].mxu1 }
 0xb01   :  { %v1562_v45 = vsel %vm932_vm11, %v1556_v44, %v1362_v37  ;;  %v5670_v46 = vpop.f32.mrb[23].mxu1 }
 0xb02   :  { %v1572_v47 = vadd.f32 %v4105_v30, %v1562_v45  ;;  %5707 = vmatmul.mubr.f32.gmra.mrb[26].mxu0 %v7793_v43  ;;  %v6269_v59 = vpack.c.bf16 %v7793_v43, %v7786_v35 }
 0xb03   :  { %5709 = vmatprep.mubr.msk.f32.mxu0 %vm7144_vm0, %v7145_v1 }
 0xb04   :  { %v7800_v49 = vmax.f32 %v1572_v47, 0.0 }
 0xb06   :  { %5710 = vmatmul.mubr.f32.gmra.mrb[28].mxu0 %v7800_v49 }
 0xb07   :  { %5759 = vmatprep.mubr.msk.f32.mxu0 %vm7144_vm0, %v7145_v1 }
 0xbd1   :  { %v1677_v50 = vpop.f32.mrb[24].mxu0 }
 0xbd2   :  { %v5705_v52 = vpop.f32.mrb[25].mxu0  ;;  %5745 = vmatmul.mubr.f32.vlgmr.msra.gmra.mrb[24].mxu1 %v1677_v50 }
 0xbd3   :  { %5747 = vmatprep.mubr.msk.f32.mxu1 %vm7144_vm0, %v7145_v1 }
 0xbd5   :  { %v1682_v53 = vpop.f32.mrb[26].mxu0 }
 0xbd6   :  { %v6264_v54 = vpack.c.bf16 %v1682_v53, %v1677_v50  ;;  %v5708_v55 = vpop.f32.mrb[27].mxu0  ;;  %5748 = vmatmul.mubr.f32.gmra.mrb[26].mxu1 %v1682_v53 }
 0xbd7   :  { %5750 = vmatprep.mubr.msk.f32.mxu1 %vm7144_vm0, %v7145_v1 }
 0xbd8   :  { %6265 = vmatpush3.bf16.msra.mxu0 %v6264_v54  ;;  %6268 = vmatpush3.bf16.msra.mxu1 %v6264_v54 }
 0xbd9   :  { %v1687_v56 = vpop.f32.mrb[28].mxu0  ;;  %5757 = vmatprep.subr.mxu0 %v7145_v1  ;;  %5772 = vmatprep.subr.mxu1 %v7145_v1 }
 0xbda   :  { %v5711_v58 = vpop.f32.mrb[29].mxu0  ;;  %5751 = vmatmul.mubr.f32.gmra.mrb[28].mxu1 %v1687_v56 }
 0xbdb   :  { %5774 = vmatprep.mubr.msk.f32.mxu1 %vm7144_vm0, %v7145_v1 }
 0xbdc   :  { %5758 = vmatpush3.msra.mxu0 %v1687_v56  ;;  %5773 = vmatpush3.msra.mxu1 %v1687_v56 }
 0xbdd   :  { %6270 = vmatprep.subr.bf16.mxu1 %v6269_v59 }
 0xca5   :  { %v1789_v41 = vpop.f32.mrb[24].mxu1 }
 0xca6   :  { %1902 = vrot.lane.b32.xlu1 %v1789_v41, %s7148_s26  ;;  %v5746_v60 = vpop.f32.mrb[25].mxu1 }
 0xca9   :  { %v1794_v63 = vpop.f32.mrb[26].mxu1 }
 0xcaa   :  { %1904 = vrot.lane.b32.xlu0 %v1794_v63, %s7148_s26  ;;  %v5749_v2 = vpop.f32.mrb[27].mxu1 }
 0xcad   :  { %v1799_v4 = vpop.f32.mrb[28].mxu1 }
 0xcae   :  { %1948 = vperm.xlu0 %6637, %v1794_v63   ;;  %1906 = vrot.lane.b32.xlu1 %v1799_v4, %s7148_s26  ;;  %v5752_v5 = vpop.f32.mrb[29].mxu1 }
 0xcb2   :  { %6638 = vset.pattern.permute.xlu0 %v7146_v21  ;;  %1944 = vperm.xlu1 %6635, %v1789_v41  }
 0xcb3   :  { %1837 = vperm.xlu0 %6638, %v1789_v41  }
 0xcb6   :  { %1952 = vperm.xlu1 %6635, %v1799_v4  }
 0xcb7   :  { %1842 = vperm.xlu0 %6638, %v1794_v63  }
 0xcbb   :  { %1847 = vperm.xlu0 %6638, %v1799_v4  }
 0xd18   :  { %v1903_v7 = vpop.permute.xlu1 %1902 }
 0xd19   :  { %1911 = vxpose.xlu1.b32.start [1/3] (short) (narrow) %v1903_v7, 8 }
 0xd1c   :  { %v1905_v8 = vpop.permute.xlu0 %1904 }
 0xd1d   :  { %1912 = vxpose.xlu1.b32.cont [2/3] (short) (narrow) %v1905_v8, 8 }
 0xd20   :  { %v1907_v9 = vpop.permute.xlu1 %1906 }
 0xd21   :  { %1913 = vxpose.xlu1.b32.end [3/3] (short) (narrow) %v1907_v9, 8 }
 0xd2d   :  { %v1949_v15 = vpop.permute.xlu0 %1948 }
 0xd31   :  { %v1945_v11 = vpop.permute.xlu1 %1944 }
 0xd32   :  { %v1838_v32 = vpop.permute.xlu0 %1837 }
 0xd35   :  { %v1953_v12 = vpop.permute.xlu1 %1952 }
 0xd36   :  { %v1843_v33 = vpop.permute.xlu0 %1842 }
 0xd3a   :  { %v1848_v34 = vpop.permute.xlu0 %1847 }
 0xd99   :  { %v1927_v13 = vpop.trf.xlu1 }
 0xd9a   :  { %v1958_v14 = vrot.slane %v1927_v13, %v7602_v48 }
 0xd9c   :  { %v1959_v16 = vadd.f32 %v1958_v14, %v1945_v11  ;;  %v1960_v17 = vadd.f32 %v1958_v14, %v1949_v15  ;;  %v1961_v21 = vadd.f32 %v1958_v14, %v1953_v12 }
 0xd9e   :  { %vm1963_vm3 = vcmp.ge.f32.partialorder %v1960_v17, 0.0  ;;  %v1966_v18 = vmul.f32 0.2, %v1960_v17  ;;  %vm1962_vm4 = vcmp.ge.f32.partialorder %v1959_v16, 0.0  ;;  %v1965_v19 = vmul.f32 0.2, %v1959_v16 }
 0xd9f   :  { %vm1964_vm6 = vcmp.ge.f32.partialorder %v1961_v21, 0.0  ;;  %v1967_v20 = vmul.f32 0.2, %v1961_v21 }
 0xda0   :  { %v1969_v22 = vsel %vm1963_vm3, %v1960_v17, %v1966_v18  ;;  %v1968_v23 = vsel %vm1962_vm4, %v1959_v16, %v1965_v19 }
 0xda1   :  { %v1972_v24 = vadd.f32 %v1969_v22, %v7607_v3  ;;  %v1971_v25 = vadd.f32 %v1968_v23, %v7605_v61  ;;  %v1970_v26 = vsel %vm1964_vm6, %v1961_v21, %v1967_v20 }
 0xda2   :  { %v1973_v30 = vadd.f32 %v1970_v26, %v7612_v10 }
 0xda3   :  { %v1977_v27 = vsel %vm615_vm5, %v1972_v24, -inf  ;;  %v1974_v28 = vsel %vm615_vm5, %v1971_v25, -inf }
 0xda4   :  { %1978 = vmax.xlane.f32.xlu1 %v1977_v27  ;;  %1975 = vmax.xlane.f32.xlu0 %v1974_v28  ;;  %v1980_v31 = vsel %vm615_vm5, %v1973_v30, -inf }
 0xda8   :  { %1981 = vmax.xlane.f32.xlu0 %v1980_v31 }
 0xdd5   :  { %1803 = vxpose.xlu0.b32.start [1/3] (short) (narrow) %v1789_v41, 8 }
 0xdd9   :  { %1804 = vxpose.xlu0.b32.cont [2/3] (short) (narrow) %v1794_v63, 8 }
 0xddd   :  { %1805 = vxpose.xlu0.b32.end [3/3] (short) (narrow) %v1799_v4, 8 }
 0xe06   :  { %6639 = vset.pattern.permute.xlu0 %v7147_v29 }
 0xe31   :  { %v1976_v36 = vpop.xlane.xlu0 %1975  ;;  %v1979_v46 = vpop.xlane.xlu1 %1978 }
 0xe32   :  { %v1983_v44 = vsub.f32 %v1971_v25, %v1976_v36  ;;  %v1984_v53 = vsub.f32 %v1972_v24, %v1979_v46  ;;  %v4879_v46 = vld [vmem:[#allocation17 + $0x58] sm:$0xff]  }
 0xe34   :  { %v1986_v54 = vmul.f32 1.442695, %v1983_v44  ;;  %v1988_v63 = vmul.f32 1.442695, %v1984_v53  ;;  %v4873_v53 = vld [vmem:[#allocation17 + $0x28] sm:$0xff]  }
 0xe35   :  { %v1982_v37 = vpop.xlane.xlu0 %1981 }
 0xe36   :  { %v1985_v38 = vsub.f32 %v1973_v30, %v1982_v37 }
 0xe38   :  { %v1990_v39 = vmul.f32 1.442695, %v1985_v38  ;;  %v4869_v38 = vld [vmem:[#allocation17 + $0x8] sm:$0xff]  }
 0xe3a   :  { %6688 = vpow2.f32 %v1990_v39 }
 0xe3b   :  { %6690 = vpow2.f32 %v1986_v54  ;;  %v4882_v54 = vld [vmem:[#allocation17 + $0x70] sm:$0xff]  }
 0xe3c   :  { %6692 = vpow2.f32 %v1988_v63 }
 0xe44   :  { %v7827_v40 = vpop.eup %6688 }
 0xe45   :  { %v1998_v42 = vsel %vm615_vm5, %v7827_v40, 0.0  ;;  %v6691_v9 = vpop.eup %6690 }
 0xe46   :  { %1999 = vadd.xlane.f32.xlu0 %v1998_v42  ;;  %v6693_v11 = vpop.eup %6692  ;;  %v4878_v42 = vld [vmem:[#allocation17 + $0x50] sm:$0xff]  }
 0xe47   :  { %v1995_v12 = vsel %vm615_vm5, %v6693_v11, 0.0 }
 0xe55   :  { %v1819_v45 = vpop.trf.xlu0 }
 0xe56   :  { %v1853_v47 = vrot.slane %v1819_v45, %v7602_v48  ;;  %v4870_v45 = vld [vmem:[#allocation17 + $0x10] sm:$0xff]  }
 0xe58   :  { %v1854_v29 = vadd.f32 %v1853_v47, %v1838_v32  ;;  %v1855_v50 = vadd.f32 %v1853_v47, %v1843_v33  ;;  %v1856_v52 = vadd.f32 %v1853_v47, %v1848_v34  ;;  %v4316_v33 = vld [vmem:[#allocation17] sm:$0xff]   ;;  %v4877_v34 = vld [vmem:[#allocation17 + $0x48] sm:$0xff]   ;;  %v4871_v47 = vld [vmem:[#allocation17 + $0x18] sm:$0xff]  }
 0xe5a   :  { %vm1857_vm7 = vcmp.ge.f32.partialorder %v1854_v29, 0.0  ;;  %v1860_v55 = vmul.f32 0.2, %v1854_v29  ;;  %vm1858_vm8 = vcmp.ge.f32.partialorder %v1855_v50, 0.0  ;;  %v1861_v56 = vmul.f32 0.2, %v1855_v50 }
 0xe5b   :  { %v1862_v41 = vmul.f32 0.2, %v1856_v52  ;;  %vm1859_vm9 = vcmp.ge.f32.partialorder %v1856_v52, 0.0 }
 0xe5c   :  { %v1863_v58 = vsel %vm1857_vm7, %v1854_v29, %v1860_v55  ;;  %v1864_v59 = vsel %vm1858_vm8, %v1855_v50, %v1861_v56  ;;  %v4880_v29 = vld [vmem:[#allocation17 + $0x60] sm:$0xff]   ;;  %v4883_v55 = vld [vmem:[#allocation17 + $0x78] sm:$0xff]  }
 0xe5d   :  { %v1866_v60 = vadd.f32 %v1863_v58, %v7605_v61  ;;  %v1867_v48 = vadd.f32 %v1864_v59, %v7607_v3  ;;  %v1865_v4 = vsel %vm1859_vm9, %v1856_v52, %v1862_v41  ;;  %v1992_v61 = vsel %vm615_vm5, %v6691_v9, 0.0  ;;  %v4876_v3 = vld [vmem:[#allocation17 + $0x40] sm:$0xff]   ;;  %v4881_v52 = vld [vmem:[#allocation17 + $0x68] sm:$0xff]   ;;  %v4875_v56 = vld [vmem:[#allocation17 + $0x38] sm:$0xff]  }
 0xe5e   :  { %v1868_v7 = vadd.f32 %v1865_v4, %v7612_v10  ;;  %6277 = vmatprep.subr.bf16.mxu0 %v4876_v3  ;;  %v4872_v50 = vld [vmem:[#allocation17 + $0x20] sm:$0xff]  }
 0xe5f   :  { %v1869_v2 = vsel %vm615_vm5, %v1866_v60, -inf  ;;  %v1872_v5 = vsel %vm615_vm5, %v1867_v48, -inf }
 0xe60   :  { %1870 = vmax.xlane.f32.xlu1 %v1869_v2  ;;  %v1875_v8 = vsel %vm615_vm5, %v1868_v7, -inf  ;;  %v6271_v2 = vpack.c.bf16 %v7680_v62, %v7673_v57 }
 0xe64   :  { %1873 = vmax.xlane.f32.xlu1 %v1872_v5 }
 0xe68   :  { %1876 = vmax.xlane.f32.xlu1 %v1875_v8 }
 0xe6c   :  { %1993 = vadd.xlane.f32.xlu1 %v1992_v61 }
 0xe70   :  { %1996 = vadd.xlane.f32.xlu1 %v1995_v12 }
 0xed3   :  { %v2000_v25 = vpop.xlane.xlu0 %1999 }
 0xeed   :  { %v1871_v13 = vpop.xlane.xlu1 %1870 }
 0xeee   :  { %v1878_v14 = vsub.f32 %v1866_v60, %v1871_v13 }
 0xef0   :  { %v1881_v15 = vmul.f32 1.442695, %v1878_v14 }
 0xef1   :  { %v1874_v16 = vpop.xlane.xlu1 %1873 }
 0xef2   :  { %6694 = vpow2.f32 %v1881_v15  ;;  %v1879_v10 = vsub.f32 %v1867_v48, %v1874_v16 }
 0xef4   :  { %v1883_v17 = vmul.f32 1.442695, %v1879_v10 }
 0xef5   :  { %v1877_v21 = vpop.xlane.xlu1 %1876 }
 0xef6   :  { %6696 = vpow2.f32 %v1883_v17  ;;  %v1880_v18 = vsub.f32 %v1868_v7, %v1877_v21 }
 0xef8   :  { %v1885_v19 = vmul.f32 1.442695, %v1880_v18 }
 0xef9   :  { %v1994_v20 = vpop.xlane.xlu1 %1993 }
 0xefa   :  { %6698 = vpow2.f32 %v1885_v19 }
 0xefb   :  { %6700 = vrcp.f32 %v1994_v20  ;;  %v7894_v20 = vld [vmem:[%s8192_s27] sm:$0xff] }
 0xefc   :  { %v7840_v22 = vpop.eup %6694 }
 0xefd   :  { %v1997_v23 = vpop.xlane.xlu1 %1996  ;;  %v1887_v24 = vsel %vm615_vm5, %v7840_v22, 0.0 }
 0xefe   :  { %6702 = vrcp.f32 %v1997_v23  ;;  %1888 = vadd.xlane.f32.xlu1 %v1887_v24  ;;  %v2227_v23 = vld [vmem:[%s8192_s27 + $0x10] sm:$0xff] }
 0xeff   :  { %6704 = vrcp.f32 %v2000_v25 }
 0xf00   :  { %v7844_v26 = vpop.eup %6696 }
 0xf01   :  { %v1890_v27 = vsel %vm615_vm5, %v7844_v26, 0.0 }
 0xf02   :  { %1891 = vadd.xlane.f32.xlu1 %v1890_v27 }
 0xf04   :  { %v7848_v28 = vpop.eup %6698 }
 0xf05   :  { %v6701_v30 = vpop.eup %6700  ;;  %v1893_v31 = vsel %vm615_vm5, %v7848_v28, 0.0 }
 0xf06   :  { %v2004_v32 = vmul.f32 %v6701_v30, %v6691_v9  ;;  %1894 = vadd.xlane.f32.xlu1 %v1893_v31 }
 0xf08   :  { %v6703_v36 = vpop.eup %6702  ;;  %5760 = vmatmul.mubr.msk.f32.vlgmr.msra.gmra.mrb[30].mxu0 %vm615_vm5, %v2004_v32 }
 0xf09   :  { %6279 = vmatpush3.bf16.msra.mxu0 %v4316_v33  ;;  %5762 = vmatprep.mubr.msk.f32.mxu0 %vm7144_vm0, %v7145_v1  ;;  %v2005_v37 = vmul.f32 %v6703_v36, %v6693_v11  ;;  %v6705_v39 = vpop.eup %6704 }
 0xf0a   :  { %6281 = vmatprep.subr.bf16.mxu0 %v4877_v34  ;;  %v2006_v44 = vmul.f32 %v6705_v39, %v7827_v40  ;;  %v4874_v40 = vld [vmem:[#allocation17 + $0x30] sm:$0xff]  }
 0xf0c   :  { %5763 = vmatmul.mubr.msk.f32.gmra.mrb[32].mxu0 %vm615_vm5, %v2005_v37 }
 0xf0d   :  { %6283 = vmatpush3.bf16.msra.mxu0 %v4869_v38  ;;  %5765 = vmatprep.mubr.msk.f32.mxu0 %vm7144_vm0, %v7145_v1 }
 0xf0e   :  { %6285 = vmatprep.subr.bf16.mxu0 %v4878_v42 }
 0xf10   :  { %5766 = vmatmul.mubr.msk.f32.gmra.mrb[34].mxu0 %vm615_vm5, %v2006_v44 }
 0xf11   :  { %6287 = vmatpush3.bf16.msra.mxu0 %v4870_v45  ;;  %2571 = vmatprep.mubr.f32.mxu0 %v7786_v35  ;;  %v4112_v45 = vld [vmem:[%s8193_s5] ss:$0 sm:$0xff]  ;;  %s7083_s5 = scalar_lea.vmem %s4076_s2, 32 }
 0xf12   :  { %6289 = vmatprep.subr.bf16.mxu0 %v4879_v46  ;;  %p7085_p4 = scmp.lt.s32.totalorder %s7083_s5, %s7079_s30 }
 0xf14   :  { %p7086_p5 = por %p7085_p4, %p7084_p3 }
 0xf15   :  { %6291 = vmatpush3.bf16.msra.mxu0 %v4871_v47 }
 0xf16   :  { %6293 = vmatprep.subr.bf16.mxu0 %v4880_v29  ;;  %p7087_p6 = pnand %p7086_p5, %p7080_p2 }
 0xf19   :  { %6295 = vmatpush3.bf16.msra.mxu0 %v4872_v50 }
 0xf1a   :  { %6297 = vmatprep.subr.bf16.mxu0 %v4881_v52 }
 0xf1d   :  { %6299 = vmatpush3.bf16.msra.mxu0 %v4873_v53 }
 0xf1e   :  { %6301 = vmatprep.subr.bf16.mxu0 %v4882_v54 }
 0xf21   :  { %6303 = vmatpush3.bf16.msra.mxu0 %v4874_v40 }
 0xf22   :  { %6305 = vmatprep.subr.bf16.mxu0 %v4883_v55 }
 0xf25   :  { %6307 = vmatpush3.bf16.msra.mxu0 %v4875_v56  ;;  %v4884_v56 = vld [vmem:[#allocation17 + $0x80] sm:$0xff]  }
 0xf26   :  { %6332 = vmatprep.subr.bf16.mxu0 %v7143_v0 }
 0xf28   :  { %2572 = vmatmul.mubr.f32.vlgmr.msra.gmra.mrb[36].mxu0 %v7673_v57 }
 0xf29   :  { %2576 = vmatprep.mubr.f32.mxu0 %v7793_v43 }
 0xf2c   :  { %2577 = vmatmul.mubr.f32.gmra.mrb[38].mxu0 %v7680_v62 }
 0xf2d   :  { %2581 = vmatprep.mubr.f32.mxu0 %v7800_v49 }
 0xf30   :  { %2582 = vmatmul.mubr.f32.gmra.mrb[40].mxu0 %v7687_v6 }
 0xf31   :  { %5865 = vmatprep.mubr.msk.f32.mxu0 %vm7144_vm0, %v7145_v1 }
 0xf8b   :  { %v1889_v58 = vpop.xlane.xlu1 %1888 }
 0xf8c   :  { %6706 = vrcp.f32 %v1889_v58  ;;  %v4885_v58 = vld [vmem:[#allocation17 + $0x88] sm:$0xff]  }
 0xf8f   :  { %v1892_v59 = vpop.xlane.xlu1 %1891 }
 0xf90   :  { %6708 = vrcp.f32 %v1892_v59  ;;  %v4886_v59 = vld [vmem:[#allocation17 + $0x90] sm:$0xff]  }
 0xf93   :  { %v1895_v41 = vpop.xlane.xlu1 %1894 }
 0xf94   :  { %6710 = vrcp.f32 %v1895_v41  ;;  %v4887_v41 = vld [vmem:[#allocation17 + $0x98] sm:$0xff]  }
 0xf96   :  { %v6707_v60 = vpop.eup %6706 }
 0xf97   :  { %v1899_v63 = vmul.f32 %v6707_v60, %v7840_v22  ;;  %v2226_v22 = vld [vmem:[%s8192_s27 + $0x8] sm:$0xff]  ;;  %v4888_v60 = vld [vmem:[#allocation17 + $0xa0] sm:$0xff]  }
 0xf99   :  { %5775 = vmatmul.mubr.msk.f32.vlgmr.msra.gmra.mrb[30].mxu1 %vm615_vm5, %v1899_v63  ;;  %v4889_v63 = vld [vmem:[#allocation17 + $0xa8] sm:$0xff]  }
 0xf9a   :  { %v6709_v48 = vpop.eup %6708  ;;  %6272 = vmatpush1.bf16.msra.mxu1 %v6271_v2  ;;  %5777 = vmatprep.mubr.msk.f32.mxu1 %vm7144_vm0, %v7145_v1  ;;  %v4890_v2 = vld [vmem:[#allocation17 + $0xb0] sm:$0xff]  }
 0xf9b   :  { %2267 = vmatprep.subr.mxu1 %v7800_v49  ;;  %v1900_v4 = vmul.f32 %v6709_v48, %v7844_v26  ;;  %v4891_v48 = vld [vmem:[#allocation17 + $0xb8] sm:$0xff]  }
 0xf9d   :  { %5778 = vmatmul.mubr.msk.f32.gmra.mrb[32].mxu1 %vm615_vm5, %v1900_v4  ;;  %v4412_v4 = vld [vmem:[#allocation18] sm:$0xff]  }
 0xf9e   :  { %v6711_v5 = vpop.eup %6710  ;;  %2268 = vmatpush1.msra.mxu1 %v7687_v6  ;;  %5780 = vmatprep.mubr.msk.f32.mxu1 %vm7144_vm0, %v7145_v1 }
 0xf9f   :  { %v1901_v7 = vmul.f32 %v6711_v5, %v7848_v28  ;;  %6273 = vmatprep.subr.bf16.mxu1 %v7143_v0  ;;  %6334 = vmatpush3.bf16.msra.mxu0 %v4412_v4  ;;  %v4892_v5 = vld [vmem:[#allocation18 + $0x8] sm:$0xff]  }
 0xfa0   :  { %6335 = vmatprep.subr.bf16.mxu0 %v7143_v0  ;;  %v4937_v4 = vld [vmem:[#allocation23 + $0x48] sm:$0xff]  }
 0xfa1   :  { %5781 = vmatmul.mubr.msk.f32.gmra.mrb[34].mxu1 %vm615_vm5, %v1901_v7  ;;  %v4893_v7 = vld [vmem:[#allocation18 + $0x10] sm:$0xff]  }
 0xfa2   :  { %2327 = vmatprep.mubr.f32.mxu1 %v7145_v1 }
 0xfa3   :  { %6337 = vmatpush3.bf16.msra.mxu0 %v4892_v5  ;;  %v4929_v5 = vld [vmem:[#allocation23 + $0x8] sm:$0xff]  }
 0xfa4   :  { %6338 = vmatprep.subr.bf16.mxu0 %v7143_v0 }
 0xfa7   :  { %6340 = vmatpush3.bf16.msra.mxu0 %v4893_v7  ;;  %v4938_v7 = vld [vmem:[#allocation23 + $0x50] sm:$0xff]  }
 0xfa8   :  { %6341 = vmatprep.subr.bf16.mxu0 %v7143_v0 }
 0xfdb   :  { %v2082_v8 = vpop.f32.mrb[30].mxu0 }
 0xfdc   :  { %2096 = vrot.lane.b32.xlu1 %v2082_v8, %s7150_s11  ;;  %v5761_v9 = vpop.f32.mrb[31].mxu0  ;;  %v4894_v8 = vld [vmem:[#allocation18 + $0x18] sm:$0xff]  }
 0xfdd   :  { %6343 = vmatpush3.bf16.msra.mxu0 %v4894_v8  ;;  %v4895_v9 = vld [vmem:[#allocation18 + $0x20] sm:$0xff]   ;;  %v4930_v8 = vld [vmem:[#allocation23 + $0x10] sm:$0xff]  }
 0xfde   :  { %6344 = vmatprep.subr.bf16.mxu0 %v7143_v0 }
 0xfdf   :  { %v2087_v61 = vpop.f32.mrb[32].mxu0 }
 0xfe0   :  { %2098 = vrot.lane.b32.xlu1 %v2087_v61, %s7150_s11  ;;  %v5764_v11 = vpop.f32.mrb[33].mxu0  ;;  %v4896_v61 = vld [vmem:[#allocation18 + $0x28] sm:$0xff]  }
 0xfe1   :  { %6346 = vmatpush3.bf16.msra.mxu0 %v4895_v9  ;;  %v4897_v11 = vld [vmem:[#allocation18 + $0x30] sm:$0xff]   ;;  %v4939_v9 = vld [vmem:[#allocation23 + $0x58] sm:$0xff]  }
 0xfe2   :  { %6347 = vmatprep.subr.bf16.mxu0 %v7143_v0 }
 0xfe3   :  { %v2092_v12 = vpop.f32.mrb[34].mxu0 }
 0xfe4   :  { %2100 = vrot.lane.b32.xlu1 %v2092_v12, %s7150_s11  ;;  %v5767_v3 = vpop.f32.mrb[35].mxu0  ;;  %v4898_v12 = vld [vmem:[#allocation18 + $0x38] sm:$0xff]  }
 0xfe5   :  { %6349 = vmatpush3.bf16.msra.mxu0 %v4896_v61  ;;  %v4913_v3 = vld [vmem:[#allocation21 + $0x40] sm:$0xff]  }
 0xfe6   :  { %6350 = vmatprep.subr.bf16.mxu0 %v7143_v0  ;;  %v4932_v61 = vld [vmem:[#allocation23 + $0x20] sm:$0xff]  }
 0xfe9   :  { %6352 = vmatpush3.bf16.msra.mxu0 %v4897_v11  ;;  %v4941_v11 = vld [vmem:[#allocation23 + $0x68] sm:$0xff]  }
 0xfea   :  { %6353 = vmatprep.subr.bf16.mxu0 %v7143_v0 }
 0xfed   :  { %6355 = vmatpush3.bf16.msra.mxu0 %v4898_v12  ;;  %v4934_v12 = vld [vmem:[#allocation23 + $0x30] sm:$0xff]  }
 0xfee   :  { %6381 = vmatprep.subr.bf16.mxu0 %v4913_v3  ;;  %v4943_v3 = vld [vmem:[#allocation23 + $0x78] sm:$0xff]  }
 0xffb   :  { %v5179_v13 = vpop.f32.mrb[36].mxu0 }
 0xffc   :  { %v5180_v14 = vpop.f32.mrb[37].mxu0 }
 0xffd   :  { %v7885_v15 = vadd.f32 %v5180_v14, %v5179_v13  ;;  %v4444_v13 = vld [vmem:[#allocation20] sm:$0xff]   ;;  %v4899_v14 = vld [vmem:[#allocation20 + $0x8] sm:$0xff]  }
 0xfff   :  { %v5182_v16 = vpop.f32.mrb[38].mxu0 }
0x1000   :  { %v5183_v10 = vpop.f32.mrb[39].mxu0 }
0x1001   :  { %v7887_v17 = vadd.f32 %v5183_v10, %v5182_v16  ;;  %v4900_v16 = vld [vmem:[#allocation20 + $0x10] sm:$0xff]   ;;  %v4901_v10 = vld [vmem:[#allocation20 + $0x18] sm:$0xff]  }
0x1003   :  { %v5185_v21 = vpop.f32.mrb[40].mxu0 }
0x1004   :  { %v5186_v18 = vpop.f32.mrb[41].mxu0 }
0x1005   :  { %v7889_v19 = vadd.f32 %v5186_v18, %v5185_v21  ;;  %v4902_v21 = vld [vmem:[#allocation20 + $0x20] sm:$0xff]   ;;  %v4903_v18 = vld [vmem:[#allocation20 + $0x28] sm:$0xff]  }
0x100d   :  { %2228 = vxpose.xlu1.b32.start [1/3] (short) (narrow) %v7894_v20, 8 }
0x1011   :  { %2229 = vxpose.xlu1.b32.cont [2/3] (short) (narrow) %v2226_v22, 8 }
0x1015   :  { %2230 = vxpose.xlu1.b32.end [3/3] (short) (narrow) %v2227_v23, 8 }
0x104e   :  { %v2097_v28 = vpop.permute.xlu1 %2096 }
0x1052   :  { %v2099_v32 = vpop.permute.xlu1 %2098 }
0x1056   :  { %v2101_v38 = vpop.permute.xlu1 %2100 }
0x106c   :  { %v2177_v24 = vpop.f32.mrb[30].mxu1 }
0x106d   :  { %v5776_v25 = vpop.f32.mrb[31].mxu1  ;;  %v2178_v34 = vadd.f32 %v2177_v24, %v2097_v28  ;;  %v4904_v24 = vld [vmem:[#allocation20 + $0x30] sm:$0xff]  }
0x106f   :  { %v2192_v37 = vmul.f32 0.5, %v2178_v34 }
0x1070   :  { %v2182_v26 = vpop.f32.mrb[32].mxu1 }
0x1071   :  { %v5779_v27 = vpop.f32.mrb[33].mxu1  ;;  %v2183_v33 = vadd.f32 %v2182_v26, %v2099_v32  ;;  %v2197_v44 = vsel %vm2191_vm10, %v2192_v37, 0.0 }
0x1072   :  { %v2207_v29 = vadd.f32 %v4112_v45, %v2197_v44  ;;  %v4115_v27 = vld [vmem:[%s8137_s13] ss:$0 sm:$0xff] }
0x1073   :  { %v2193_v36 = vmul.f32 0.5, %v2183_v33  ;;  %v2574_v28 = vadd.f32 %v7885_v15, %v4115_v27  ;;  %v2579_v34 = vadd.f32 %v7887_v17, %v4115_v27  ;;  %v4906_v15 = vld [vmem:[#allocation21 + $0x8] sm:$0xff]  }
0x1074   :  { %v2187_v30 = vpop.f32.mrb[34].mxu1  ;;  %v7909_v53 = vmax.f32 %v2207_v29, 0.0 }
0x1075   :  { %v5782_v31 = vpop.f32.mrb[35].mxu1  ;;  %v2198_v39 = vsel %vm2191_vm10, %v2193_v36, 0.0  ;;  %v2188_v42 = vadd.f32 %v2187_v30, %v2101_v38  ;;  %v4476_v36 = vld [vmem:[#allocation21] sm:$0xff]   ;;  %v4914_v38 = vld [vmem:[#allocation21 + $0x48] sm:$0xff]  }
0x1076   :  { %v2208_v46 = vadd.f32 %v4112_v45, %v2198_v39 }
0x1077   :  { %v2194_v47 = vmul.f32 0.5, %v2188_v42 }
0x1078   :  { %v7907_v50 = vmax.f32 %v2208_v46, 0.0 }
0x1079   :  { %v2199_v52 = vsel %vm2191_vm10, %v2194_v47, 0.0  ;;  %v4915_v47 = vld [vmem:[#allocation21 + $0x50] sm:$0xff]  }
0x107a   :  { %v2209_v54 = vadd.f32 %v4112_v45, %v2199_v52  ;;  %v6274_v51 = vpack.c.bf16 %v7907_v50, %v7909_v53  ;;  %v2584_v45 = vadd.f32 %v7889_v19, %v4115_v27  ;;  %v4908_v19 = vld [vmem:[#allocation21 + $0x18] sm:$0xff]  }
0x107c   :  { %v7917_v55 = vmax.f32 %v2209_v54, 0.0  ;;  %v4907_v54 = vld [vmem:[#allocation21 + $0x10] sm:$0xff]  }
0x108d   :  { %v2244_v40 = vpop.trf.xlu1 }
0x108e   :  { %4113 = vmatmul.mubr.msk.f32.vlgmr.msra.gmra.mrb[36].mxu1 %vm615_vm5, %v2244_v40 }
0x108f   :  { %6275 = vmatpush3.bf16.msra.mxu1 %v6274_v51  ;;  %5789 = vmatprep.mubr.msk.f32.mxu1 %vm7144_vm0, %v7145_v1  ;;  %v4917_v51 = vld [vmem:[#allocation21 + $0x60] sm:$0xff]  }
0x1090   :  { %5787 = vmatprep.subr.mxu1 %v7145_v1 }
0x1093   :  { %5788 = vmatpush3.msra.mxu1 %v7917_v55 }
0x1094   :  { %5790 = vmatmul.mubr.msk.f32.vlgmr.msra.gmra.mrb[38].mxu1 %vm615_vm5, %v2244_v40  ;;  %6308 = vmatprep.subr.bf16.mxu1 %v7143_v0  ;;  %v4916_v40 = vld [vmem:[#allocation21 + $0x58] sm:$0xff]   ;;  %vm4067_vm5 = vcmask 0  }
0x1095   :  { %6310 = vmatpush3.bf16.msra.mxu1 %v4884_v56  ;;  %5824 = vmatprep.mubr.msk.f32.mxu1 %vm7144_vm0, %v7145_v1  ;;  %v4909_v56 = vld [vmem:[#allocation21 + $0x20] sm:$0xff]  }
0x1096   :  { %6311 = vmatprep.subr.bf16.mxu1 %v7143_v0 }
0x1099   :  { %6313 = vmatpush3.bf16.msra.mxu1 %v4885_v58  ;;  %v4918_v58 = vld [vmem:[#allocation21 + $0x68] sm:$0xff]  }
0x109a   :  { %6314 = vmatprep.subr.bf16.mxu1 %v7143_v0 }
0x109d   :  { %6316 = vmatpush3.bf16.msra.mxu1 %v4886_v59  ;;  %v4910_v59 = vld [vmem:[#allocation21 + $0x28] sm:$0xff]  }
0x109e   :  { %6317 = vmatprep.subr.bf16.mxu1 %v7143_v0 }
0x10a1   :  { %6319 = vmatpush3.bf16.msra.mxu1 %v4887_v41  ;;  %v4919_v41 = vld [vmem:[#allocation21 + $0x70] sm:$0xff]  }
0x10a2   :  { %6320 = vmatprep.subr.bf16.mxu1 %v7143_v0 }
0x10a5   :  { %6322 = vmatpush3.bf16.msra.mxu1 %v4888_v60  ;;  %v4911_v60 = vld [vmem:[#allocation21 + $0x30] sm:$0xff]  }
0x10a6   :  { %6323 = vmatprep.subr.bf16.mxu1 %v7143_v0 }
0x10a9   :  { %6325 = vmatpush3.bf16.msra.mxu1 %v4889_v63  ;;  %v4920_v63 = vld [vmem:[#allocation21 + $0x78] sm:$0xff]  }
0x10aa   :  { %6326 = vmatprep.subr.bf16.mxu1 %v7143_v0 }
0x10ad   :  { %6328 = vmatpush3.bf16.msra.mxu1 %v4890_v2  ;;  %v4912_v2 = vld [vmem:[#allocation21 + $0x38] sm:$0xff]  }
0x10ae   :  { %6329 = vmatprep.subr.bf16.mxu1 %v7143_v0 }
0x10b1   :  { %6331 = vmatpush3.bf16.msra.mxu1 %v4891_v48  ;;  %v4936_v48 = vld [vmem:[#allocation23 + $0x40] sm:$0xff]  }
0x10b2   :  { %6356 = vmatprep.subr.bf16.mxu1 %v7143_v0 }
0x10b4   :  { %5825 = vmatmul.mubr.f32.vlgmr.msra.gmra.mrb[40].mxu1 %v7909_v53 }
0x10b5   :  { %5827 = vmatprep.mubr.msk.f32.mxu1 %vm7144_vm0, %v7145_v1  ;;  %6358 = vmatpush3.bf16.msra.mxu1 %v4444_v13  ;;  %v4905_v13 = vld [vmem:[#allocation20 + $0x38] sm:$0xff]  }
0x10b6   :  { %6359 = vmatprep.subr.bf16.mxu1 %v7143_v0 }
0x10b8   :  { %5828 = vmatmul.mubr.f32.gmra.mrb[42].mxu1 %v7907_v50 }
0x10b9   :  { %5830 = vmatprep.mubr.msk.f32.mxu1 %vm7144_vm0, %v7145_v1  ;;  %6361 = vmatpush3.bf16.msra.mxu1 %v4899_v14  ;;  %v4116_v14 = vld [vmem:[%s8139_s15] ss:$0 sm:$0xff] }
0x10ba   :  { %6362 = vmatprep.subr.bf16.mxu1 %v7143_v0 }
0x10bc   :  { %5831 = vmatmul.mubr.f32.gmra.mrb[44].mxu1 %v7917_v55 }
0x10bd   :  { %5906 = vmatprep.mubr.msk.f32.mxu1 %vm7144_vm0, %v7145_v1  ;;  %6364 = vmatpush3.bf16.msra.mxu1 %v4900_v16 }
0x10be   :  { %6365 = vmatprep.subr.bf16.mxu1 %v7143_v0 }
0x10c1   :  { %6367 = vmatpush3.bf16.msra.mxu1 %v4901_v10 }
0x10c2   :  { %6368 = vmatprep.subr.bf16.mxu1 %v7143_v0 }
0x10c5   :  { %6370 = vmatpush3.bf16.msra.mxu1 %v4902_v21 }
0x10c6   :  { %6371 = vmatprep.subr.bf16.mxu1 %v7143_v0 }
0x10c9   :  { %6373 = vmatpush3.bf16.msra.mxu1 %v4903_v18 }
0x10ca   :  { %6374 = vmatprep.subr.bf16.mxu1 %v7143_v0 }
0x10cd   :  { %6376 = vmatpush3.bf16.msra.mxu1 %v4904_v24  ;;  %v4921_v24 = vld [vmem:[#allocation21 + $0x80] sm:$0xff]  }
0x10ce   :  { %6377 = vmatprep.subr.bf16.mxu1 %v7143_v0 }
0x10d1   :  { %6379 = vmatpush3.bf16.msra.mxu1 %v4905_v13 }
0x10d2   :  { %6412 = vmatprep.subr.bf16.mxu1 %v7143_v0 }
0x1161   :  { %v7953_v22 = vpop.f32.mrb[36].mxu1 }
0x1162   :  { %v7955_v23 = vpop.f32.mrb[37].mxu1 }
0x1167   :  { %v7959_v25 = vpop.f32.mrb[38].mxu1 }
0x1168   :  { %v5791_v26 = vpop.f32.mrb[39].mxu1 }
0x1187   :  { %v2653_v30 = vpop.f32.mrb[40].mxu1 }
0x1188   :  { %v2654_v31 = vadd.f32 %v2653_v30, %v2574_v28  ;;  %v5826_v32 = vpop.f32.mrb[41].mxu1 }
0x118a   :  { %v2667_v33 = vmax.f32 %v2654_v31, 0.0  ;;  %v4922_v31 = vld [vmem:[#allocation21 + $0x88] sm:$0xff]  }
0x118b   :  { %v2658_v37 = vpop.f32.mrb[42].mxu1 }
0x118c   :  { %v2659_v39 = vadd.f32 %v2658_v37, %v2579_v34  ;;  %v5829_v42 = vpop.f32.mrb[43].mxu1  ;;  %5866 = vmatmul.mubr.f32.vlgmr.msra.gmra.mrb[42].mxu0 %v2667_v33  ;;  %v4923_v37 = vld [vmem:[#allocation21 + $0x90] sm:$0xff]  }
0x118d   :  { %6383 = vmatpush3.bf16.msra.mxu0 %v4476_v36  ;;  %5868 = vmatprep.mubr.msk.f32.mxu0 %vm7144_vm0, %v7145_v1  ;;  %v4926_v42 = vld [vmem:[#allocation21 + $0xa8] sm:$0xff]  }
0x118e   :  { %v2668_v44 = vmax.f32 %v2659_v39, 0.0  ;;  %6385 = vmatprep.subr.bf16.mxu0 %v4914_v38  ;;  %v4924_v38 = vld [vmem:[#allocation21 + $0x98] sm:$0xff]   ;;  %v4925_v39 = vld [vmem:[#allocation21 + $0xa0] sm:$0xff]  }
0x118f   :  { %v2663_v46 = vpop.f32.mrb[44].mxu1 }
0x1190   :  { %v2664_v29 = vadd.f32 %v2663_v46, %v2584_v45  ;;  %v5832_v52 = vpop.f32.mrb[45].mxu1  ;;  %5869 = vmatmul.mubr.f32.gmra.mrb[44].mxu0 %v2668_v44  ;;  %v4927_v44 = vld [vmem:[#allocation21 + $0xb0] sm:$0xff]   ;;  %v4928_v45 = vld [vmem:[#allocation21 + $0xb8] sm:$0xff]  }
0x1191   :  { %6387 = vmatpush3.bf16.msra.mxu0 %v4906_v15  ;;  %5871 = vmatprep.mubr.msk.f32.mxu0 %vm7144_vm0, %v7145_v1 }
0x1192   :  { %v2669_v17 = vmax.f32 %v2664_v29, 0.0  ;;  %6389 = vmatprep.subr.bf16.mxu0 %v4915_v47  ;;  %v4944_v29 = vld [vmem:[#allocation23 + $0x80] sm:$0xff]  }
0x1194   :  { %5872 = vmatmul.mubr.f32.gmra.mrb[46].mxu0 %v2669_v17 }
0x1195   :  { %6391 = vmatpush3.bf16.msra.mxu0 %v4907_v54  ;;  %3081 = vmatprep.mubr.f32.mxu0 %v7786_v35  ;;  %v4572_v35 = vld [vmem:[#allocation23] sm:$0xff]  }
0x1196   :  { %6393 = vmatprep.subr.bf16.mxu0 %v4916_v40  ;;  %v4945_v40 = vld [vmem:[#allocation23 + $0x88] sm:$0xff]  }
0x1199   :  { %6395 = vmatpush3.bf16.msra.mxu0 %v4908_v19 }
0x119a   :  { %6397 = vmatprep.subr.bf16.mxu0 %v4917_v51 }
0x119d   :  { %6399 = vmatpush3.bf16.msra.mxu0 %v4909_v56 }
0x119e   :  { %6401 = vmatprep.subr.bf16.mxu0 %v4918_v58  ;;  %v4947_v58 = vld [vmem:[#allocation23 + $0x98] sm:$0xff]  }
0x11a1   :  { %6403 = vmatpush3.bf16.msra.mxu0 %v4910_v59  ;;  %v4949_v59 = vld [vmem:[#allocation23 + $0xa8] sm:$0xff]  }
0x11a2   :  { %6405 = vmatprep.subr.bf16.mxu0 %v4919_v41  ;;  %v4950_v41 = vld [vmem:[#allocation23 + $0xb0] sm:$0xff]  }
0x11a5   :  { %6407 = vmatpush3.bf16.msra.mxu0 %v4911_v60 }
0x11a6   :  { %6409 = vmatprep.subr.bf16.mxu0 %v4920_v63 }
0x11a9   :  { %6411 = vmatpush3.bf16.msra.mxu0 %v4912_v2 }
0x11aa   :  { %6437 = vmatprep.subr.bf16.mxu0 %v4936_v48  ;;  %v4668_v48 = vld [vmem:[#allocation24] sm:$0xff]  }
0x11ac   :  { %3082 = vmatmul.mubr.f32.vlgmr.msra.gmra.mrb[48].mxu0 %v7673_v57  ;;  %v4931_v57 = vld [vmem:[#allocation23 + $0x18] sm:$0xff]  }
0x11ad   :  { %3086 = vmatprep.mubr.f32.mxu0 %v7793_v43  ;;  %6439 = vmatpush3.bf16.msra.mxu0 %v4572_v35  ;;  %v4940_v43 = vld [vmem:[#allocation23 + $0x60] sm:$0xff]   ;;  %v4952_v35 = vld [vmem:[#allocation24 + $0x8] sm:$0xff]  }
0x11ae   :  { %6441 = vmatprep.subr.bf16.mxu0 %v4937_v4  ;;  %v4953_v4 = vld [vmem:[#allocation24 + $0x10] sm:$0xff]  }
0x11b0   :  { %3087 = vmatmul.mubr.f32.gmra.mrb[50].mxu0 %v7680_v62  ;;  %v4933_v62 = vld [vmem:[#allocation23 + $0x28] sm:$0xff]  }
0x11b1   :  { %3091 = vmatprep.mubr.f32.mxu0 %v7800_v49  ;;  %6443 = vmatpush3.bf16.msra.mxu0 %v4929_v5  ;;  %v4942_v49 = vld [vmem:[#allocation23 + $0x70] sm:$0xff]   ;;  %v4954_v5 = vld [vmem:[#allocation24 + $0x18] sm:$0xff]  }
0x11b2   :  { %6445 = vmatprep.subr.bf16.mxu0 %v4938_v7  ;;  %v4955_v7 = vld [vmem:[#allocation24 + $0x20] sm:$0xff]  }
0x11b4   :  { %3092 = vmatmul.mubr.f32.gmra.mrb[52].mxu0 %v7687_v6  ;;  %v4935_v6 = vld [vmem:[#allocation23 + $0x38] sm:$0xff]  }
0x11b5   :  { %6447 = vmatpush3.bf16.msra.mxu0 %v4930_v8  ;;  %3347 = vmatprep.mubr.f32.mxu0 %v7955_v23  ;;  %v4956_v8 = vld [vmem:[#allocation24 + $0x28] sm:$0xff]  }
0x11b6   :  { %6449 = vmatprep.subr.bf16.mxu0 %v4939_v9  ;;  %v4957_v9 = vld [vmem:[#allocation24 + $0x30] sm:$0xff]  }
0x11b9   :  { %6451 = vmatpush3.bf16.msra.mxu0 %v4931_v57  ;;  %v4958_v57 = vld [vmem:[#allocation24 + $0x38] sm:$0xff]  }
0x11ba   :  { %6453 = vmatprep.subr.bf16.mxu0 %v4940_v43  ;;  %v4973_v43 = vld [vmem:[#allocation27 + $0x40] sm:$0xff]  }
0x11bd   :  { %6455 = vmatpush3.bf16.msra.mxu0 %v4932_v61  ;;  %v4700_v61 = vld [vmem:[#allocation26] sm:$0xff]  }
0x11be   :  { %6457 = vmatprep.subr.bf16.mxu0 %v4941_v11  ;;  %v4959_v11 = vld [vmem:[#allocation26 + $0x8] sm:$0xff]  }
0x11c1   :  { %6459 = vmatpush3.bf16.msra.mxu0 %v4933_v62  ;;  %v4960_v62 = vld [vmem:[#allocation26 + $0x10] sm:$0xff]  }
0x11c2   :  { %6461 = vmatprep.subr.bf16.mxu0 %v4942_v49  ;;  %v4961_v49 = vld [vmem:[#allocation26 + $0x18] sm:$0xff]  }
0x11c5   :  { %6463 = vmatpush3.bf16.msra.mxu0 %v4934_v12  ;;  %v4962_v12 = vld [vmem:[#allocation26 + $0x20] sm:$0xff]  }
0x11c6   :  { %6465 = vmatprep.subr.bf16.mxu0 %v4943_v3  ;;  %v4963_v3 = vld [vmem:[#allocation26 + $0x28] sm:$0xff]  }
0x11c9   :  { %6467 = vmatpush3.bf16.msra.mxu0 %v4935_v6  ;;  %v4964_v6 = vld [vmem:[#allocation26 + $0x30] sm:$0xff]  }
0x11ca   :  { %6492 = vmatprep.subr.bf16.mxu0 %v7143_v0 }
0x11cc   :  { %3348 = vmatmul.mubr.f32.vlgmr.msra.gmra.mrb[54].mxu0 %v7953_v22 }
0x11cd   :  { %6023 = vmatprep.mubr.msk.f32.mxu0 %vm7144_vm0, %v7145_v1  ;;  %6494 = vmatpush3.bf16.msra.mxu0 %v4668_v48  ;;  %v4977_v48 = vld [vmem:[#allocation27 + $0x60] sm:$0xff]  }
0x11ce   :  { %6495 = vmatprep.subr.bf16.mxu0 %v7143_v0 }
0x11d1   :  { %6497 = vmatpush3.bf16.msra.mxu0 %v4952_v35  ;;  %v4969_v35 = vld [vmem:[#allocation27 + $0x20] sm:$0xff]  }
0x11d2   :  { %6498 = vmatprep.subr.bf16.mxu0 %v7143_v0 }
0x11d5   :  { %6500 = vmatpush3.bf16.msra.mxu0 %v4953_v4  ;;  %v4978_v4 = vld [vmem:[#allocation27 + $0x68] sm:$0xff]  }
0x11d6   :  { %6501 = vmatprep.subr.bf16.mxu0 %v7143_v0 }
0x11d9   :  { %6503 = vmatpush3.bf16.msra.mxu0 %v4954_v5  ;;  %v4970_v5 = vld [vmem:[#allocation27 + $0x28] sm:$0xff]  }
0x11da   :  { %6504 = vmatprep.subr.bf16.mxu0 %v7143_v0 }
0x11dd   :  { %6506 = vmatpush3.bf16.msra.mxu0 %v4955_v7  ;;  %v4979_v7 = vld [vmem:[#allocation27 + $0x70] sm:$0xff]  }
0x11de   :  { %6507 = vmatprep.subr.bf16.mxu0 %v7143_v0 }
0x11e1   :  { %6509 = vmatpush3.bf16.msra.mxu0 %v4956_v8  ;;  %v4980_v8 = vld [vmem:[#allocation27 + $0x78] sm:$0xff]  }
0x11e2   :  { %6510 = vmatprep.subr.bf16.mxu0 %v7143_v0 }
0x11e5   :  { %6512 = vmatpush3.bf16.msra.mxu0 %v4957_v9  ;;  %v4972_v9 = vld [vmem:[#allocation27 + $0x38] sm:$0xff]  }
0x11e6   :  { %6513 = vmatprep.subr.bf16.mxu0 %v7143_v0 }
0x11e9   :  { %6515 = vmatpush3.bf16.msra.mxu0 %v4958_v57  ;;  %v4965_v57 = vld [vmem:[#allocation26 + $0x38] sm:$0xff]  }
0x11ea   :  { %6541 = vmatprep.subr.bf16.mxu0 %v4973_v43  ;;  %v4120_v43 = vld [vmem:[%s8147_s23] ss:$0 sm:$0xff] }
0x125f   :  { %v2775_v16 = vpop.f32.mrb[42].mxu0 }
0x1260   :  { %v2776_v10 = vadd.f32 %v4116_v14, %v2775_v16  ;;  %v5867_v21 = vpop.f32.mrb[43].mxu0 }
0x1262   :  { %v2789_v18 = vmax.f32 %v2776_v10, 0.0 }
0x1263   :  { %v2780_v26 = vpop.f32.mrb[44].mxu0 }
0x1264   :  { %v2781_v27 = vadd.f32 %v4116_v14, %v2780_v26  ;;  %v5870_v28 = vpop.f32.mrb[45].mxu0  ;;  %5907 = vmatmul.mubr.f32.vlgmr.msra.gmra.mrb[46].mxu1 %v2789_v18  ;;  %v4118_v26 = vld [vmem:[%s8143_s19] ss:$0 sm:$0xff] }
0x1265   :  { %6414 = vmatpush3.bf16.msra.mxu1 %v4921_v24  ;;  %5909 = vmatprep.mubr.msk.f32.mxu1 %vm7144_vm0, %v7145_v1  ;;  %v4117_v24 = vld [vmem:[%s8141_s17] ss:$0 sm:$0xff] }
0x1266   :  { %v2790_v30 = vmax.f32 %v2781_v27, 0.0  ;;  %6415 = vmatprep.subr.bf16.mxu1 %v7143_v0 }
0x1267   :  { %v2785_v32 = vpop.f32.mrb[46].mxu0 }
0x1268   :  { %v2786_v33 = vadd.f32 %v4116_v14, %v2785_v32  ;;  %v5873_v34 = vpop.f32.mrb[47].mxu0  ;;  %5910 = vmatmul.mubr.f32.gmra.mrb[48].mxu1 %v2790_v30 }
0x1269   :  { %6417 = vmatpush3.bf16.msra.mxu1 %v4922_v31  ;;  %5912 = vmatprep.mubr.msk.f32.mxu1 %vm7144_vm0, %v7145_v1 }
0x126a   :  { %v2791_v36 = vmax.f32 %v2786_v33, 0.0  ;;  %6418 = vmatprep.subr.bf16.mxu1 %v7143_v0 }
0x126c   :  { %5913 = vmatmul.mubr.f32.gmra.mrb[50].mxu1 %v2791_v36 }
0x126d   :  { %6420 = vmatpush3.bf16.msra.mxu1 %v4923_v37  ;;  %5947 = vmatprep.mubr.msk.f32.mxu1 %vm7144_vm0, %v7145_v1 }
0x126e   :  { %6421 = vmatprep.subr.bf16.mxu1 %v7143_v0 }
0x1271   :  { %6423 = vmatpush3.bf16.msra.mxu1 %v4924_v38 }
0x1272   :  { %6424 = vmatprep.subr.bf16.mxu1 %v7143_v0 }
0x1275   :  { %6426 = vmatpush3.bf16.msra.mxu1 %v4925_v39 }
0x1276   :  { %6427 = vmatprep.subr.bf16.mxu1 %v7143_v0 }
0x1279   :  { %6429 = vmatpush3.bf16.msra.mxu1 %v4926_v42 }
0x127a   :  { %6430 = vmatprep.subr.bf16.mxu1 %v7143_v0 }
0x127d   :  { %6432 = vmatpush3.bf16.msra.mxu1 %v4927_v44 }
0x127e   :  { %6433 = vmatprep.subr.bf16.mxu1 %v7143_v0 }
0x127f   :  { %v5277_v15 = vpop.f32.mrb[48].mxu0 }
0x1280   :  { %v5278_v46 = vpop.f32.mrb[49].mxu0 }
0x1281   :  { %v7999_v47 = vadd.f32 %v5278_v46, %v5277_v15  ;;  %6435 = vmatpush3.bf16.msra.mxu1 %v4928_v45 }
0x1282   :  { %6468 = vmatprep.subr.bf16.mxu1 %v7143_v0 }
0x1283   :  { %v5280_v52 = vpop.f32.mrb[50].mxu0  ;;  %v3084_v28 = vadd.f32 %v7999_v47, %v4118_v26 }
0x1284   :  { %v5281_v17 = vpop.f32.mrb[51].mxu0  ;;  %5948 = vmatmul.mubr.f32.vlgmr.msra.gmra.mrb[52].mxu1 %v7909_v53  ;;  %v4946_v53 = vld [vmem:[#allocation23 + $0x90] sm:$0xff]  }
0x1285   :  { %v8003_v54 = vadd.f32 %v5281_v17, %v5280_v52  ;;  %6470 = vmatpush3.bf16.msra.mxu1 %v4944_v29  ;;  %5950 = vmatprep.mubr.msk.f32.mxu1 %vm7144_vm0, %v7145_v1 }
0x1286   :  { %6471 = vmatprep.subr.bf16.mxu1 %v7143_v0 }
0x1287   :  { %v5283_v19 = vpop.f32.mrb[52].mxu0  ;;  %v3089_v37 = vadd.f32 %v8003_v54, %v4118_v26 }
0x1288   :  { %v5284_v51 = vpop.f32.mrb[53].mxu0  ;;  %5951 = vmatmul.mubr.f32.gmra.mrb[54].mxu1 %v7907_v50  ;;  %v4948_v50 = vld [vmem:[#allocation23 + $0xa0] sm:$0xff]  }
0x1289   :  { %v8009_v56 = vadd.f32 %v5284_v51, %v5283_v19  ;;  %6473 = vmatpush3.bf16.msra.mxu1 %v4945_v40  ;;  %5953 = vmatprep.mubr.msk.f32.mxu1 %vm7144_vm0, %v7145_v1  ;;  %v4119_v19 = vld [vmem:[%s8145_s21] ss:$0 sm:$0xff] }
0x128a   :  { %6474 = vmatprep.subr.bf16.mxu1 %v7143_v0 }
0x128b   :  { %v3094_v46 = vadd.f32 %v8009_v56, %v4118_v26  ;;  %v4966_v56 = vld [vmem:[#allocation27 + $0x8] sm:$0xff]  }
0x128c   :  { %5954 = vmatmul.mubr.f32.gmra.mrb[56].mxu1 %v7917_v55  ;;  %v4951_v55 = vld [vmem:[#allocation23 + $0xb8] sm:$0xff]  }
0x128d   :  { %6476 = vmatpush3.bf16.msra.mxu1 %v4946_v53  ;;  %5988 = vmatprep.mubr.msk.f32.mxu1 %vm7144_vm0, %v7145_v1 }
0x128e   :  { %6477 = vmatprep.subr.bf16.mxu1 %v7143_v0 }
0x1291   :  { %6479 = vmatpush3.bf16.msra.mxu1 %v4947_v58 }
0x1292   :  { %6480 = vmatprep.subr.bf16.mxu1 %v7143_v0 }
0x1295   :  { %6482 = vmatpush3.bf16.msra.mxu1 %v4948_v50 }
0x1296   :  { %6483 = vmatprep.subr.bf16.mxu1 %v7143_v0 }
0x1299   :  { %6485 = vmatpush3.bf16.msra.mxu1 %v4949_v59  ;;  %v4732_v59 = vld [vmem:[#allocation27] sm:$0xff]  }
0x129a   :  { %6486 = vmatprep.subr.bf16.mxu1 %v7143_v0 }
0x129d   :  { %6488 = vmatpush3.bf16.msra.mxu1 %v4950_v41  ;;  %v4974_v41 = vld [vmem:[#allocation27 + $0x48] sm:$0xff]  }
0x129e   :  { %6489 = vmatprep.subr.bf16.mxu1 %v7143_v0 }
0x129f   :  { %v5337_v60 = vpop.f32.mrb[54].mxu0 }
0x12a0   :  { %v5338_v63 = vpop.f32.mrb[55].mxu0 }
0x12a1   :  { %v8022_v2 = vadd.f32 %v5338_v63, %v5337_v60  ;;  %6491 = vmatpush3.bf16.msra.mxu1 %v4951_v55  ;;  %v4975_v55 = vld [vmem:[#allocation27 + $0x50] sm:$0xff]   ;;  %v4976_v63 = vld [vmem:[#allocation27 + $0x58] sm:$0xff]  }
0x12a2   :  { %6516 = vmatprep.subr.bf16.mxu1 %v7143_v0  ;;  %v4967_v60 = vld [vmem:[#allocation27 + $0x10] sm:$0xff]  }
0x12a3   :  { %v3350_v54 = vadd.f32 %v8022_v2, %v4119_v19  ;;  %v4968_v2 = vld [vmem:[#allocation27 + $0x18] sm:$0xff]  }
0x12a4   :  { %5989 = vmatmul.mubr.f32.vlgmr.msra.gmra.mrb[58].mxu1 %v7959_v25 }
0x12a5   :  { %6058 = vmatprep.mubr.msk.f32.mxu1 %vm7144_vm0, %v7145_v1  ;;  %6518 = vmatpush3.bf16.msra.mxu1 %v4700_v61 }
0x12a6   :  { %6519 = vmatprep.subr.bf16.mxu1 %v7143_v0 }
0x12a9   :  { %6521 = vmatpush3.bf16.msra.mxu1 %v4959_v11 }
0x12aa   :  { %6522 = vmatprep.subr.bf16.mxu1 %v7143_v0 }
0x12ad   :  { %6524 = vmatpush3.bf16.msra.mxu1 %v4960_v62 }
0x12ae   :  { %6525 = vmatprep.subr.bf16.mxu1 %v7143_v0 }
0x12b1   :  { %6527 = vmatpush3.bf16.msra.mxu1 %v4961_v49 }
0x12b2   :  { %6528 = vmatprep.subr.bf16.mxu1 %v7143_v0 }
0x12b5   :  { %6530 = vmatpush3.bf16.msra.mxu1 %v4962_v12  ;;  %v4981_v12 = vld [vmem:[#allocation27 + $0x80] sm:$0xff]  }
0x12b6   :  { %6531 = vmatprep.subr.bf16.mxu1 %v7143_v0 }
0x12b9   :  { %6533 = vmatpush3.bf16.msra.mxu1 %v4963_v3  ;;  %v4983_v3 = vld [vmem:[#allocation27 + $0x90] sm:$0xff]  }
0x12ba   :  { %6534 = vmatprep.subr.bf16.mxu1 %v7143_v0 }
0x12bd   :  { %6536 = vmatpush3.bf16.msra.mxu1 %v4964_v6  ;;  %v4984_v6 = vld [vmem:[#allocation27 + $0x98] sm:$0xff]  }
0x12be   :  { %6537 = vmatprep.subr.bf16.mxu1 %v7143_v0 }
0x12c1   :  { %6539 = vmatpush3.bf16.msra.mxu1 %v4965_v57 }
0x12c2   :  { %6572 = vmatprep.subr.bf16.mxu1 %v7143_v0 }
0x1337   :  { %v2897_v13 = vpop.f32.mrb[46].mxu1 }
0x1338   :  { %v5908_v14 = vpop.f32.mrb[47].mxu1  ;;  %v2898_v27 = vadd.f32 %v4117_v24, %v2897_v13  ;;  %v4985_v13 = vld [vmem:[#allocation27 + $0xa0] sm:$0xff]  }
0x1339   :  { %v4986_v14 = vld [vmem:[#allocation27 + $0xa8] sm:$0xff]  }
0x133a   :  { %v2911_v31 = vmax.f32 %v2898_v27, 0.0 }
0x133b   :  { %v2902_v16 = vpop.f32.mrb[48].mxu1 }
0x133c   :  { %v5911_v10 = vpop.f32.mrb[49].mxu1  ;;  %v2903_v32 = vadd.f32 %v4117_v24, %v2902_v16  ;;  %v4987_v16 = vld [vmem:[#allocation27 + $0xb0] sm:$0xff]  }
0x133d   :  { %v4988_v10 = vld [vmem:[#allocation27 + $0xb8] sm:$0xff]  }
0x133e   :  { %v2912_v39 = vmax.f32 %v2903_v32, 0.0 }
0x133f   :  { %v2907_v21 = vpop.f32.mrb[50].mxu1 }
0x1340   :  { %v5914_v18 = vpop.f32.mrb[51].mxu1  ;;  %v2908_v42 = vadd.f32 %v4117_v24, %v2907_v21 }
0x1342   :  { %v2913_v47 = vmax.f32 %v2908_v42, 0.0 }
0x1357   :  { %v3163_v30 = vpop.f32.mrb[52].mxu1 }
0x1358   :  { %v3164_v33 = vadd.f32 %v3163_v30, %v3084_v28  ;;  %v5949_v34 = vpop.f32.mrb[53].mxu1  ;;  %v4121_v28 = vld [vmem:[%s8194_s10] ss:$0 sm:$0xff] }
0x1359   :  { %v4122_v30 = vld [vmem:[%s8195_s18] ss:$0 sm:$0xff] }
0x135a   :  { %v8049_v36 = vadd.f32 %v3164_v33, %v2911_v31 }
0x135b   :  { %v3168_v38 = vpop.f32.mrb[54].mxu1 }
0x135c   :  { %v3169_v44 = vadd.f32 %v3168_v38, %v3089_v37  ;;  %v5952_v45 = vpop.f32.mrb[55].mxu1 }
0x135e   :  { %v8052_v15 = vadd.f32 %v3169_v44, %v2912_v39 }
0x135f   :  { %v3173_v29 = vpop.f32.mrb[56].mxu1 }
0x1360   :  { %v3174_v52 = vadd.f32 %v3173_v29, %v3094_v46  ;;  %v5955_v17 = vpop.f32.mrb[57].mxu1 }
0x1362   :  { %v8055_v40 = vadd.f32 %v3174_v52, %v2913_v47 }
0x1377   :  { %v3419_v51 = vpop.f32.mrb[58].mxu1 }
0x1378   :  { %v3420_v53 = vadd.f32 %v3419_v51, %v3350_v54  ;;  %v5990_v58 = vpop.f32.mrb[59].mxu1 }
0x137a   :  { %v3423_v50 = vmax.f32 %v3420_v53, 0.0 }
0x137c   :  { %6024 = vmatmul.mubr.f32.vlgmr.msra.gmra.mrb[56].mxu0 %v3423_v50 }
0x137d   :  { %6543 = vmatpush3.bf16.msra.mxu0 %v4732_v59  ;;  %3811 = vmatprep.mubr.f32.mxu0 %v7955_v23  ;;  %v4971_v23 = vld [vmem:[#allocation27 + $0x30] sm:$0xff]  }
0x137e   :  { %6545 = vmatprep.subr.bf16.mxu0 %v4974_v41 }
0x1381   :  { %6547 = vmatpush3.bf16.msra.mxu0 %v4966_v56 }
0x1382   :  { %6549 = vmatprep.subr.bf16.mxu0 %v4975_v55 }
0x1385   :  { %6551 = vmatpush3.bf16.msra.mxu0 %v4967_v60 }
0x1386   :  { %6553 = vmatprep.subr.bf16.mxu0 %v4976_v63 }
0x1389   :  { %6555 = vmatpush3.bf16.msra.mxu0 %v4968_v2 }
0x138a   :  { %6557 = vmatprep.subr.bf16.mxu0 %v4977_v48 }
0x138d   :  { %6559 = vmatpush3.bf16.msra.mxu0 %v4969_v35 }
0x138e   :  { %6561 = vmatprep.subr.bf16.mxu0 %v4978_v4  ;;  %v3968_v4 = vsub.f32 1.0, %v7894_v20 }
0x1391   :  { %6563 = vmatpush3.bf16.msra.mxu0 %v4970_v5 }
0x1392   :  { %6565 = vmatprep.subr.bf16.mxu0 %v4979_v7 }
0x1395   :  { %6567 = vmatpush3.bf16.msra.mxu0 %v4971_v23 }
0x1396   :  { %6569 = vmatprep.subr.bf16.mxu0 %v4980_v8  ;;  %v6724_v8 = vld [vmem:[%s8192_s27 + $0x8] sm:$0xff] }
0x1399   :  { %6571 = vmatpush3.bf16.msra.mxu0 %v4972_v9  ;;  %v3969_v9 = vsub.f32 1.0, %v6724_v8 }
0x139a   :  { %6096 = vmatprep.subr.mxu0 %v7145_v1 }
0x139c   :  { %3812 = vmatmul.mubr.f32.vlgmr.msra.gmra.mrb[58].mxu0 %v7953_v22  ;;  %v4982_v22 = vld [vmem:[#allocation27 + $0x88] sm:$0xff]  }
0x139d   :  { %6098 = vmatprep.mubr.msk.f32.mxu0 %vm7144_vm0, %v7145_v1 }
0x144f   :  { %v3529_v61 = vpop.f32.mrb[56].mxu0 }
0x1450   :  { %v3530_v11 = vadd.f32 %v4120_v43, %v3529_v61  ;;  %v6025_v62 = vpop.f32.mrb[57].mxu0  ;;  %v6725_v43 = vld [vmem:[%s8192_s27] sm:$0xff] }
0x1452   :  { %v3533_v49 = vmax.f32 %v3530_v11, 0.0 }
0x1454   :  { %6059 = vmatmul.mubr.f32.vlgmr.msra.gmra.mrb[60].mxu1 %v3533_v49 }
0x1455   :  { %6574 = vmatpush3.bf16.msra.mxu1 %v4981_v12  ;;  %6093 = vmatprep.mubr.msk.f32.mxu1 %vm7144_vm0, %v7145_v1 }
0x1456   :  { %6575 = vmatprep.subr.bf16.mxu1 %v7143_v0 }
0x1459   :  { %6577 = vmatpush3.bf16.msra.mxu1 %v4982_v22 }
0x145a   :  { %6578 = vmatprep.subr.bf16.mxu1 %v7143_v0 }
0x145d   :  { %6580 = vmatpush3.bf16.msra.mxu1 %v4983_v3  ;;  %v6726_v3 = vld [vmem:[%s8192_s27 + $0x10] sm:$0xff] }
0x145e   :  { %6581 = vmatprep.subr.bf16.mxu1 %v7143_v0 }
0x1461   :  { %6583 = vmatpush3.bf16.msra.mxu1 %v4984_v6  ;;  %v3970_v6 = vsub.f32 1.0, %v6726_v3 }
0x1462   :  { %6584 = vmatprep.subr.bf16.mxu1 %v7143_v0 }
0x1465   :  { %6586 = vmatpush3.bf16.msra.mxu1 %v4985_v13 }
0x1466   :  { %6587 = vmatprep.subr.bf16.mxu1 %v7143_v0 }
0x1469   :  { %6589 = vmatpush3.bf16.msra.mxu1 %v4986_v14 }
0x146a   :  { %6590 = vmatprep.subr.bf16.mxu1 %v7143_v0 }
0x146d   :  { %6592 = vmatpush3.bf16.msra.mxu1 %v4987_v16 }
0x146e   :  { %6593 = vmatprep.subr.bf16.mxu1 %v7143_v0 }
0x146f   :  { %v5423_v21 = vpop.f32.mrb[58].mxu0 }
0x1470   :  { %v5424_v18 = vpop.f32.mrb[59].mxu0 }
0x1471   :  { %v5425_v24 = vadd.f32 %v5424_v18, %v5423_v21  ;;  %6595 = vmatpush3.bf16.msra.mxu1 %v4988_v10 }
0x1473   :  { %v3814_v32 = vadd.f32 %v5425_v24, %v4122_v30 }
0x1474   :  { %6094 = vmatmul.mubr.f32.vlgmr.msra.gmra.mrb[62].mxu1 %v7959_v25 }
0x1527   :  { %v3639_v26 = vpop.f32.mrb[60].mxu1 }
0x1528   :  { %v6060_v27 = vpop.f32.mrb[61].mxu1  ;;  %v3640_v31 = vadd.f32 %v4121_v28, %v3639_v26 }
0x152a   :  { %v3643_v33 = vmax.f32 %v3640_v31, 0.0 }
0x1547   :  { %v3883_v0 = vpop.f32.mrb[62].mxu1 }
0x1548   :  { %v3884_v34 = vadd.f32 %v3883_v0, %v3814_v32  ;;  %v6095_v37 = vpop.f32.mrb[63].mxu1 }
0x154a   :  { %v3887_v38 = vadd.f32 %v3884_v34, %v3643_v33 }
0x154c   :  { %6097 = vmatpush3.xpose.msra.mxu0 %v3887_v38 }
0x154f   :  { %6099 = vmatmul.mubr.f32.vlgmr.msra.gmra.mrb[60].mxu0 %v8049_v36 }
0x1550   :  { %6101 = vmatprep.mubr.msk.f32.mxu0 %vm7144_vm0, %v7145_v1 }
0x1553   :  { %6102 = vmatmul.mubr.f32.gmra.mrb[62].mxu0 %v8052_v15 }
0x1554   :  { %6104 = vmatprep.mubr.msk.f32.mxu0 %vm7144_vm0, %v7145_v1  ;;  %vm4004_vm0 = vcmask 23552  }
0x1555   :  { %v4041_v32 = vsel %vm4004_vm0, %v6725_v43, 0.0  ;;  %v4042_v0 = vsel %vm4004_vm0, %v6724_v8, 0.0 }
0x1556   :  { %v4043_v38 = vadd.f32 %v4042_v0, %v4041_v32 }
0x1557   :  { %6105 = vmatmul.mubr.f32.gmra.mrb[64].mxu0 %v8055_v40 }
0x1622   :  { %v3954_v25 = vpop.f32.mrb[60].mxu0 }
0x1623   :  { %v3977_v39 = vand.u32 2147483647, %v3954_v25  ;;  %v6100_v42 = vpop.f32.mrb[61].mxu0  ;;  %v3971_v41 = vsub.f32 0.0, %v3954_v25 }
0x1625   :  { %v3980_v44 = vsub.f32 0.0, %v3977_v39  ;;  %v3974_v55 = vmax.f32 %v3971_v41, 0.0 }
0x1626   :  { %v3959_v45 = vpop.f32.mrb[62].mxu0 }
0x1627   :  { %v3983_v46 = vmul.f32 1.442695, %v3980_v44  ;;  %v3978_v29 = vand.u32 2147483647, %v3959_v45  ;;  %v6103_v47 = vpop.f32.mrb[63].mxu0  ;;  %v3972_v63 = vsub.f32 0.0, %v3959_v45 }
0x1629   :  { %6712 = vpow2.f32 %v3983_v46  ;;  %v3981_v36 = vsub.f32 0.0, %v3978_v29  ;;  %v3975_v7 = vmax.f32 %v3972_v63, 0.0 }
0x162a   :  { %v3964_v52 = vpop.f32.mrb[64].mxu0 }
0x162b   :  { %v3985_v17 = vmul.f32 1.442695, %v3981_v36  ;;  %v3979_v19 = vand.u32 2147483647, %v3964_v52  ;;  %v6106_v54 = vpop.f32.mrb[65].mxu0  ;;  %v3973_v35 = vsub.f32 0.0, %v3964_v52 }
0x162d   :  { %6714 = vpow2.f32 %v3985_v17  ;;  %v3982_v15 = vsub.f32 0.0, %v3979_v19  ;;  %v3976_v62 = vmax.f32 %v3973_v35, 0.0 }
0x162f   :  { %v3987_v51 = vmul.f32 1.442695, %v3982_v15 }
0x1631   :  { %6716 = vpow2.f32 %v3987_v51 }
0x1633   :  { %v6713_v1 = vpop.eup %6712 }
0x1634   :  { %v3989_v40 = vadd.f32 1.0, %v6713_v1 }
0x1636   :  { %6718 = vlog2.f32 %v3989_v40 }
0x1637   :  { %v6715_v53 = vpop.eup %6714 }
0x1638   :  { %v3990_v58 = vadd.f32 1.0, %v6715_v53 }
0x163a   :  { %6720 = vlog2.f32 %v3990_v58 }
0x163b   :  { %v6717_v50 = vpop.eup %6716 }
0x163c   :  { %v3991_v59 = vadd.f32 1.0, %v6717_v50 }
0x163e   :  { %6722 = vlog2.f32 %v3991_v59 }
0x1640   :  { %v6719_v56 = vpop.eup %6718 }
0x1641   :  { %v3993_v60 = vmul.f32 0.6931472, %v6719_v56 }
0x1643   :  { %v3998_v2 = vadd.f32 %v3993_v60, %v3974_v55 }
0x1644   :  { %v6721_v48 = vpop.eup %6720 }
0x1645   :  { %v4020_v5 = vadd.f32 %v3998_v2, %v3954_v25  ;;  %v3995_v23 = vmul.f32 0.6931472, %v6721_v48  ;;  %v4001_v61 = vmul.f32 %v6725_v43, %v3998_v2  ;;  %v4044_v25 = vsel %vm4004_vm0, %v6726_v3, 0.0 }
0x1646   :  { %v4045_v39 = vadd.f32 %v4044_v25, %v4043_v38 }
0x1647   :  { %v3999_v57 = vadd.f32 %v3995_v23, %v3975_v7  ;;  %v4023_v49 = vmul.f32 %v4020_v5, %v3968_v4  ;;  %v4005_v16 = vsel %vm4004_vm0, %v4001_v61, 0.0 }
0x1648   :  { %v6723_v11 = vpop.eup %6722 }
0x1649   :  { %v4021_v12 = vadd.f32 %v3999_v57, %v3959_v45  ;;  %v3997_v20 = vmul.f32 0.6931472, %v6723_v11  ;;  %v4002_v22 = vmul.f32 %v6724_v8, %v3999_v57  ;;  %v4026_v26 = vsel %vm4004_vm0, %v4023_v49, 0.0 }
0x164b   :  { %v4024_v13 = vmul.f32 %v4021_v12, %v3969_v9  ;;  %v4000_v14 = vadd.f32 %v3997_v20, %v3976_v62  ;;  %v4006_v10 = vsel %vm4004_vm0, %v4002_v22, 0.0 }
0x164c   :  { %v4007_v21 = vadd.f32 %v4006_v10, %v4005_v16 }
0x164d   :  { %v4022_v18 = vadd.f32 %v4000_v14, %v3964_v52  ;;  %v4003_v24 = vmul.f32 %v6726_v3, %v4000_v14  ;;  %v4027_v27 = vsel %vm4004_vm0, %v4024_v13, 0.0 }
0x164e   :  { %v4028_v28 = vadd.f32 %v4027_v27, %v4026_v26 }
0x164f   :  { %v4008_v30 = vsel %vm4004_vm0, %v4003_v24, 0.0  ;;  %v4025_v31 = vmul.f32 %v4022_v18, %v3970_v6 }
0x1650   :  { %v4009_v33 = vadd.f32 %v4008_v30, %v4007_v21 }
0x1651   :  { %v4029_v34 = vsel %vm4004_vm0, %v4025_v31, 0.0 }
0x1652   :  { %4010 = vadd.xlane.f32.xlu0 %v4009_v33  ;;  %v4030_v37 = vadd.f32 %v4029_v34, %v4028_v28 }
0x1656   :  { %4031 = vadd.xlane.f32.xlu0 %v4030_v37 }
0x165a   :  { %4046 = vadd.xlane.f32.xlu0 %v4045_v39 }
0x16df   :  { %v4011_v42 = vpop.xlane.xlu0 %4010 }
0x16e0   :  { %v4012_v44 = vrot.slane %v4011_v42, 4 }
0x16e2   :  { %v4013_v45 = vadd.f32 %v4012_v44, %v4011_v42 }
0x16e3   :  { %v4032_v46 = vpop.xlane.xlu0 %4031 }
0x16e4   :  { %v4014_v29 = vrot.slane %v4013_v45, 2  ;;  %v4033_v47 = vrot.slane %v4032_v46, 4 }
0x16e6   :  { %v4034_v36 = vadd.f32 %v4033_v47, %v4032_v46  ;;  %v4015_v52 = vadd.f32 %v4014_v29, %v4013_v45 }
0x16e7   :  { %v4047_v17 = vpop.xlane.xlu0 %4046 }
0x16e8   :  { %v4035_v19 = vrot.slane %v4034_v36, 2  ;;  %v4048_v54 = vrot.slane %v4047_v17, 4  ;;  %v4016_v15 = vrot.slane %v4015_v52, 1 }
0x16ea   :  { %v4049_v51 = vadd.f32 %v4048_v54, %v4047_v17  ;;  %v4017_v1 = vadd.f32 %v4016_v15, %v4015_v52  ;;  %v4036_v40 = vadd.f32 %v4035_v19, %v4034_v36 }
0x16ec   :  { %v4050_v53 = vrot.slane %v4049_v51, 2  ;;  %6596 = vpush %v4017_v1  ;;  %v4037_v58 = vrot.slane %v4036_v40, 1 }
0x16ee   :  { %v4051_v50 = vadd.f32 %v4050_v53, %v4049_v51  ;;  %v4038_v59 = vadd.f32 %v4037_v58, %v4036_v40 }
0x16f0   :  { %6598 = vpush %v4038_v59  ;;  %v4052_v41 = vrot.slane %v4051_v50, 1 }
0x16f2   :  { %v4053_v56 = vadd.f32 %v4052_v41, %v4051_v50 }
0x16f4   :  { %6600 = vpush %v4053_v56 }
0x171d   :  { %s6597_s27 = spop %6596 }
0x171e   :  { %v4019_v55 = vstv %s6597_s27 }
0x171f   :  { %v4056_v35 = vsub.f32 0.0, %v4019_v55 }
0x1721   :  { %s6599_s3 = spop %6598 }
0x1722   :  { %v4040_v48 = vstv %s6599_s3 }
0x1725   :  { %s6601_s7 = spop %6600 }
0x1726   :  { %v4055_v60 = vstv %s6601_s7 }
0x1727   :  { %v4057_v63 = vsub.f32 72.0, %v4055_v60  ;;  %v4062_v2 = vmul.f32 0.6931472, %v4055_v60 }
0x1729   :  { %v4058_v4 = vmul.f32 0.6931472, %v4057_v63  ;;  %v4063_v5 = vadd.f32 %v4062_v2, %v4040_v48 }
0x172b   :  { %v4059_v7 = vsub.f32 %v4056_v35, %v4058_v4  ;;  %v4065_v8 = vmul.f32 0.020833334, %v4063_v5 }
0x172d   :  { %v4061_v23 = vmul.f32 0.041666668, %v4059_v7 }
0x172f   :  { %v4066_v9 = vsub.f32 %v4065_v8, %v4061_v23 }
0x1731   :  { %4068 = vst.msk [vmem:[#allocation29] sm:$0x1] %vm4067_vm5, %v4066_v9 }
0x1732   :  { %7090 = shalt.err (!%p7087_p6)
}
0x1733   :  { %s8196_s13 = sld [smem:[#allocation55_spill]] }
0x1739   :  { %s7091_s25 = scalar_lea.hbm %s8196_s13, 16 }
0x173a   :  { %p7092_p7 = scmp.ne.s32.totalorder %s8196_s13, %s7091_s25  ;;  %p7095_p8 = scmp.lt.u32.totalorder %s7091_s25, %s8196_s13 }
0x173c   :  { %p7097_p9 = pnand %p7095_p8, %p7092_p7 }
0x173e   :  { %7100 = shalt.err (!%p7097_p9)
}
0x173f   :  { %4078 = dma.vmem_to_hbm [thread:$0]  %s4076_s2, 16, %s8196_s13, [#allocation5]  }
0x1740   :  { %7119 = dma.done.wait [#allocation5], 16  }
0x1741   :  { %7120 = vsyncadd [#allocation5], 4294967280 }
0x1742   :  { %4082 = vsyncpa [#allocation4], 1 }
0x1743   :  { %4083 = vsyncpa [#allocation7], 1 }
0x1744   :  { %4084 = vsyncpa [#allocation10], 1 }
0x1745   :  { %4085 = vsyncpa [#allocation13], 1 }
0x1746   :  { %4086 = vsyncpa [#allocation16], 1 }
0x1747   :  { %4087 = vsyncpa [#allocation19], 1 }
0x1748   :  { %4088 = vsyncpa [#allocation22], 1 }
0x1749   :  { %4089 = vsyncpa [#allocation25], 1 }
0x174a   :  { %4090 = vsyncpa [#allocation28], 1 }
0x174b   :  { %4091 = vsyncpa [#allocation5], 1 }

</bundles_post_ra>
